<compile_context>
chip_gen: v7x
topology: tpu7x:2x2x1
jax: 0.10.0
libtpu: 0.0.40
codegen_flags: <defaults>
</compile_context>

<pallas_src>
from functools import partial

import jax
import jax.numpy as jnp
from jax import lax
from jax.experimental import pallas as pl
from jax.experimental.pallas import tpu as pltpu


# ----------------------------------------------------------------------------
# Small helpers
# ----------------------------------------------------------------------------
def _round_up(x, m):
    return ((x + m - 1) // m) * m


def _pick_tile(total, target, align):
    """Largest divisor of `total` that is a multiple of `align` and <= target.
    `total` is assumed to already be a multiple of `align`."""
    if total <= target:
        return total
    best = align
    d = align
    while d <= target:
        if total % d == 0:
            best = d
        d += align
    return best


def _vmem_limit_bytes():
    """Generation-aware scoped-VMEM cap (~5/8 of physical, <= 96 MiB):
    ~40 MiB on v7x (64 MiB physical VMEM), ~80 MiB on v5e/v6e (128 MiB)."""
    try:
        cap = pltpu.get_tpu_info().vmem_capacity_bytes
    except Exception:
        cap = 128 * 1024 * 1024
    return int(min(cap * 5 // 8, 96 * 1024 * 1024))


def _const_spec(shape, index_map):
    """BlockSpec for operands whose block never changes across the grid:
    single-buffered (double buffering would only double resident VMEM)."""
    try:
        return pl.BlockSpec(shape, index_map, pipeline_mode=pl.Buffered(1))
    except Exception:  # older jax: no pipeline_mode / pl.Buffered
        return pl.BlockSpec(shape, index_map)


def _layer_norm(v, g, b, eps=1e-5):
    mu = jnp.mean(v, axis=-1, keepdims=True)
    var = jnp.mean((v - mu) ** 2, axis=-1, keepdims=True)
    return (v - mu) * lax.rsqrt(var + eps) * g + b


# ----------------------------------------------------------------------------
# Timestep embedding MLP (Linear -> SiLU -> Linear) as one small fused kernel
# ----------------------------------------------------------------------------
def _timestep_embed_kernel(ff_ref, w1_ref, b1_ref, w2_ref, b2_ref, o_ref):
    h = jnp.dot(ff_ref[...].astype(jnp.bfloat16), w1_ref[...],
                preferred_element_type=jnp.float32) + b1_ref[...]
    h = h * jax.nn.sigmoid(h)                                  # SiLU
    te = jnp.dot(h.astype(jnp.bfloat16), w2_ref[...],
                 preferred_element_type=jnp.float32) + b2_ref[...]
    o_ref[...] = te.astype(o_ref.dtype)


def timestep_embed(ff, params):
    B, F = ff.shape
    D = params["t1_b"].shape[1]
    return pl.pallas_call(
        _timestep_embed_kernel,
        out_shape=jax.ShapeDtypeStruct((B, D), jnp.bfloat16),
        grid=(1,),
        in_specs=[
            pl.BlockSpec((B, F), lambda i: (0, 0)),
            pl.BlockSpec((F, D), lambda i: (0, 0)),
            pl.BlockSpec((1, D), lambda i: (0, 0)),
            pl.BlockSpec((D, D), lambda i: (0, 0)),
            pl.BlockSpec((1, D), lambda i: (0, 0)),
        ],
        out_specs=pl.BlockSpec((B, D), lambda i: (0, 0)),
    )(ff, params["t1_w"], params["t1_b"], params["t2_w"], params["t2_b"])


# ----------------------------------------------------------------------------
# Fused input stage: project_in (with folded zero-init preprocess conv)
#                    + token-slab assembly (timestep token row 0, seq rows 8..)
# ----------------------------------------------------------------------------
def _in_fuse_kernel(x_ref, te_ref, w_in_ref, o_ref, *, seq_len):
    D = o_ref.shape[2]
    h = jnp.dot(x_ref[0].astype(jnp.bfloat16), w_in_ref[...],
                preferred_element_type=jnp.float32)            # (L, D)
    # first 8-row slab: zeros, then timestep token in row 0 (rows 1..7 padding)
    o_ref[0, pl.ds(0, 8), :] = jnp.zeros((8, D), o_ref.dtype)
    o_ref[0, pl.ds(0, 1), :] = te_ref[0].astype(o_ref.dtype)
    # sequence tokens start at the sublane-aligned row 8 (free view downstream)
    o_ref[0, pl.ds(8, seq_len), :] = h.astype(o_ref.dtype)
    tail = o_ref.shape[1] - 8 - seq_len
    if tail > 0:                                               # static
        o_ref[0, pl.ds(8 + seq_len, tail), :] = jnp.zeros((tail, D), o_ref.dtype)


def fused_project_in(x_lc, te3, w_in, tokens_pad):
    B, L, C = x_lc.shape
    D = w_in.shape[1]
    return pl.pallas_call(
        partial(_in_fuse_kernel, seq_len=L),
        out_shape=jax.ShapeDtypeStruct((B, tokens_pad, D), jnp.bfloat16),
        grid=(B,),
        in_specs=[
            pl.BlockSpec((1, L, C), lambda b: (b, 0, 0)),
            pl.BlockSpec((1, 1, D), lambda b: (b, 0, 0)),
            _const_spec((C, D), lambda b: (0, 0)),
        ],
        out_specs=pl.BlockSpec((1, tokens_pad, D), lambda b: (b, 0, 0)),
        compiler_params=pltpu.CompilerParams(dimension_semantics=("parallel",)),
    )(x_lc, te3, w_in)


# ----------------------------------------------------------------------------
# Fused output stage: drop token rows + project_out (with folded zero-init
# postprocess conv) + NLC->NCL absorbed into an "nt" dot_general
# ----------------------------------------------------------------------------
def _out_fuse_kernel(h_ref, w_out_ref, o_ref, *, seq_len):
    hb = h_ref[0, pl.ds(8, seq_len), :]                        # (L, D), 8-aligned
    # out[c, l] = sum_d W_out_cd[c, d] * h[l, d]  -> (C, L), no transpose
    out = lax.dot_general(w_out_ref[...], hb, (((1,), (1,)), ((), ())),
                          preferred_element_type=jnp.float32)
    o_ref[0] = out.astype(o_ref.dtype)


def fused_project_out(h, w_out_cd, seq_len):
    B, Tp, D = h.shape
    C = w_out_cd.shape[0]
    return pl.pallas_call(
        partial(_out_fuse_kernel, seq_len=seq_len),
        out_shape=jax.ShapeDtypeStruct((B, C, seq_len), jnp.float32),
        grid=(B,),
        in_specs=[
            pl.BlockSpec((1, Tp, D), lambda b: (b, 0, 0)),
            _const_spec((C, D), lambda b: (0, 0)),
        ],
        out_specs=pl.BlockSpec((1, C, seq_len), lambda b: (b, 0, 0)),
        compiler_params=pltpu.CompilerParams(dimension_semantics=("parallel",)),
    )(h, w_out_cd)


# ----------------------------------------------------------------------------
# Attention: pre-LN + flash-style multi-head self-attention + residual
#   grid = (B, q-tiles [parallel], kv-tiles [arbitrary])
# ----------------------------------------------------------------------------
def _attn_kernel(xq_ref, xkv_ref, ln1g_ref, ln1b_ref,
                 wq_ref, wk_ref, wv_ref, wo_ref,
                 o_ref, hq_s, m_s, l_s, acc_s,
                 *, num_heads, dh_real, seq_len):
    j = pl.program_id(2)
    tkv = xkv_ref.shape[1]

    @pl.when(j == 0)
    def _():
        hq_s[...] = _layer_norm(xq_ref[0].astype(jnp.float32),
                                ln1g_ref[...], ln1b_ref[...]).astype(jnp.bfloat16)
        m_s[...] = jnp.full_like(m_s, -jnp.inf)
        l_s[...] = jnp.zeros_like(l_s)
        acc_s[...] = jnp.zeros_like(acc_s)

    hkv = _layer_norm(xkv_ref[0].astype(jnp.float32),
                      ln1g_ref[...], ln1b_ref[...]).astype(jnp.bfloat16)

    # (1, tkv) key-validity row: key 0 = timestep token, keys 8..8+L-1 = sequence
    kidx = j * tkv + lax.broadcasted_iota(jnp.int32, (1, tkv), 1)
    valid = (kidx == 0) | ((kidx >= 8) & (kidx < 8 + seq_len))

    scale = dh_real ** -0.5
    hq = hq_s[...]
    # TODO(synk): lax.fori_loop(..., unroll=2) over heads at production head counts.
    for h in range(num_heads):
        qh = jnp.dot(hq, wq_ref[h], preferred_element_type=jnp.float32)
        kh = jnp.dot(hkv, wk_ref[h], preferred_element_type=jnp.float32)
        vh = jnp.dot(hkv, wv_ref[h], preferred_element_type=jnp.float32)
        # q @ k^T by contracting the (padded, lane-dense) head dims directly.
        s = lax.dot_general(qh.astype(jnp.bfloat16), kh.astype(jnp.bfloat16),
                            (((1,), (1,)), ((), ())),
                            preferred_element_type=jnp.float32) * scale
        s = jnp.where(valid, s, -1e30)
        m_prev = m_s[h]
        m_new = jnp.maximum(m_prev, jnp.max(s, axis=-1, keepdims=True))
        a = jnp.exp(m_prev - m_new)
        p = jnp.exp(s - m_new)
        l_s[h] = a * l_s[h] + jnp.sum(p, axis=-1, keepdims=True)
        acc_s[h] = a * acc_s[h] + jnp.dot(p.astype(jnp.bfloat16),
                                          vh.astype(jnp.bfloat16),
                                          preferred_element_type=jnp.float32)
        m_s[h] = m_new

    @pl.when(j == pl.num_programs(2) - 1)
    def _():
        attn = jnp.zeros(o_ref.shape[1:], jnp.float32)         # (tq, D)
        for h in range(num_heads):
            oh = acc_s[h] * pl.reciprocal(l_s[h], approx=True)
            attn = attn + jnp.dot(oh.astype(jnp.bfloat16), wo_ref[h],
                                  preferred_element_type=jnp.float32)
        o_ref[0] = (xq_ref[0].astype(jnp.float32) + attn).astype(o_ref.dtype)


def attention_block(h, layer, *, num_heads, seq_len, tq=None, tkv=None):
    B, Tp, D = h.shape
    dhp = layer["wq_h"].shape[2]
    dh = D // num_heads
    tq = _pick_tile(Tp, 256, 8) if tq is None else tq
    tkv = _pick_tile(Tp, 256, 8) if tkv is None else tkv
    assert Tp % tq == 0 and Tp % tkv == 0
    nq, nkv = Tp // tq, Tp // tkv

    def cs(shape):
        n = len(shape)
        return _const_spec(shape, lambda b, i, j, n=n: (0,) * n)

    return pl.pallas_call(
        partial(_attn_kernel, num_heads=num_heads, dh_real=dh, seq_len=seq_len),
        out_shape=jax.ShapeDtypeStruct((B, Tp, D), jnp.bfloat16),
        grid=(B, nq, nkv),
        in_specs=[
            pl.BlockSpec((1, tq, D), lambda b, i, j: (b, i, 0)),   # query tile
            pl.BlockSpec((1, tkv, D), lambda b, i, j: (b, j, 0)),  # kv tile
            cs((1, D)), cs((1, D)),                                # ln1 g/b
            cs((num_heads, D, dhp)), cs((num_heads, D, dhp)),      # wq, wk
            cs((num_heads, D, dhp)), cs((num_heads, dhp, D)),      # wv, wo
        ],
        out_specs=pl.BlockSpec((1, tq, D), lambda b, i, j: (b, i, 0)),
        scratch_shapes=[
            pltpu.VMEM((tq, D), jnp.bfloat16),                     # LN1(q tile)
            pltpu.VMEM((num_heads, tq, 1), jnp.float32),           # running max
            pltpu.VMEM((num_heads, tq, 1), jnp.float32),           # running sum
            pltpu.VMEM((num_heads, tq, dhp), jnp.float32),         # running acc
        ],
        compiler_params=pltpu.CompilerParams(
            dimension_semantics=("parallel", "parallel", "arbitrary"),
            vmem_limit_bytes=_vmem_limit_bytes(),
        ),
    )(h, h, layer["ln1_g"], layer["ln1_b"],
      layer["wq_h"], layer["wk_h"], layer["wv_h"], layer["wo_h"])


# ----------------------------------------------------------------------------
# FFN: pre-LN + Linear(4D) + GELU + Linear(D) + residual
#   grid = (B, q-tiles [parallel], H4-tiles [arbitrary, accumulated])
# ----------------------------------------------------------------------------
def _ffn_kernel(x_ref, ln2g_ref, ln2b_ref, w1_ref, b1_ref, w2_ref, b2_ref,
                o_ref, h2_s, acc_s):
    k = pl.program_id(2)

    @pl.when(k == 0)
    def _():
        h2_s[...] = _layer_norm(x_ref[0].astype(jnp.float32),
                                ln2g_ref[...], ln2b_ref[...]).astype(jnp.bfloat16)
        acc_s[...] = jnp.zeros_like(acc_s)

    f = jnp.dot(h2_s[...], w1_ref[...],
                preferred_element_type=jnp.float32) + b1_ref[...]
    # TODO(synk): PyTorch nn.GELU defaults to exact erf; tanh approx used here.
    f = jax.nn.gelu(f)
    acc_s[...] += jnp.dot(f.astype(jnp.bfloat16), w2_ref[...],
                          preferred_element_type=jnp.float32)

    @pl.when(k == pl.num_programs(2) - 1)
    def _():
        o_ref[0] = (x_ref[0].astype(jnp.float32) + acc_s[...]
                    + b2_ref[...]).astype(o_ref.dtype)


def ffn_block(h, layer, *, tq=None, th4=None):
    B, Tp, D = h.shape
    H4 = layer["w1"].shape[1]
    tq = _pick_tile(Tp, 256, 8) if tq is None else tq
    th4 = _pick_tile(H4, 512, 128) if th4 is None else th4
    assert Tp % tq == 0 and H4 % th4 == 0
    nq, nk = Tp // tq, H4 // th4

    def cs(shape):
        n = len(shape)
        return _const_spec(shape, lambda b, i, k, n=n: (0,) * n)

    return pl.pallas_call(
        _ffn_kernel,
        out_shape=jax.ShapeDtypeStruct((B, Tp, D), jnp.bfloat16),
        grid=(B, nq, nk),
        in_specs=[
            pl.BlockSpec((1, tq, D), lambda b, i, k: (b, i, 0)),
            cs((1, D)), cs((1, D)),                                # ln2 g/b
            pl.BlockSpec((D, th4), lambda b, i, k: (0, k)),        # w1 tile
            pl.BlockSpec((1, th4), lambda b, i, k: (0, k)),        # b1 tile
            pl.BlockSpec((th4, D), lambda b, i, k: (k, 0)),        # w2 tile
            cs((1, D)),                                            # b2
        ],
        out_specs=pl.BlockSpec((1, tq, D), lambda b, i, k: (b, i, 0)),
        scratch_shapes=[
            pltpu.VMEM((tq, D), jnp.bfloat16),                     # LN2(x tile)
            pltpu.VMEM((tq, D), jnp.float32),                      # w2 accumulator
        ],
        compiler_params=pltpu.CompilerParams(
            dimension_semantics=("parallel", "parallel", "arbitrary"),
            vmem_limit_bytes=_vmem_limit_bytes(),
        ),
    )(h, layer["ln2_g"], layer["ln2_b"], layer["w1"], layer["b1"],
      layer["w2"], layer["b2"])


# ----------------------------------------------------------------------------
# Parameter init (deterministic) + wrapper's `param *= 0.5`
# ----------------------------------------------------------------------------
def init_params(key, io_channels, embed_dim, depth, num_heads,
                timestep_features_dim=256):
    D, C = embed_dim, io_channels
    H4 = 4 * D
    nh = num_heads
    assert D % nh == 0
    dh = D // nh
    dhp = _round_up(max(dh, 128), 128)     # lane-dense per-head MXU width
    ks = jax.random.split(key, 8 + depth)

    def nrm(k, shape, std=0.02):
        return jax.random.normal(k, shape, jnp.float32) * std

    raw = {
        # FourierFeatures(1, 256): weight (128, 1), std=1.0
        "fourier_w": jax.random.normal(ks[0], (timestep_features_dim // 2, 1),
                                       jnp.float32),
        # to_timestep_embed: Linear(256, D) -> SiLU -> Linear(D, D)
        "t1_w": nrm(ks[1], (timestep_features_dim, D)),
        "t1_b": jnp.zeros((1, D), jnp.float32),
        "t2_w": nrm(ks[2], (D, D)),
        "t2_b": jnp.zeros((1, D), jnp.float32),
        # preprocess / postprocess 1x1 convs: bias-free, zero-init, stored
        # pre-transposed as (C_in, C_out)
        "pre_wt": jnp.zeros((C, C), jnp.float32),
        "post_wt": jnp.zeros((C, C), jnp.float32),
        # project in / out (bias-free)
        "proj_in_w": nrm(ks[3], (C, D)),
        "proj_out_w": nrm(ks[4], (D, C)),
        "layers": [],
    }
    for li in range(depth):
        lk = jax.random.split(ks[8 + li], 6)
        raw["layers"].append({
            "ln1_g": jnp.ones((1, D), jnp.float32),
            "ln1_b": jnp.zeros((1, D), jnp.float32),
            "wq": nrm(lk[0], (D, D)), "wk": nrm(lk[1], (D, D)),
            "wv": nrm(lk[2], (D, D)), "wo": nrm(lk[3], (D, D)),
            "ln2_g": jnp.ones((1, D), jnp.float32),
            "ln2_b": jnp.zeros((1, D), jnp.float32),
            "w1": nrm(lk[4], (D, H4)), "b1": jnp.zeros((1, H4), jnp.float32),
            "w2": nrm(lk[5], (H4, D)), "b2": jnp.zeros((1, D), jnp.float32),
        })

    # DiTUncondWrapper.__init__: every parameter of the inner model *= 0.5
    raw = jax.tree_util.tree_map(lambda p: p * 0.5, raw)

    def bf16(p):
        return p.astype(jnp.bfloat16)

    eye = jnp.eye(C, dtype=jnp.float32)

    def split_qkv(w):  # (D, D) -> (H, D, dhp), head-major, zero-padded lanes
        wh = jnp.transpose(w.reshape(D, nh, dh), (1, 0, 2))
        return bf16(jnp.pad(wh, ((0, 0), (0, 0), (0, dhp - dh))))

    def split_wo(w):   # (D, D) -> (H, dhp, D), zero-padded (dead) rows
        wh = w.reshape(nh, dh, D)
        return bf16(jnp.pad(wh, ((0, 0), (0, dhp - dh), (0, 0))))

    params = {
        "fourier_w": raw["fourier_w"],
        "t1_w": bf16(raw["t1_w"]), "t1_b": raw["t1_b"],
        "t2_w": bf16(raw["t2_w"]), "t2_b": raw["t2_b"],
        # zero-init, bias-free 1x1 convs folded into the projections (exact):
        #   w_in     = (I + pre_wt) @ proj_in_w                      (C, D)
        #   w_out_cd = (proj_out_w @ (I + post_wt))^T                (C, D)
        "w_in": bf16((eye + raw["pre_wt"]) @ raw["proj_in_w"]),
        "w_out_cd": bf16((raw["proj_out_w"] @ (eye + raw["post_wt"])).T),
        "layers": [],
    }
    for lyr in raw["layers"]:
        params["layers"].append({
            "ln1_g": lyr["ln1_g"], "ln1_b": lyr["ln1_b"],
            "wq_h": split_qkv(lyr["wq"]), "wk_h": split_qkv(lyr["wk"]),
            "wv_h": split_qkv(lyr["wv"]), "wo_h": split_wo(lyr["wo"]),
            "ln2_g": lyr["ln2_g"], "ln2_b": lyr["ln2_b"],
            "w1": bf16(lyr["w1"]), "b1": lyr["b1"],
            "w2": bf16(lyr["w2"]), "b2": lyr["b2"],
        })
    return params


# ----------------------------------------------------------------------------
# Forward pass
# ----------------------------------------------------------------------------
def dit_uncond_forward(params, x, t, *, num_heads, tq=None, tkv=None, th4=None):
    """x: (B, C, L) float32, t: (B,) float32 -> (B, C, L) float32."""
    B, C, L = x.shape
    D = params["w_in"].shape[1]
    # row 0: timestep token, rows 1..7: padding, rows 8..8+L-1: sequence tokens
    tokens_pad = 8 + _round_up(L, 8)

    # timestep Fourier features (tiny, plain XLA) + fused 2-layer MLP kernel
    f = 2.0 * jnp.pi * t[:, None] * params["fourier_w"][:, 0][None, :]
    ff = jnp.concatenate([jnp.cos(f), jnp.sin(f)], axis=-1)      # (B, 256)
    te = timestep_embed(ff, params)                               # (B, D) bf16

    # NCL -> NLC on the host (single cheap XLA transpose), then fused
    # project_in (with folded zero-init preprocess conv) + token-slab assembly.
    x_lc = jnp.transpose(x, (0, 2, 1))
    h = fused_project_in(x_lc, te.reshape(B, 1, D), params["w_in"], tokens_pad)

    for layer in params["layers"]:
        # TODO(synk): hide next-layer weight DMA behind compute (P10 cross-call
        # prefetch or layer-pair fusion) -- matters most on v5e.
        h = attention_block(h, layer, num_heads=num_heads, seq_len=L,
                            tq=tq, tkv=tkv)
        h = ffn_block(h, layer, tq=tq, th4=th4)

    # fused project_out (with folded zero-init postprocess conv); NLC -> NCL is
    # absorbed into an "nt" dot_general inside the kernel.
    return fused_project_out(h, params["w_out_cd"], L)


# ----------------------------------------------------------------------------
if __name__ == "__main__":
    batch = 2
    in_channels = 4
    seq_len = 16
    embed_dim = 32
    depth = 2
    num_heads = 4

    key = jax.random.PRNGKey(0)
    k_param, k_x, k_t = jax.random.split(key, 3)

    params = init_params(k_param, in_channels, embed_dim, depth, num_heads)

    x = jax.random.normal(k_x, (batch, in_channels, seq_len), jnp.float32)
    t = jax.random.uniform(k_t, (batch,), jnp.float32)

    # small tiles so the toy run exercises the multi-tile flash / FFN grids
    fwd = jax.jit(partial(dit_uncond_forward, num_heads=num_heads, tq=8, tkv=8))
    out = jax.block_until_ready(fwd(params, x, t))

    assert out.shape == (batch, in_channels, seq_len), out.shape
    assert bool(jnp.all(jnp.isfinite(out)))
    print("KERNEL_OK")
</pallas_src>

<mosaic_0001>
module attributes {stable_mosaic.version = 11 : i64} {
  func.func @_timestep_embed_kernel(%arg0: i32, %arg1: memref<2x256xf32, #tpu.memory_space<vmem>>, %arg2: memref<256x32xbf16, #tpu.memory_space<vmem>>, %arg3: memref<1x32xf32, #tpu.memory_space<vmem>>, %arg4: memref<32x32xbf16, #tpu.memory_space<vmem>>, %arg5: memref<1x32xf32, #tpu.memory_space<vmem>>, %arg6: memref<2x32xbf16, #tpu.memory_space<vmem>>) attributes {dimension_semantics = [#tpu.dimension_semantics<arbitrary>], iteration_bounds = array<i64: 1>, scalar_prefetch = 0 : i64, scratch_operands = 0 : i64, tpu.core_type = #tpu.core_type<tc>, window_params = [{pipeline_mode = #tpu.pipeline_mode<synchronous>, transform_indices = @transform_0, window_bounds = array<i64: 2, 256>}, {pipeline_mode = #tpu.pipeline_mode<synchronous>, transform_indices = @transform_1, window_bounds = array<i64: 256, 32>}, {pipeline_mode = #tpu.pipeline_mode<synchronous>, transform_indices = @transform_2, window_bounds = array<i64: 1, 32>}, {pipeline_mode = #tpu.pipeline_mode<synchronous>, transform_indices = @transform_3, window_bounds = array<i64: 32, 32>}, {pipeline_mode = #tpu.pipeline_mode<synchronous>, transform_indices = @transform_4, window_bounds = array<i64: 1, 32>}, {pipeline_mode = #tpu.pipeline_mode<synchronous>, transform_indices = @transform_5, window_bounds = array<i64: 2, 32>}]} {
    %c0 = arith.constant 0 : index
    %c0_0 = arith.constant 0 : index
    %0 = vector.load %arg1[%c0, %c0_0] : memref<2x256xf32, #tpu.memory_space<vmem>>, vector<2x256xf32>
    %1 = arith.truncf %0 : vector<2x256xf32> to vector<2x256xbf16>
    %c0_1 = arith.constant 0 : index
    %c0_2 = arith.constant 0 : index
    %2 = vector.load %arg2[%c0_1, %c0_2] : memref<256x32xbf16, #tpu.memory_space<vmem>>, vector<256x32xbf16>
    %cst = arith.constant dense<0.000000e+00> : vector<2x32xf32>
    %3 = tpu.matmul %1, %2, %cst {dimension_numbers = #tpu.dot_dimension_numbers<[1], [0], [0], [1], [0, 0, 1, 1], [], []>} : vector<2x256xbf16>, vector<256x32xbf16>, vector<2x32xf32> -> vector<2x32xf32>
    %c0_3 = arith.constant 0 : index
    %c0_4 = arith.constant 0 : index
    %4 = vector.load %arg3[%c0_3, %c0_4] : memref<1x32xf32, #tpu.memory_space<vmem>>, vector<1x32xf32>
    %5 = vector.broadcast %4 : vector<1x32xf32> to vector<2x32xf32>
    %6 = arith.addf %3, %5 : vector<2x32xf32>
    %7 = arith.negf %6 : vector<2x32xf32>
    %8 = math.exp %7 : vector<2x32xf32>
    %cst_5 = arith.constant 1.000000e+00 : f32
    %9 = vector.broadcast %cst_5 : f32 to vector<2x32xf32>
    %10 = arith.addf %9, %8 : vector<2x32xf32>
    %11 = arith.divf %9, %10 : vector<2x32xf32>
    %12 = arith.mulf %6, %11 : vector<2x32xf32>
    %13 = arith.truncf %12 : vector<2x32xf32> to vector<2x32xbf16>
    %c0_6 = arith.constant 0 : index
    %c0_7 = arith.constant 0 : index
    %14 = vector.load %arg4[%c0_6, %c0_7] : memref<32x32xbf16, #tpu.memory_space<vmem>>, vector<32x32xbf16>
    %cst_8 = arith.constant dense<0.000000e+00> : vector<2x32xf32>
    %15 = tpu.matmul %13, %14, %cst_8 {dimension_numbers = #tpu.dot_dimension_numbers<[1], [0], [0], [1], [0, 0, 1, 1], [], []>} : vector<2x32xbf16>, vector<32x32xbf16>, vector<2x32xf32> -> vector<2x32xf32>
    %c0_9 = arith.constant 0 : index
    %c0_10 = arith.constant 0 : index
    %16 = vector.load %arg5[%c0_9, %c0_10] : memref<1x32xf32, #tpu.memory_space<vmem>>, vector<1x32xf32>
    %17 = vector.broadcast %16 : vector<1x32xf32> to vector<2x32xf32>
    %18 = arith.addf %15, %17 : vector<2x32xf32>
    %19 = arith.truncf %18 : vector<2x32xf32> to vector<2x32xbf16>
    %c0_11 = arith.constant 0 : index
    %c0_12 = arith.constant 0 : index
    %20 = vector.load %arg6[%c0_11, %c0_12] : memref<2x32xbf16, #tpu.memory_space<vmem>>, vector<2x32xbf16>
    tpu.vector_store %arg6[%c0_11, %c0_12], %19 {strides = array<i32>} : memref<2x32xbf16, #tpu.memory_space<vmem>>, vector<2x32xbf16>,
    return
  }
  func.func @transform_0(%arg0: i32) -> (i32, i32) {
    %c0_i32 = arith.constant 0 : i32
    %c0_i32_0 = arith.constant 0 : i32
    %c0_i32_1 = arith.constant 0 : i32
    return %c0_i32, %c0_i32_0 : i32, i32
  }
  func.func @transform_1(%arg0: i32) -> (i32, i32) {
    %c0_i32 = arith.constant 0 : i32
    %c0_i32_0 = arith.constant 0 : i32
    %c0_i32_1 = arith.constant 0 : i32
    return %c0_i32, %c0_i32_0 : i32, i32
  }
  func.func @transform_2(%arg0: i32) -> (i32, i32) {
    %c0_i32 = arith.constant 0 : i32
    %c0_i32_0 = arith.constant 0 : i32
    %c0_i32_1 = arith.constant 0 : i32
    return %c0_i32, %c0_i32_0 : i32, i32
  }
  func.func @transform_3(%arg0: i32) -> (i32, i32) {
    %c0_i32 = arith.constant 0 : i32
    %c0_i32_0 = arith.constant 0 : i32
    %c0_i32_1 = arith.constant 0 : i32
    return %c0_i32, %c0_i32_0 : i32, i32
  }
  func.func @transform_4(%arg0: i32) -> (i32, i32) {
    %c0_i32 = arith.constant 0 : i32
    %c0_i32_0 = arith.constant 0 : i32
    %c0_i32_1 = arith.constant 0 : i32
    return %c0_i32, %c0_i32_0 : i32, i32
  }
  func.func @transform_5(%arg0: i32) -> (i32, i32) {
    %c0_i32 = arith.constant 0 : i32
    %c0_i32_0 = arith.constant 0 : i32
    %c0_i32_1 = arith.constant 0 : i32
    return %c0_i32, %c0_i32_0 : i32, i32
  }
}

module attributes {stable_mosaic.version = 11 : i64} {
  func.func @_in_fuse_kernel(%arg0: i32, %arg1: memref<1x16x4xf32, #tpu.memory_space<vmem>>, %arg2: memref<1x1x32xbf16, #tpu.memory_space<vmem>>, %arg3: memref<4x32xbf16, #tpu.memory_space<vmem>>, %arg4: memref<1x24x32xbf16, #tpu.memory_space<vmem>>) attributes {dimension_semantics = [#tpu.dimension_semantics<parallel>], iteration_bounds = array<i64: 2>, scalar_prefetch = 0 : i64, scratch_operands = 0 : i64, tpu.core_type = #tpu.core_type<tc>, window_params = [{transform_indices = @transform_0, window_bounds = array<i64: 1, 16, 4>}, {transform_indices = @transform_1, window_bounds = array<i64: 1, 1, 32>}, {pipeline_mode = #tpu.pipeline_mode<synchronous>, transform_indices = @transform_2, window_bounds = array<i64: 4, 32>}, {transform_indices = @transform_3, window_bounds = array<i64: 1, 24, 32>}]} {
    %c0 = arith.constant 0 : index
    %c0_0 = arith.constant 0 : index
    %c0_1 = arith.constant 0 : index
    %0 = vector.load %arg1[%c0, %c0_0, %c0_1] : memref<1x16x4xf32, #tpu.memory_space<vmem>>, vector<1x16x4xf32>
    %1 = vector.shape_cast %0 : vector<1x16x4xf32> to vector<16x4xf32>
    %2 = arith.truncf %1 : vector<16x4xf32> to vector<16x4xbf16>
    %c0_2 = arith.constant 0 : index
    %c0_3 = arith.constant 0 : index
    %3 = vector.load %arg3[%c0_2, %c0_3] : memref<4x32xbf16, #tpu.memory_space<vmem>>, vector<4x32xbf16>
    %cst = arith.constant dense<0.000000e+00> : vector<16x32xf32>
    %4 = tpu.matmul %2, %3, %cst {dimension_numbers = #tpu.dot_dimension_numbers<[1], [0], [0], [1], [0, 0, 1, 1], [], []>} : vector<16x4xbf16>, vector<4x32xbf16>, vector<16x32xf32> -> vector<16x32xf32>
    %cst_4 = arith.constant 0.000000e+00 : bf16
    %5 = vector.broadcast %cst_4 : bf16 to vector<8x32xbf16>
    %c0_5 = arith.constant 0 : index
    %c0_6 = arith.constant 0 : index
    %c0_7 = arith.constant 0 : index
    %6 = vector.load %arg4[%c0_5, %c0_6, %c0_7] : memref<1x24x32xbf16, #tpu.memory_space<vmem>>, vector<1x8x32xbf16>
    %7 = vector.shape_cast %6 : vector<1x8x32xbf16> to vector<8x32xbf16>
    %8 = vector.shape_cast %5 : vector<8x32xbf16> to vector<1x8x32xbf16>
    tpu.vector_store %arg4[%c0_5, %c0_6, %c0_7], %8 {strides = array<i32>} : memref<1x24x32xbf16, #tpu.memory_space<vmem>>, vector<1x8x32xbf16>,
    %c0_8 = arith.constant 0 : index
    %c0_9 = arith.constant 0 : index
    %c0_10 = arith.constant 0 : index
    %9 = vector.load %arg2[%c0_8, %c0_9, %c0_10] : memref<1x1x32xbf16, #tpu.memory_space<vmem>>, vector<1x1x32xbf16>
    %10 = vector.shape_cast %9 : vector<1x1x32xbf16> to vector<1x32xbf16>
    %c0_11 = arith.constant 0 : index
    %c0_12 = arith.constant 0 : index
    %c0_13 = arith.constant 0 : index
    %11 = vector.load %arg4[%c0_11, %c0_12, %c0_13] : memref<1x24x32xbf16, #tpu.memory_space<vmem>>, vector<1x1x32xbf16>
    %12 = vector.shape_cast %11 : vector<1x1x32xbf16> to vector<1x32xbf16>
    %13 = vector.shape_cast %10 : vector<1x32xbf16> to vector<1x1x32xbf16>
    tpu.vector_store %arg4[%c0_11, %c0_12, %c0_13], %13 {strides = array<i32>} : memref<1x24x32xbf16, #tpu.memory_space<vmem>>, vector<1x1x32xbf16>,
    %14 = arith.truncf %4 : vector<16x32xf32> to vector<16x32xbf16>
    %c0_14 = arith.constant 0 : index
    %c8 = arith.constant 8 : index
    %c0_15 = arith.constant 0 : index
    %15 = vector.load %arg4[%c0_14, %c8, %c0_15] : memref<1x24x32xbf16, #tpu.memory_space<vmem>>, vector<1x16x32xbf16>
    %16 = vector.shape_cast %15 : vector<1x16x32xbf16> to vector<16x32xbf16>
    %17 = vector.shape_cast %14 : vector<16x32xbf16> to vector<1x16x32xbf16>
    tpu.vector_store %arg4[%c0_14, %c8, %c0_15], %17 {strides = array<i32>} : memref<1x24x32xbf16, #tpu.memory_space<vmem>>, vector<1x16x32xbf16>,
    return
  }
  func.func @transform_0(%arg0: i32) -> (i32, i32, i32) {
    %c0_i32 = arith.constant 0 : i32
    %c0_i32_0 = arith.constant 0 : i32
    %c0_i32_1 = arith.constant 0 : i32
    return %arg0, %c0_i32, %c0_i32_0 : i32, i32, i32
  }
  func.func @transform_1(%arg0: i32) -> (i32, i32, i32) {
    %c0_i32 = arith.constant 0 : i32
    %c0_i32_0 = arith.constant 0 : i32
    %c0_i32_1 = arith.constant 0 : i32
    return %arg0, %c0_i32, %c0_i32_0 : i32, i32, i32
  }
  func.func @transform_2(%arg0: i32) -> (i32, i32) {
    %c0_i32 = arith.constant 0 : i32
    %c0_i32_0 = arith.constant 0 : i32
    %c0_i32_1 = arith.constant 0 : i32
    return %c0_i32, %c0_i32_0 : i32, i32
  }
  func.func @transform_3(%arg0: i32) -> (i32, i32, i32) {
    %c0_i32 = arith.constant 0 : i32
    %c0_i32_0 = arith.constant 0 : i32
    %c0_i32_1 = arith.constant 0 : i32
    return %arg0, %c0_i32, %c0_i32_0 : i32, i32, i32
  }
}

module attributes {stable_mosaic.version = 11 : i64} {
  func.func @_attn_kernel(%arg0: i32, %arg1: i32, %arg2: i32, %arg3: memref<1x8x32xbf16, #tpu.memory_space<vmem>>, %arg4: memref<1x8x32xbf16, #tpu.memory_space<vmem>>, %arg5: memref<1x32xf32, #tpu.memory_space<vmem>>, %arg6: memref<1x32xf32, #tpu.memory_space<vmem>>, %arg7: memref<4x32x128xbf16, #tpu.memory_space<vmem>>, %arg8: memref<4x32x128xbf16, #tpu.memory_space<vmem>>, %arg9: memref<4x32x128xbf16, #tpu.memory_space<vmem>>, %arg10: memref<4x128x32xbf16, #tpu.memory_space<vmem>>, %arg11: memref<1x8x32xbf16, #tpu.memory_space<vmem>>, %arg12: memref<8x32xbf16, #tpu.memory_space<vmem>>, %arg13: memref<4x8x1xf32, #tpu.memory_space<vmem>>, %arg14: memref<4x8x1xf32, #tpu.memory_space<vmem>>, %arg15: memref<4x8x128xf32, #tpu.memory_space<vmem>>) attributes {dimension_semantics = [#tpu.dimension_semantics<parallel>, #tpu.dimension_semantics<parallel>, #tpu.dimension_semantics<arbitrary>], iteration_bounds = array<i64: 2, 3, 3>, scalar_prefetch = 0 : i64, scratch_operands = 4 : i64, tpu.core_type = #tpu.core_type<tc>, window_params = [{transform_indices = @transform_0, window_bounds = array<i64: 1, 8, 32>}, {transform_indices = @transform_1, window_bounds = array<i64: 1, 8, 32>}, {pipeline_mode = #tpu.pipeline_mode<synchronous>, transform_indices = @transform_2, window_bounds = array<i64: 1, 32>}, {pipeline_mode = #tpu.pipeline_mode<synchronous>, transform_indices = @transform_3, window_bounds = array<i64: 1, 32>}, {pipeline_mode = #tpu.pipeline_mode<synchronous>, transform_indices = @transform_4, window_bounds = array<i64: 4, 32, 128>}, {pipeline_mode = #tpu.pipeline_mode<synchronous>, transform_indices = @transform_5, window_bounds = array<i64: 4, 32, 128>}, {pipeline_mode = #tpu.pipeline_mode<synchronous>, transform_indices = @transform_6, window_bounds = array<i64: 4, 32, 128>}, {pipeline_mode = #tpu.pipeline_mode<synchronous>, transform_indices = @transform_7, window_bounds = array<i64: 4, 128, 32>}, {transform_indices = @transform_8, window_bounds = array<i64: 1, 8, 32>}]} {
    %c0_i32 = arith.constant 0 : i32
    %0 = arith.cmpi eq, %arg2, %c0_i32 : i32
    %1 = arith.extui %0 : i1 to i32
    %c0_i32_0 = arith.constant 0 : i32
    %2 = arith.cmpi ne, %1, %c0_i32_0 : i32
    scf.if %2 {
      %c0_157 = arith.constant 0 : index
      %c0_158 = arith.constant 0 : index
      %c0_159 = arith.constant 0 : index
      %251 = vector.load %arg3[%c0_157, %c0_158, %c0_159] : memref<1x8x32xbf16, #tpu.memory_space<vmem>>, vector<1x8x32xbf16>
      %252 = vector.shape_cast %251 : vector<1x8x32xbf16> to vector<8x32xbf16>
      %253 = arith.extf %252 : vector<8x32xbf16> to vector<8x32xf32>
      %c0_160 = arith.constant 0 : index
      %c0_161 = arith.constant 0 : index
      %254 = vector.load %arg5[%c0_160, %c0_161] : memref<1x32xf32, #tpu.memory_space<vmem>>, vector<1x32xf32>
      %c0_162 = arith.constant 0 : index
      %c0_163 = arith.constant 0 : index
      %255 = vector.load %arg6[%c0_162, %c0_163] : memref<1x32xf32, #tpu.memory_space<vmem>>, vector<1x32xf32>
      %cst_164 = arith.constant dense<0.000000e+00> : vector<8xf32>
      %256 = vector.multi_reduction <add>, %253, %cst_164 [1] : vector<8x32xf32> to vector<8xf32>
      %257 = vector.shape_cast %256 : vector<8xf32> to vector<8x1xf32>
      %cst_165 = arith.constant 3.200000e+01 : f32
      %258 = vector.broadcast %cst_165 : f32 to vector<8x1xf32>
      %259 = arith.divf %257, %258 : vector<8x1xf32>
      %260 = vector.broadcast %259 : vector<8x1xf32> to vector<8x32xf32>
      %261 = arith.subf %253, %260 : vector<8x32xf32>
      %262 = arith.mulf %261, %261 : vector<8x32xf32>
      %cst_166 = arith.constant dense<0.000000e+00> : vector<8xf32>
      %263 = vector.multi_reduction <add>, %262, %cst_166 [1] : vector<8x32xf32> to vector<8xf32>
      %264 = vector.shape_cast %263 : vector<8xf32> to vector<8x1xf32>
      %cst_167 = arith.constant 3.200000e+01 : f32
      %265 = vector.broadcast %cst_167 : f32 to vector<8x1xf32>
      %266 = arith.divf %264, %265 : vector<8x1xf32>
      %267 = vector.broadcast %259 : vector<8x1xf32> to vector<8x32xf32>
      %268 = arith.subf %253, %267 : vector<8x32xf32>
      %cst_168 = arith.constant 9.99999974E-6 : f32
      %269 = vector.broadcast %cst_168 : f32 to vector<8x1xf32>
      %270 = arith.addf %266, %269 : vector<8x1xf32>
      %271 = math.rsqrt %270 : vector<8x1xf32>
      %272 = vector.broadcast %271 : vector<8x1xf32> to vector<8x32xf32>
      %273 = arith.mulf %268, %272 : vector<8x32xf32>
      %274 = vector.broadcast %254 : vector<1x32xf32> to vector<8x32xf32>
      %275 = arith.mulf %273, %274 : vector<8x32xf32>
      %276 = vector.broadcast %255 : vector<1x32xf32> to vector<8x32xf32>
      %277 = arith.addf %275, %276 : vector<8x32xf32>
      %278 = arith.truncf %277 : vector<8x32xf32> to vector<8x32xbf16>
      %c0_169 = arith.constant 0 : index
      %c0_170 = arith.constant 0 : index
      %279 = vector.load %arg12[%c0_169, %c0_170] : memref<8x32xbf16, #tpu.memory_space<vmem>>, vector<8x32xbf16>
      tpu.vector_store %arg12[%c0_169, %c0_170], %278 {strides = array<i32>} : memref<8x32xbf16, #tpu.memory_space<vmem>>, vector<8x32xbf16>,
      %cst_171 = arith.constant 0xFF800000 : f32
      %280 = vector.broadcast %cst_171 : f32 to vector<4x8x1xf32>
      %c0_172 = arith.constant 0 : index
      %c0_173 = arith.constant 0 : index
      %c0_174 = arith.constant 0 : index
      %281 = vector.load %arg13[%c0_172, %c0_173, %c0_174] : memref<4x8x1xf32, #tpu.memory_space<vmem>>, vector<4x8x1xf32>
      tpu.vector_store %arg13[%c0_172, %c0_173, %c0_174], %280 {strides = array<i32>} : memref<4x8x1xf32, #tpu.memory_space<vmem>>, vector<4x8x1xf32>,
      %cst_175 = arith.constant 0.000000e+00 : f32
      %282 = vector.broadcast %cst_175 : f32 to vector<4x8x1xf32>
      %c0_176 = arith.constant 0 : index
      %c0_177 = arith.constant 0 : index
      %c0_178 = arith.constant 0 : index
      %283 = vector.load %arg14[%c0_176, %c0_177, %c0_178] : memref<4x8x1xf32, #tpu.memory_space<vmem>>, vector<4x8x1xf32>
      tpu.vector_store %arg14[%c0_176, %c0_177, %c0_178], %282 {strides = array<i32>} : memref<4x8x1xf32, #tpu.memory_space<vmem>>, vector<4x8x1xf32>,
      %cst_179 = arith.constant 0.000000e+00 : f32
      %284 = vector.broadcast %cst_179 : f32 to vector<4x8x128xf32>
      %c0_180 = arith.constant 0 : index
      %c0_181 = arith.constant 0 : index
      %c0_182 = arith.constant 0 : index
      %285 = vector.load %arg15[%c0_180, %c0_181, %c0_182] : memref<4x8x128xf32, #tpu.memory_space<vmem>>, vector<4x8x128xf32>
      tpu.vector_store %arg15[%c0_180, %c0_181, %c0_182], %284 {strides = array<i32>} : memref<4x8x128xf32, #tpu.memory_space<vmem>>, vector<4x8x128xf32>,
    } else {
    }
    %c0 = arith.constant 0 : index
    %c0_1 = arith.constant 0 : index
    %c0_2 = arith.constant 0 : index
    %3 = vector.load %arg4[%c0, %c0_1, %c0_2] : memref<1x8x32xbf16, #tpu.memory_space<vmem>>, vector<1x8x32xbf16>
    %4 = vector.shape_cast %3 : vector<1x8x32xbf16> to vector<8x32xbf16>
    %5 = arith.extf %4 : vector<8x32xbf16> to vector<8x32xf32>
    %c0_3 = arith.constant 0 : index
    %c0_4 = arith.constant 0 : index
    %6 = vector.load %arg5[%c0_3, %c0_4] : memref<1x32xf32, #tpu.memory_space<vmem>>, vector<1x32xf32>
    %c0_5 = arith.constant 0 : index
    %c0_6 = arith.constant 0 : index
    %7 = vector.load %arg6[%c0_5, %c0_6] : memref<1x32xf32, #tpu.memory_space<vmem>>, vector<1x32xf32>
    %cst = arith.constant dense<0.000000e+00> : vector<8xf32>
    %8 = vector.multi_reduction <add>, %5, %cst [1] : vector<8x32xf32> to vector<8xf32>
    %9 = vector.shape_cast %8 : vector<8xf32> to vector<8x1xf32>
    %cst_7 = arith.constant 3.200000e+01 : f32
    %10 = vector.broadcast %cst_7 : f32 to vector<8x1xf32>
    %11 = arith.divf %9, %10 : vector<8x1xf32>
    %12 = vector.broadcast %11 : vector<8x1xf32> to vector<8x32xf32>
    %13 = arith.subf %5, %12 : vector<8x32xf32>
    %14 = arith.mulf %13, %13 : vector<8x32xf32>
    %cst_8 = arith.constant dense<0.000000e+00> : vector<8xf32>
    %15 = vector.multi_reduction <add>, %14, %cst_8 [1] : vector<8x32xf32> to vector<8xf32>
    %16 = vector.shape_cast %15 : vector<8xf32> to vector<8x1xf32>
    %cst_9 = arith.constant 3.200000e+01 : f32
    %17 = vector.broadcast %cst_9 : f32 to vector<8x1xf32>
    %18 = arith.divf %16, %17 : vector<8x1xf32>
    %19 = vector.broadcast %11 : vector<8x1xf32> to vector<8x32xf32>
    %20 = arith.subf %5, %19 : vector<8x32xf32>
    %cst_10 = arith.constant 9.99999974E-6 : f32
    %21 = vector.broadcast %cst_10 : f32 to vector<8x1xf32>
    %22 = arith.addf %18, %21 : vector<8x1xf32>
    %23 = math.rsqrt %22 : vector<8x1xf32>
    %24 = vector.broadcast %23 : vector<8x1xf32> to vector<8x32xf32>
    %25 = arith.mulf %20, %24 : vector<8x32xf32>
    %26 = vector.broadcast %6 : vector<1x32xf32> to vector<8x32xf32>
    %27 = arith.mulf %25, %26 : vector<8x32xf32>
    %28 = vector.broadcast %7 : vector<1x32xf32> to vector<8x32xf32>
    %29 = arith.addf %27, %28 : vector<8x32xf32>
    %30 = arith.truncf %29 : vector<8x32xf32> to vector<8x32xbf16>
    %c8_i32 = arith.constant 8 : i32
    %31 = arith.muli %arg2, %c8_i32 : i32
    %32 = tpu.iota {dimensions = array<i32: 1>} : vector<1x8xi32>
    %33 = vector.broadcast %31 : i32 to vector<1x8xi32>
    %34 = arith.addi %33, %32 : vector<1x8xi32>
    %c0_i32_11 = arith.constant 0 : i32
    %35 = vector.broadcast %c0_i32_11 : i32 to vector<1x8xi32>
    %36 = arith.cmpi eq, %34, %35 : vector<1x8xi32>
    %c8_i32_12 = arith.constant 8 : i32
    %37 = vector.broadcast %c8_i32_12 : i32 to vector<1x8xi32>
    %38 = arith.cmpi sge, %34, %37 : vector<1x8xi32>
    %c24_i32 = arith.constant 24 : i32
    %39 = vector.broadcast %c24_i32 : i32 to vector<1x8xi32>
    %40 = arith.cmpi slt, %34, %39 : vector<1x8xi32>
    %41 = arith.andi %38, %40 : vector<1x8xi1>
    %42 = arith.ori %36, %41 : vector<1x8xi1>
    %c0_13 = arith.constant 0 : index
    %c0_14 = arith.constant 0 : index
    %43 = vector.load %arg12[%c0_13, %c0_14] : memref<8x32xbf16, #tpu.memory_space<vmem>>, vector<8x32xbf16>
    %c0_15 = arith.constant 0 : index
    %c0_16 = arith.constant 0 : index
    %c0_17 = arith.constant 0 : index
    %44 = vector.load %arg7[%c0_15, %c0_16, %c0_17] : memref<4x32x128xbf16, #tpu.memory_space<vmem>>, vector<1x32x128xbf16>
    %45 = vector.shape_cast %44 : vector<1x32x128xbf16> to vector<32x128xbf16>
    %cst_18 = arith.constant dense<0.000000e+00> : vector<8x128xf32>
    %46 = tpu.matmul %43, %45, %cst_18 {dimension_numbers = #tpu.dot_dimension_numbers<[1], [0], [0], [1], [0, 0, 1, 1], [], []>} : vector<8x32xbf16>, vector<32x128xbf16>, vector<8x128xf32> -> vector<8x128xf32>
    %c0_19 = arith.constant 0 : index
    %c0_20 = arith.constant 0 : index
    %c0_21 = arith.constant 0 : index
    %47 = vector.load %arg8[%c0_19, %c0_20, %c0_21] : memref<4x32x128xbf16, #tpu.memory_space<vmem>>, vector<1x32x128xbf16>
    %48 = vector.shape_cast %47 : vector<1x32x128xbf16> to vector<32x128xbf16>
    %cst_22 = arith.constant dense<0.000000e+00> : vector<8x128xf32>
    %49 = tpu.matmul %30, %48, %cst_22 {dimension_numbers = #tpu.dot_dimension_numbers<[1], [0], [0], [1], [0, 0, 1, 1], [], []>} : vector<8x32xbf16>, vector<32x128xbf16>, vector<8x128xf32> -> vector<8x128xf32>
    %c0_23 = arith.constant 0 : index
    %c0_24 = arith.constant 0 : index
    %c0_25 = arith.constant 0 : index
    %50 = vector.load %arg9[%c0_23, %c0_24, %c0_25] : memref<4x32x128xbf16, #tpu.memory_space<vmem>>, vector<1x32x128xbf16>
    %51 = vector.shape_cast %50 : vector<1x32x128xbf16> to vector<32x128xbf16>
    %cst_26 = arith.constant dense<0.000000e+00> : vector<8x128xf32>
    %52 = tpu.matmul %30, %51, %cst_26 {dimension_numbers = #tpu.dot_dimension_numbers<[1], [0], [0], [1], [0, 0, 1, 1], [], []>} : vector<8x32xbf16>, vector<32x128xbf16>, vector<8x128xf32> -> vector<8x128xf32>
    %53 = arith.truncf %46 : vector<8x128xf32> to vector<8x128xbf16>
    %54 = arith.truncf %49 : vector<8x128xf32> to vector<8x128xbf16>
    %cst_27 = arith.constant dense<0.000000e+00> : vector<8x8xf32>
    %55 = tpu.matmul %53, %54, %cst_27 {dimension_numbers = #tpu.dot_dimension_numbers<[1], [1], [0], [0], [0, 0, 1, 0], [], []>} : vector<8x128xbf16>, vector<8x128xbf16>, vector<8x8xf32> -> vector<8x8xf32>
    %cst_28 = arith.constant 0.353553385 : f32
    %56 = vector.broadcast %cst_28 : f32 to vector<8x8xf32>
    %57 = arith.mulf %55, %56 : vector<8x8xf32>
    %cst_29 = arith.constant -1.000000e+30 : f32
    %58 = vector.shape_cast %42 : vector<1x8xi1> to vector<1x8xi1>
    %59 = vector.broadcast %58 : vector<1x8xi1> to vector<8x8xi1>
    %60 = vector.broadcast %cst_29 : f32 to vector<8x8xf32>
    %61 = arith.select %59, %57, %60 : vector<8x8xi1>, vector<8x8xf32>
    %c0_30 = arith.constant 0 : index
    %c0_31 = arith.constant 0 : index
    %c0_32 = arith.constant 0 : index
    %62 = vector.load %arg13[%c0_30, %c0_31, %c0_32] : memref<4x8x1xf32, #tpu.memory_space<vmem>>, vector<1x8x1xf32>
    %63 = vector.shape_cast %62 : vector<1x8x1xf32> to vector<8x1xf32>
    %cst_33 = arith.constant dense<0xFF800000> : vector<8xf32>
    %64 = vector.multi_reduction <maximumf>, %61, %cst_33 [1] : vector<8x8xf32> to vector<8xf32>
    %65 = vector.shape_cast %64 : vector<8xf32> to vector<8x1xf32>
    %66 = arith.maximumf %63, %65 : vector<8x1xf32>
    %67 = arith.subf %63, %66 : vector<8x1xf32>
    %68 = math.exp %67 : vector<8x1xf32>
    %69 = vector.broadcast %66 : vector<8x1xf32> to vector<8x8xf32>
    %70 = arith.subf %61, %69 : vector<8x8xf32>
    %71 = math.exp %70 : vector<8x8xf32>
    %c0_34 = arith.constant 0 : index
    %c0_35 = arith.constant 0 : index
    %c0_36 = arith.constant 0 : index
    %72 = vector.load %arg14[%c0_34, %c0_35, %c0_36] : memref<4x8x1xf32, #tpu.memory_space<vmem>>, vector<1x8x1xf32>
    %73 = vector.shape_cast %72 : vector<1x8x1xf32> to vector<8x1xf32>
    %74 = arith.mulf %68, %73 : vector<8x1xf32>
    %cst_37 = arith.constant dense<0.000000e+00> : vector<8xf32>
    %75 = vector.multi_reduction <add>, %71, %cst_37 [1] : vector<8x8xf32> to vector<8xf32>
    %76 = vector.shape_cast %75 : vector<8xf32> to vector<8x1xf32>
    %77 = arith.addf %74, %76 : vector<8x1xf32>
    %c0_38 = arith.constant 0 : index
    %c0_39 = arith.constant 0 : index
    %c0_40 = arith.constant 0 : index
    %78 = vector.load %arg14[%c0_38, %c0_39, %c0_40] : memref<4x8x1xf32, #tpu.memory_space<vmem>>, vector<1x8x1xf32>
    %79 = vector.shape_cast %78 : vector<1x8x1xf32> to vector<8x1xf32>
    %80 = vector.shape_cast %77 : vector<8x1xf32> to vector<1x8x1xf32>
    tpu.vector_store %arg14[%c0_38, %c0_39, %c0_40], %80 {strides = array<i32>} : memref<4x8x1xf32, #tpu.memory_space<vmem>>, vector<1x8x1xf32>,
    %c0_41 = arith.constant 0 : index
    %c0_42 = arith.constant 0 : index
    %c0_43 = arith.constant 0 : index
    %81 = vector.load %arg15[%c0_41, %c0_42, %c0_43] : memref<4x8x128xf32, #tpu.memory_space<vmem>>, vector<1x8x128xf32>
    %82 = vector.shape_cast %81 : vector<1x8x128xf32> to vector<8x128xf32>
    %83 = vector.broadcast %68 : vector<8x1xf32> to vector<8x128xf32>
    %84 = arith.mulf %83, %82 : vector<8x128xf32>
    %85 = arith.truncf %71 : vector<8x8xf32> to vector<8x8xbf16>
    %86 = arith.truncf %52 : vector<8x128xf32> to vector<8x128xbf16>
    %cst_44 = arith.constant dense<0.000000e+00> : vector<8x128xf32>
    %87 = tpu.matmul %85, %86, %cst_44 {dimension_numbers = #tpu.dot_dimension_numbers<[1], [0], [0], [1], [0, 0, 1, 1], [], []>} : vector<8x8xbf16>, vector<8x128xbf16>, vector<8x128xf32> -> vector<8x128xf32>
    %88 = arith.addf %84, %87 : vector<8x128xf32>
    %c0_45 = arith.constant 0 : index
    %c0_46 = arith.constant 0 : index
    %c0_47 = arith.constant 0 : index
    %89 = vector.load %arg15[%c0_45, %c0_46, %c0_47] : memref<4x8x128xf32, #tpu.memory_space<vmem>>, vector<1x8x128xf32>
    %90 = vector.shape_cast %89 : vector<1x8x128xf32> to vector<8x128xf32>
    %91 = vector.shape_cast %88 : vector<8x128xf32> to vector<1x8x128xf32>
    tpu.vector_store %arg15[%c0_45, %c0_46, %c0_47], %91 {strides = array<i32>} : memref<4x8x128xf32, #tpu.memory_space<vmem>>, vector<1x8x128xf32>,
    %c0_48 = arith.constant 0 : index
    %c0_49 = arith.constant 0 : index
    %c0_50 = arith.constant 0 : index
    %92 = vector.load %arg13[%c0_48, %c0_49, %c0_50] : memref<4x8x1xf32, #tpu.memory_space<vmem>>, vector<1x8x1xf32>
    %93 = vector.shape_cast %92 : vector<1x8x1xf32> to vector<8x1xf32>
    %94 = vector.shape_cast %66 : vector<8x1xf32> to vector<1x8x1xf32>
    tpu.vector_store %arg13[%c0_48, %c0_49, %c0_50], %94 {strides = array<i32>} : memref<4x8x1xf32, #tpu.memory_space<vmem>>, vector<1x8x1xf32>,
    %c1 = arith.constant 1 : index
    %c0_51 = arith.constant 0 : index
    %c0_52 = arith.constant 0 : index
    %95 = vector.load %arg7[%c1, %c0_51, %c0_52] : memref<4x32x128xbf16, #tpu.memory_space<vmem>>, vector<1x32x128xbf16>
    %96 = vector.shape_cast %95 : vector<1x32x128xbf16> to vector<32x128xbf16>
    %cst_53 = arith.constant dense<0.000000e+00> : vector<8x128xf32>
    %97 = tpu.matmul %43, %96, %cst_53 {dimension_numbers = #tpu.dot_dimension_numbers<[1], [0], [0], [1], [0, 0, 1, 1], [], []>} : vector<8x32xbf16>, vector<32x128xbf16>, vector<8x128xf32> -> vector<8x128xf32>
    %c1_54 = arith.constant 1 : index
    %c0_55 = arith.constant 0 : index
    %c0_56 = arith.constant 0 : index
    %98 = vector.load %arg8[%c1_54, %c0_55, %c0_56] : memref<4x32x128xbf16, #tpu.memory_space<vmem>>, vector<1x32x128xbf16>
    %99 = vector.shape_cast %98 : vector<1x32x128xbf16> to vector<32x128xbf16>
    %cst_57 = arith.constant dense<0.000000e+00> : vector<8x128xf32>
    %100 = tpu.matmul %30, %99, %cst_57 {dimension_numbers = #tpu.dot_dimension_numbers<[1], [0], [0], [1], [0, 0, 1, 1], [], []>} : vector<8x32xbf16>, vector<32x128xbf16>, vector<8x128xf32> -> vector<8x128xf32>
    %c1_58 = arith.constant 1 : index
    %c0_59 = arith.constant 0 : index
    %c0_60 = arith.constant 0 : index
    %101 = vector.load %arg9[%c1_58, %c0_59, %c0_60] : memref<4x32x128xbf16, #tpu.memory_space<vmem>>, vector<1x32x128xbf16>
    %102 = vector.shape_cast %101 : vector<1x32x128xbf16> to vector<32x128xbf16>
    %cst_61 = arith.constant dense<0.000000e+00> : vector<8x128xf32>
    %103 = tpu.matmul %30, %102, %cst_61 {dimension_numbers = #tpu.dot_dimension_numbers<[1], [0], [0], [1], [0, 0, 1, 1], [], []>} : vector<8x32xbf16>, vector<32x128xbf16>, vector<8x128xf32> -> vector<8x128xf32>
    %104 = arith.truncf %97 : vector<8x128xf32> to vector<8x128xbf16>
    %105 = arith.truncf %100 : vector<8x128xf32> to vector<8x128xbf16>
    %cst_62 = arith.constant dense<0.000000e+00> : vector<8x8xf32>
    %106 = tpu.matmul %104, %105, %cst_62 {dimension_numbers = #tpu.dot_dimension_numbers<[1], [1], [0], [0], [0, 0, 1, 0], [], []>} : vector<8x128xbf16>, vector<8x128xbf16>, vector<8x8xf32> -> vector<8x8xf32>
    %cst_63 = arith.constant 0.353553385 : f32
    %107 = vector.broadcast %cst_63 : f32 to vector<8x8xf32>
    %108 = arith.mulf %106, %107 : vector<8x8xf32>
    %cst_64 = arith.constant -1.000000e+30 : f32
    %109 = vector.shape_cast %42 : vector<1x8xi1> to vector<1x8xi1>
    %110 = vector.broadcast %109 : vector<1x8xi1> to vector<8x8xi1>
    %111 = vector.broadcast %cst_64 : f32 to vector<8x8xf32>
    %112 = arith.select %110, %108, %111 : vector<8x8xi1>, vector<8x8xf32>
    %c1_65 = arith.constant 1 : index
    %c0_66 = arith.constant 0 : index
    %c0_67 = arith.constant 0 : index
    %113 = vector.load %arg13[%c1_65, %c0_66, %c0_67] : memref<4x8x1xf32, #tpu.memory_space<vmem>>, vector<1x8x1xf32>
    %114 = vector.shape_cast %113 : vector<1x8x1xf32> to vector<8x1xf32>
    %cst_68 = arith.constant dense<0xFF800000> : vector<8xf32>
    %115 = vector.multi_reduction <maximumf>, %112, %cst_68 [1] : vector<8x8xf32> to vector<8xf32>
    %116 = vector.shape_cast %115 : vector<8xf32> to vector<8x1xf32>
    %117 = arith.maximumf %114, %116 : vector<8x1xf32>
    %118 = arith.subf %114, %117 : vector<8x1xf32>
    %119 = math.exp %118 : vector<8x1xf32>
    %120 = vector.broadcast %117 : vector<8x1xf32> to vector<8x8xf32>
    %121 = arith.subf %112, %120 : vector<8x8xf32>
    %122 = math.exp %121 : vector<8x8xf32>
    %c1_69 = arith.constant 1 : index
    %c0_70 = arith.constant 0 : index
    %c0_71 = arith.constant 0 : index
    %123 = vector.load %arg14[%c1_69, %c0_70, %c0_71] : memref<4x8x1xf32, #tpu.memory_space<vmem>>, vector<1x8x1xf32>
    %124 = vector.shape_cast %123 : vector<1x8x1xf32> to vector<8x1xf32>
    %125 = arith.mulf %119, %124 : vector<8x1xf32>
    %cst_72 = arith.constant dense<0.000000e+00> : vector<8xf32>
    %126 = vector.multi_reduction <add>, %122, %cst_72 [1] : vector<8x8xf32> to vector<8xf32>
    %127 = vector.shape_cast %126 : vector<8xf32> to vector<8x1xf32>
    %128 = arith.addf %125, %127 : vector<8x1xf32>
    %c1_73 = arith.constant 1 : index
    %c0_74 = arith.constant 0 : index
    %c0_75 = arith.constant 0 : index
    %129 = vector.load %arg14[%c1_73, %c0_74, %c0_75] : memref<4x8x1xf32, #tpu.memory_space<vmem>>, vector<1x8x1xf32>
    %130 = vector.shape_cast %129 : vector<1x8x1xf32> to vector<8x1xf32>
    %131 = vector.shape_cast %128 : vector<8x1xf32> to vector<1x8x1xf32>
    tpu.vector_store %arg14[%c1_73, %c0_74, %c0_75], %131 {strides = array<i32>} : memref<4x8x1xf32, #tpu.memory_space<vmem>>, vector<1x8x1xf32>,
    %c1_76 = arith.constant 1 : index
    %c0_77 = arith.constant 0 : index
    %c0_78 = arith.constant 0 : index
    %132 = vector.load %arg15[%c1_76, %c0_77, %c0_78] : memref<4x8x128xf32, #tpu.memory_space<vmem>>, vector<1x8x128xf32>
    %133 = vector.shape_cast %132 : vector<1x8x128xf32> to vector<8x128xf32>
    %134 = vector.broadcast %119 : vector<8x1xf32> to vector<8x128xf32>
    %135 = arith.mulf %134, %133 : vector<8x128xf32>
    %136 = arith.truncf %122 : vector<8x8xf32> to vector<8x8xbf16>
    %137 = arith.truncf %103 : vector<8x128xf32> to vector<8x128xbf16>
    %cst_79 = arith.constant dense<0.000000e+00> : vector<8x128xf32>
    %138 = tpu.matmul %136, %137, %cst_79 {dimension_numbers = #tpu.dot_dimension_numbers<[1], [0], [0], [1], [0, 0, 1, 1], [], []>} : vector<8x8xbf16>, vector<8x128xbf16>, vector<8x128xf32> -> vector<8x128xf32>
    %139 = arith.addf %135, %138 : vector<8x128xf32>
    %c1_80 = arith.constant 1 : index
    %c0_81 = arith.constant 0 : index
    %c0_82 = arith.constant 0 : index
    %140 = vector.load %arg15[%c1_80, %c0_81, %c0_82] : memref<4x8x128xf32, #tpu.memory_space<vmem>>, vector<1x8x128xf32>
    %141 = vector.shape_cast %140 : vector<1x8x128xf32> to vector<8x128xf32>
    %142 = vector.shape_cast %139 : vector<8x128xf32> to vector<1x8x128xf32>
    tpu.vector_store %arg15[%c1_80, %c0_81, %c0_82], %142 {strides = array<i32>} : memref<4x8x128xf32, #tpu.memory_space<vmem>>, vector<1x8x128xf32>,
    %c1_83 = arith.constant 1 : index
    %c0_84 = arith.constant 0 : index
    %c0_85 = arith.constant 0 : index
    %143 = vector.load %arg13[%c1_83, %c0_84, %c0_85] : memref<4x8x1xf32, #tpu.memory_space<vmem>>, vector<1x8x1xf32>
    %144 = vector.shape_cast %143 : vector<1x8x1xf32> to vector<8x1xf32>
    %145 = vector.shape_cast %117 : vector<8x1xf32> to vector<1x8x1xf32>
    tpu.vector_store %arg13[%c1_83, %c0_84, %c0_85], %145 {strides = array<i32>} : memref<4x8x1xf32, #tpu.memory_space<vmem>>, vector<1x8x1xf32>,
    %c2 = arith.constant 2 : index
    %c0_86 = arith.constant 0 : index
    %c0_87 = arith.constant 0 : index
    %146 = vector.load %arg7[%c2, %c0_86, %c0_87] : memref<4x32x128xbf16, #tpu.memory_space<vmem>>, vector<1x32x128xbf16>
    %147 = vector.shape_cast %146 : vector<1x32x128xbf16> to vector<32x128xbf16>
    %cst_88 = arith.constant dense<0.000000e+00> : vector<8x128xf32>
    %148 = tpu.matmul %43, %147, %cst_88 {dimension_numbers = #tpu.dot_dimension_numbers<[1], [0], [0], [1], [0, 0, 1, 1], [], []>} : vector<8x32xbf16>, vector<32x128xbf16>, vector<8x128xf32> -> vector<8x128xf32>
    %c2_89 = arith.constant 2 : index
    %c0_90 = arith.constant 0 : index
    %c0_91 = arith.constant 0 : index
    %149 = vector.load %arg8[%c2_89, %c0_90, %c0_91] : memref<4x32x128xbf16, #tpu.memory_space<vmem>>, vector<1x32x128xbf16>
    %150 = vector.shape_cast %149 : vector<1x32x128xbf16> to vector<32x128xbf16>
    %cst_92 = arith.constant dense<0.000000e+00> : vector<8x128xf32>
    %151 = tpu.matmul %30, %150, %cst_92 {dimension_numbers = #tpu.dot_dimension_numbers<[1], [0], [0], [1], [0, 0, 1, 1], [], []>} : vector<8x32xbf16>, vector<32x128xbf16>, vector<8x128xf32> -> vector<8x128xf32>
    %c2_93 = arith.constant 2 : index
    %c0_94 = arith.constant 0 : index
    %c0_95 = arith.constant 0 : index
    %152 = vector.load %arg9[%c2_93, %c0_94, %c0_95] : memref<4x32x128xbf16, #tpu.memory_space<vmem>>, vector<1x32x128xbf16>
    %153 = vector.shape_cast %152 : vector<1x32x128xbf16> to vector<32x128xbf16>
    %cst_96 = arith.constant dense<0.000000e+00> : vector<8x128xf32>
    %154 = tpu.matmul %30, %153, %cst_96 {dimension_numbers = #tpu.dot_dimension_numbers<[1], [0], [0], [1], [0, 0, 1, 1], [], []>} : vector<8x32xbf16>, vector<32x128xbf16>, vector<8x128xf32> -> vector<8x128xf32>
    %155 = arith.truncf %148 : vector<8x128xf32> to vector<8x128xbf16>
    %156 = arith.truncf %151 : vector<8x128xf32> to vector<8x128xbf16>
    %cst_97 = arith.constant dense<0.000000e+00> : vector<8x8xf32>
    %157 = tpu.matmul %155, %156, %cst_97 {dimension_numbers = #tpu.dot_dimension_numbers<[1], [1], [0], [0], [0, 0, 1, 0], [], []>} : vector<8x128xbf16>, vector<8x128xbf16>, vector<8x8xf32> -> vector<8x8xf32>
    %cst_98 = arith.constant 0.353553385 : f32
    %158 = vector.broadcast %cst_98 : f32 to vector<8x8xf32>
    %159 = arith.mulf %157, %158 : vector<8x8xf32>
    %cst_99 = arith.constant -1.000000e+30 : f32
    %160 = vector.shape_cast %42 : vector<1x8xi1> to vector<1x8xi1>
    %161 = vector.broadcast %160 : vector<1x8xi1> to vector<8x8xi1>
    %162 = vector.broadcast %cst_99 : f32 to vector<8x8xf32>
    %163 = arith.select %161, %159, %162 : vector<8x8xi1>, vector<8x8xf32>
    %c2_100 = arith.constant 2 : index
    %c0_101 = arith.constant 0 : index
    %c0_102 = arith.constant 0 : index
    %164 = vector.load %arg13[%c2_100, %c0_101, %c0_102] : memref<4x8x1xf32, #tpu.memory_space<vmem>>, vector<1x8x1xf32>
    %165 = vector.shape_cast %164 : vector<1x8x1xf32> to vector<8x1xf32>
    %cst_103 = arith.constant dense<0xFF800000> : vector<8xf32>
    %166 = vector.multi_reduction <maximumf>, %163, %cst_103 [1] : vector<8x8xf32> to vector<8xf32>
    %167 = vector.shape_cast %166 : vector<8xf32> to vector<8x1xf32>
    %168 = arith.maximumf %165, %167 : vector<8x1xf32>
    %169 = arith.subf %165, %168 : vector<8x1xf32>
    %170 = math.exp %169 : vector<8x1xf32>
    %171 = vector.broadcast %168 : vector<8x1xf32> to vector<8x8xf32>
    %172 = arith.subf %163, %171 : vector<8x8xf32>
    %173 = math.exp %172 : vector<8x8xf32>
    %c2_104 = arith.constant 2 : index
    %c0_105 = arith.constant 0 : index
    %c0_106 = arith.constant 0 : index
    %174 = vector.load %arg14[%c2_104, %c0_105, %c0_106] : memref<4x8x1xf32, #tpu.memory_space<vmem>>, vector<1x8x1xf32>
    %175 = vector.shape_cast %174 : vector<1x8x1xf32> to vector<8x1xf32>
    %176 = arith.mulf %170, %175 : vector<8x1xf32>
    %cst_107 = arith.constant dense<0.000000e+00> : vector<8xf32>
    %177 = vector.multi_reduction <add>, %173, %cst_107 [1] : vector<8x8xf32> to vector<8xf32>
    %178 = vector.shape_cast %177 : vector<8xf32> to vector<8x1xf32>
    %179 = arith.addf %176, %178 : vector<8x1xf32>
    %c2_108 = arith.constant 2 : index
    %c0_109 = arith.constant 0 : index
    %c0_110 = arith.constant 0 : index
    %180 = vector.load %arg14[%c2_108, %c0_109, %c0_110] : memref<4x8x1xf32, #tpu.memory_space<vmem>>, vector<1x8x1xf32>
    %181 = vector.shape_cast %180 : vector<1x8x1xf32> to vector<8x1xf32>
    %182 = vector.shape_cast %179 : vector<8x1xf32> to vector<1x8x1xf32>
    tpu.vector_store %arg14[%c2_108, %c0_109, %c0_110], %182 {strides = array<i32>} : memref<4x8x1xf32, #tpu.memory_space<vmem>>, vector<1x8x1xf32>,
    %c2_111 = arith.constant 2 : index
    %c0_112 = arith.constant 0 : index
    %c0_113 = arith.constant 0 : index
    %183 = vector.load %arg15[%c2_111, %c0_112, %c0_113] : memref<4x8x128xf32, #tpu.memory_space<vmem>>, vector<1x8x128xf32>
    %184 = vector.shape_cast %183 : vector<1x8x128xf32> to vector<8x128xf32>
    %185 = vector.broadcast %170 : vector<8x1xf32> to vector<8x128xf32>
    %186 = arith.mulf %185, %184 : vector<8x128xf32>
    %187 = arith.truncf %173 : vector<8x8xf32> to vector<8x8xbf16>
    %188 = arith.truncf %154 : vector<8x128xf32> to vector<8x128xbf16>
    %cst_114 = arith.constant dense<0.000000e+00> : vector<8x128xf32>
    %189 = tpu.matmul %187, %188, %cst_114 {dimension_numbers = #tpu.dot_dimension_numbers<[1], [0], [0], [1], [0, 0, 1, 1], [], []>} : vector<8x8xbf16>, vector<8x128xbf16>, vector<8x128xf32> -> vector<8x128xf32>
    %190 = arith.addf %186, %189 : vector<8x128xf32>
    %c2_115 = arith.constant 2 : index
    %c0_116 = arith.constant 0 : index
    %c0_117 = arith.constant 0 : index
    %191 = vector.load %arg15[%c2_115, %c0_116, %c0_117] : memref<4x8x128xf32, #tpu.memory_space<vmem>>, vector<1x8x128xf32>
    %192 = vector.shape_cast %191 : vector<1x8x128xf32> to vector<8x128xf32>
    %193 = vector.shape_cast %190 : vector<8x128xf32> to vector<1x8x128xf32>
    tpu.vector_store %arg15[%c2_115, %c0_116, %c0_117], %193 {strides = array<i32>} : memref<4x8x128xf32, #tpu.memory_space<vmem>>, vector<1x8x128xf32>,
    %c2_118 = arith.constant 2 : index
    %c0_119 = arith.constant 0 : index
    %c0_120 = arith.constant 0 : index
    %194 = vector.load %arg13[%c2_118, %c0_119, %c0_120] : memref<4x8x1xf32, #tpu.memory_space<vmem>>, vector<1x8x1xf32>
    %195 = vector.shape_cast %194 : vector<1x8x1xf32> to vector<8x1xf32>
    %196 = vector.shape_cast %168 : vector<8x1xf32> to vector<1x8x1xf32>
    tpu.vector_store %arg13[%c2_118, %c0_119, %c0_120], %196 {strides = array<i32>} : memref<4x8x1xf32, #tpu.memory_space<vmem>>, vector<1x8x1xf32>,
    %c3 = arith.constant 3 : index
    %c0_121 = arith.constant 0 : index
    %c0_122 = arith.constant 0 : index
    %197 = vector.load %arg7[%c3, %c0_121, %c0_122] : memref<4x32x128xbf16, #tpu.memory_space<vmem>>, vector<1x32x128xbf16>
    %198 = vector.shape_cast %197 : vector<1x32x128xbf16> to vector<32x128xbf16>
    %cst_123 = arith.constant dense<0.000000e+00> : vector<8x128xf32>
    %199 = tpu.matmul %43, %198, %cst_123 {dimension_numbers = #tpu.dot_dimension_numbers<[1], [0], [0], [1], [0, 0, 1, 1], [], []>} : vector<8x32xbf16>, vector<32x128xbf16>, vector<8x128xf32> -> vector<8x128xf32>
    %c3_124 = arith.constant 3 : index
    %c0_125 = arith.constant 0 : index
    %c0_126 = arith.constant 0 : index
    %200 = vector.load %arg8[%c3_124, %c0_125, %c0_126] : memref<4x32x128xbf16, #tpu.memory_space<vmem>>, vector<1x32x128xbf16>
    %201 = vector.shape_cast %200 : vector<1x32x128xbf16> to vector<32x128xbf16>
    %cst_127 = arith.constant dense<0.000000e+00> : vector<8x128xf32>
    %202 = tpu.matmul %30, %201, %cst_127 {dimension_numbers = #tpu.dot_dimension_numbers<[1], [0], [0], [1], [0, 0, 1, 1], [], []>} : vector<8x32xbf16>, vector<32x128xbf16>, vector<8x128xf32> -> vector<8x128xf32>
    %c3_128 = arith.constant 3 : index
    %c0_129 = arith.constant 0 : index
    %c0_130 = arith.constant 0 : index
    %203 = vector.load %arg9[%c3_128, %c0_129, %c0_130] : memref<4x32x128xbf16, #tpu.memory_space<vmem>>, vector<1x32x128xbf16>
    %204 = vector.shape_cast %203 : vector<1x32x128xbf16> to vector<32x128xbf16>
    %cst_131 = arith.constant dense<0.000000e+00> : vector<8x128xf32>
    %205 = tpu.matmul %30, %204, %cst_131 {dimension_numbers = #tpu.dot_dimension_numbers<[1], [0], [0], [1], [0, 0, 1, 1], [], []>} : vector<8x32xbf16>, vector<32x128xbf16>, vector<8x128xf32> -> vector<8x128xf32>
    %206 = arith.truncf %199 : vector<8x128xf32> to vector<8x128xbf16>
    %207 = arith.truncf %202 : vector<8x128xf32> to vector<8x128xbf16>
    %cst_132 = arith.constant dense<0.000000e+00> : vector<8x8xf32>
    %208 = tpu.matmul %206, %207, %cst_132 {dimension_numbers = #tpu.dot_dimension_numbers<[1], [1], [0], [0], [0, 0, 1, 0], [], []>} : vector<8x128xbf16>, vector<8x128xbf16>, vector<8x8xf32> -> vector<8x8xf32>
    %cst_133 = arith.constant 0.353553385 : f32
    %209 = vector.broadcast %cst_133 : f32 to vector<8x8xf32>
    %210 = arith.mulf %208, %209 : vector<8x8xf32>
    %cst_134 = arith.constant -1.000000e+30 : f32
    %211 = vector.shape_cast %42 : vector<1x8xi1> to vector<1x8xi1>
    %212 = vector.broadcast %211 : vector<1x8xi1> to vector<8x8xi1>
    %213 = vector.broadcast %cst_134 : f32 to vector<8x8xf32>
    %214 = arith.select %212, %210, %213 : vector<8x8xi1>, vector<8x8xf32>
    %c3_135 = arith.constant 3 : index
    %c0_136 = arith.constant 0 : index
    %c0_137 = arith.constant 0 : index
    %215 = vector.load %arg13[%c3_135, %c0_136, %c0_137] : memref<4x8x1xf32, #tpu.memory_space<vmem>>, vector<1x8x1xf32>
    %216 = vector.shape_cast %215 : vector<1x8x1xf32> to vector<8x1xf32>
    %cst_138 = arith.constant dense<0xFF800000> : vector<8xf32>
    %217 = vector.multi_reduction <maximumf>, %214, %cst_138 [1] : vector<8x8xf32> to vector<8xf32>
    %218 = vector.shape_cast %217 : vector<8xf32> to vector<8x1xf32>
    %219 = arith.maximumf %216, %218 : vector<8x1xf32>
    %220 = arith.subf %216, %219 : vector<8x1xf32>
    %221 = math.exp %220 : vector<8x1xf32>
    %222 = vector.broadcast %219 : vector<8x1xf32> to vector<8x8xf32>
    %223 = arith.subf %214, %222 : vector<8x8xf32>
    %224 = math.exp %223 : vector<8x8xf32>
    %c3_139 = arith.constant 3 : index
    %c0_140 = arith.constant 0 : index
    %c0_141 = arith.constant 0 : index
    %225 = vector.load %arg14[%c3_139, %c0_140, %c0_141] : memref<4x8x1xf32, #tpu.memory_space<vmem>>, vector<1x8x1xf32>
    %226 = vector.shape_cast %225 : vector<1x8x1xf32> to vector<8x1xf32>
    %227 = arith.mulf %221, %226 : vector<8x1xf32>
    %cst_142 = arith.constant dense<0.000000e+00> : vector<8xf32>
    %228 = vector.multi_reduction <add>, %224, %cst_142 [1] : vector<8x8xf32> to vector<8xf32>
    %229 = vector.shape_cast %228 : vector<8xf32> to vector<8x1xf32>
    %230 = arith.addf %227, %229 : vector<8x1xf32>
    %c3_143 = arith.constant 3 : index
    %c0_144 = arith.constant 0 : index
    %c0_145 = arith.constant 0 : index
    %231 = vector.load %arg14[%c3_143, %c0_144, %c0_145] : memref<4x8x1xf32, #tpu.memory_space<vmem>>, vector<1x8x1xf32>
    %232 = vector.shape_cast %231 : vector<1x8x1xf32> to vector<8x1xf32>
    %233 = vector.shape_cast %230 : vector<8x1xf32> to vector<1x8x1xf32>
    tpu.vector_store %arg14[%c3_143, %c0_144, %c0_145], %233 {strides = array<i32>} : memref<4x8x1xf32, #tpu.memory_space<vmem>>, vector<1x8x1xf32>,
    %c3_146 = arith.constant 3 : index
    %c0_147 = arith.constant 0 : index
    %c0_148 = arith.constant 0 : index
    %234 = vector.load %arg15[%c3_146, %c0_147, %c0_148] : memref<4x8x128xf32, #tpu.memory_space<vmem>>, vector<1x8x128xf32>
    %235 = vector.shape_cast %234 : vector<1x8x128xf32> to vector<8x128xf32>
    %236 = vector.broadcast %221 : vector<8x1xf32> to vector<8x128xf32>
    %237 = arith.mulf %236, %235 : vector<8x128xf32>
    %238 = arith.truncf %224 : vector<8x8xf32> to vector<8x8xbf16>
    %239 = arith.truncf %205 : vector<8x128xf32> to vector<8x128xbf16>
    %cst_149 = arith.constant dense<0.000000e+00> : vector<8x128xf32>
    %240 = tpu.matmul %238, %239, %cst_149 {dimension_numbers = #tpu.dot_dimension_numbers<[1], [0], [0], [1], [0, 0, 1, 1], [], []>} : vector<8x8xbf16>, vector<8x128xbf16>, vector<8x128xf32> -> vector<8x128xf32>
    %241 = arith.addf %237, %240 : vector<8x128xf32>
    %c3_150 = arith.constant 3 : index
    %c0_151 = arith.constant 0 : index
    %c0_152 = arith.constant 0 : index
    %242 = vector.load %arg15[%c3_150, %c0_151, %c0_152] : memref<4x8x128xf32, #tpu.memory_space<vmem>>, vector<1x8x128xf32>
    %243 = vector.shape_cast %242 : vector<1x8x128xf32> to vector<8x128xf32>
    %244 = vector.shape_cast %241 : vector<8x128xf32> to vector<1x8x128xf32>
    tpu.vector_store %arg15[%c3_150, %c0_151, %c0_152], %244 {strides = array<i32>} : memref<4x8x128xf32, #tpu.memory_space<vmem>>, vector<1x8x128xf32>,
    %c3_153 = arith.constant 3 : index
    %c0_154 = arith.constant 0 : index
    %c0_155 = arith.constant 0 : index
    %245 = vector.load %arg13[%c3_153, %c0_154, %c0_155] : memref<4x8x1xf32, #tpu.memory_space<vmem>>, vector<1x8x1xf32>
    %246 = vector.shape_cast %245 : vector<1x8x1xf32> to vector<8x1xf32>
    %247 = vector.shape_cast %219 : vector<8x1xf32> to vector<1x8x1xf32>
    tpu.vector_store %arg13[%c3_153, %c0_154, %c0_155], %247 {strides = array<i32>} : memref<4x8x1xf32, #tpu.memory_space<vmem>>, vector<1x8x1xf32>,
    %c2_i32 = arith.constant 2 : i32
    %248 = arith.cmpi eq, %arg2, %c2_i32 : i32
    %249 = arith.extui %248 : i1 to i32
    %c0_i32_156 = arith.constant 0 : i32
    %250 = arith.cmpi ne, %249, %c0_i32_156 : i32
    scf.if %250 {
      %cst_157 = arith.constant 0.000000e+00 : f32
      %251 = vector.broadcast %cst_157 : f32 to vector<8x32xf32>
      %c0_158 = arith.constant 0 : index
      %c0_159 = arith.constant 0 : index
      %c0_160 = arith.constant 0 : index
      %252 = vector.load %arg15[%c0_158, %c0_159, %c0_160] : memref<4x8x128xf32, #tpu.memory_space<vmem>>, vector<1x8x128xf32>
      %253 = vector.shape_cast %252 : vector<1x8x128xf32> to vector<8x128xf32>
      %c0_161 = arith.constant 0 : index
      %c0_162 = arith.constant 0 : index
      %c0_163 = arith.constant 0 : index
      %254 = vector.load %arg14[%c0_161, %c0_162, %c0_163] : memref<4x8x1xf32, #tpu.memory_space<vmem>>, vector<1x8x1xf32>
      %255 = vector.shape_cast %254 : vector<1x8x1xf32> to vector<8x1xf32>
      %256 = tpu.reciprocal %255 {approx = true} : vector<8x1xf32> -> vector<8x1xf32>
      %257 = vector.broadcast %256 : vector<8x1xf32> to vector<8x128xf32>
      %258 = arith.mulf %253, %257 : vector<8x128xf32>
      %259 = arith.truncf %258 : vector<8x128xf32> to vector<8x128xbf16>
      %c0_164 = arith.constant 0 : index
      %c0_165 = arith.constant 0 : index
      %c0_166 = arith.constant 0 : index
      %260 = vector.load %arg10[%c0_164, %c0_165, %c0_166] : memref<4x128x32xbf16, #tpu.memory_space<vmem>>, vector<1x128x32xbf16>
      %261 = vector.shape_cast %260 : vector<1x128x32xbf16> to vector<128x32xbf16>
      %cst_167 = arith.constant dense<0.000000e+00> : vector<8x32xf32>
      %262 = tpu.matmul %259, %261, %cst_167 {dimension_numbers = #tpu.dot_dimension_numbers<[1], [0], [0], [1], [0, 0, 1, 1], [], []>} : vector<8x128xbf16>, vector<128x32xbf16>, vector<8x32xf32> -> vector<8x32xf32>
      %263 = arith.addf %251, %262 : vector<8x32xf32>
      %c1_168 = arith.constant 1 : index
      %c0_169 = arith.constant 0 : index
      %c0_170 = arith.constant 0 : index
      %264 = vector.load %arg15[%c1_168, %c0_169, %c0_170] : memref<4x8x128xf32, #tpu.memory_space<vmem>>, vector<1x8x128xf32>
      %265 = vector.shape_cast %264 : vector<1x8x128xf32> to vector<8x128xf32>
      %c1_171 = arith.constant 1 : index
      %c0_172 = arith.constant 0 : index
      %c0_173 = arith.constant 0 : index
      %266 = vector.load %arg14[%c1_171, %c0_172, %c0_173] : memref<4x8x1xf32, #tpu.memory_space<vmem>>, vector<1x8x1xf32>
      %267 = vector.shape_cast %266 : vector<1x8x1xf32> to vector<8x1xf32>
      %268 = tpu.reciprocal %267 {approx = true} : vector<8x1xf32> -> vector<8x1xf32>
      %269 = vector.broadcast %268 : vector<8x1xf32> to vector<8x128xf32>
      %270 = arith.mulf %265, %269 : vector<8x128xf32>
      %271 = arith.truncf %270 : vector<8x128xf32> to vector<8x128xbf16>
      %c1_174 = arith.constant 1 : index
      %c0_175 = arith.constant 0 : index
      %c0_176 = arith.constant 0 : index
      %272 = vector.load %arg10[%c1_174, %c0_175, %c0_176] : memref<4x128x32xbf16, #tpu.memory_space<vmem>>, vector<1x128x32xbf16>
      %273 = vector.shape_cast %272 : vector<1x128x32xbf16> to vector<128x32xbf16>
      %cst_177 = arith.constant dense<0.000000e+00> : vector<8x32xf32>
      %274 = tpu.matmul %271, %273, %cst_177 {dimension_numbers = #tpu.dot_dimension_numbers<[1], [0], [0], [1], [0, 0, 1, 1], [], []>} : vector<8x128xbf16>, vector<128x32xbf16>, vector<8x32xf32> -> vector<8x32xf32>
      %275 = arith.addf %263, %274 : vector<8x32xf32>
      %c2_178 = arith.constant 2 : index
      %c0_179 = arith.constant 0 : index
      %c0_180 = arith.constant 0 : index
      %276 = vector.load %arg15[%c2_178, %c0_179, %c0_180] : memref<4x8x128xf32, #tpu.memory_space<vmem>>, vector<1x8x128xf32>
      %277 = vector.shape_cast %276 : vector<1x8x128xf32> to vector<8x128xf32>
      %c2_181 = arith.constant 2 : index
      %c0_182 = arith.constant 0 : index
      %c0_183 = arith.constant 0 : index
      %278 = vector.load %arg14[%c2_181, %c0_182, %c0_183] : memref<4x8x1xf32, #tpu.memory_space<vmem>>, vector<1x8x1xf32>
      %279 = vector.shape_cast %278 : vector<1x8x1xf32> to vector<8x1xf32>
      %280 = tpu.reciprocal %279 {approx = true} : vector<8x1xf32> -> vector<8x1xf32>
      %281 = vector.broadcast %280 : vector<8x1xf32> to vector<8x128xf32>
      %282 = arith.mulf %277, %281 : vector<8x128xf32>
      %283 = arith.truncf %282 : vector<8x128xf32> to vector<8x128xbf16>
      %c2_184 = arith.constant 2 : index
      %c0_185 = arith.constant 0 : index
      %c0_186 = arith.constant 0 : index
      %284 = vector.load %arg10[%c2_184, %c0_185, %c0_186] : memref<4x128x32xbf16, #tpu.memory_space<vmem>>, vector<1x128x32xbf16>
      %285 = vector.shape_cast %284 : vector<1x128x32xbf16> to vector<128x32xbf16>
      %cst_187 = arith.constant dense<0.000000e+00> : vector<8x32xf32>
      %286 = tpu.matmul %283, %285, %cst_187 {dimension_numbers = #tpu.dot_dimension_numbers<[1], [0], [0], [1], [0, 0, 1, 1], [], []>} : vector<8x128xbf16>, vector<128x32xbf16>, vector<8x32xf32> -> vector<8x32xf32>
      %287 = arith.addf %275, %286 : vector<8x32xf32>
      %c3_188 = arith.constant 3 : index
      %c0_189 = arith.constant 0 : index
      %c0_190 = arith.constant 0 : index
      %288 = vector.load %arg15[%c3_188, %c0_189, %c0_190] : memref<4x8x128xf32, #tpu.memory_space<vmem>>, vector<1x8x128xf32>
      %289 = vector.shape_cast %288 : vector<1x8x128xf32> to vector<8x128xf32>
      %c3_191 = arith.constant 3 : index
      %c0_192 = arith.constant 0 : index
      %c0_193 = arith.constant 0 : index
      %290 = vector.load %arg14[%c3_191, %c0_192, %c0_193] : memref<4x8x1xf32, #tpu.memory_space<vmem>>, vector<1x8x1xf32>
      %291 = vector.shape_cast %290 : vector<1x8x1xf32> to vector<8x1xf32>
      %292 = tpu.reciprocal %291 {approx = true} : vector<8x1xf32> -> vector<8x1xf32>
      %293 = vector.broadcast %292 : vector<8x1xf32> to vector<8x128xf32>
      %294 = arith.mulf %289, %293 : vector<8x128xf32>
      %295 = arith.truncf %294 : vector<8x128xf32> to vector<8x128xbf16>
      %c3_194 = arith.constant 3 : index
      %c0_195 = arith.constant 0 : index
      %c0_196 = arith.constant 0 : index
      %296 = vector.load %arg10[%c3_194, %c0_195, %c0_196] : memref<4x128x32xbf16, #tpu.memory_space<vmem>>, vector<1x128x32xbf16>
      %297 = vector.shape_cast %296 : vector<1x128x32xbf16> to vector<128x32xbf16>
      %cst_197 = arith.constant dense<0.000000e+00> : vector<8x32xf32>
      %298 = tpu.matmul %295, %297, %cst_197 {dimension_numbers = #tpu.dot_dimension_numbers<[1], [0], [0], [1], [0, 0, 1, 1], [], []>} : vector<8x128xbf16>, vector<128x32xbf16>, vector<8x32xf32> -> vector<8x32xf32>
      %299 = arith.addf %287, %298 : vector<8x32xf32>
      %c0_198 = arith.constant 0 : index
      %c0_199 = arith.constant 0 : index
      %c0_200 = arith.constant 0 : index
      %300 = vector.load %arg3[%c0_198, %c0_199, %c0_200] : memref<1x8x32xbf16, #tpu.memory_space<vmem>>, vector<1x8x32xbf16>
      %301 = vector.shape_cast %300 : vector<1x8x32xbf16> to vector<8x32xbf16>
      %302 = arith.extf %301 : vector<8x32xbf16> to vector<8x32xf32>
      %303 = arith.addf %302, %299 : vector<8x32xf32>
      %304 = arith.truncf %303 : vector<8x32xf32> to vector<8x32xbf16>
      %c0_201 = arith.constant 0 : index
      %c0_202 = arith.constant 0 : index
      %c0_203 = arith.constant 0 : index
      %305 = vector.load %arg11[%c0_201, %c0_202, %c0_203] : memref<1x8x32xbf16, #tpu.memory_space<vmem>>, vector<1x8x32xbf16>
      %306 = vector.shape_cast %305 : vector<1x8x32xbf16> to vector<8x32xbf16>
      %307 = vector.shape_cast %304 : vector<8x32xbf16> to vector<1x8x32xbf16>
      tpu.vector_store %arg11[%c0_201, %c0_202, %c0_203], %307 {strides = array<i32>} : memref<1x8x32xbf16, #tpu.memory_space<vmem>>, vector<1x8x32xbf16>,
    } else {
    }
    return
  }
  func.func @transform_0(%arg0: i32, %arg1: i32, %arg2: i32) -> (i32, i32, i32) {
    %c0_i32 = arith.constant 0 : i32
    %c0_i32_0 = arith.constant 0 : i32
    return %arg0, %arg1, %c0_i32 : i32, i32, i32
  }
  func.func @transform_1(%arg0: i32, %arg1: i32, %arg2: i32) -> (i32, i32, i32) {
    %c0_i32 = arith.constant 0 : i32
    %c0_i32_0 = arith.constant 0 : i32
    return %arg0, %arg2, %c0_i32 : i32, i32, i32
  }
  func.func @transform_2(%arg0: i32, %arg1: i32, %arg2: i32) -> (i32, i32) {
    %c0_i32 = arith.constant 0 : i32
    %c0_i32_0 = arith.constant 0 : i32
    %c0_i32_1 = arith.constant 0 : i32
    return %c0_i32, %c0_i32_0 : i32, i32
  }
  func.func @transform_3(%arg0: i32, %arg1: i32, %arg2: i32) -> (i32, i32) {
    %c0_i32 = arith.constant 0 : i32
    %c0_i32_0 = arith.constant 0 : i32
    %c0_i32_1 = arith.constant 0 : i32
    return %c0_i32, %c0_i32_0 : i32, i32
  }
  func.func @transform_4(%arg0: i32, %arg1: i32, %arg2: i32) -> (i32, i32, i32) {
    %c0_i32 = arith.constant 0 : i32
    %c0_i32_0 = arith.constant 0 : i32
    %c0_i32_1 = arith.constant 0 : i32
    %c0_i32_2 = arith.constant 0 : i32
    return %c0_i32, %c0_i32_0, %c0_i32_1 : i32, i32, i32
  }
  func.func @transform_5(%arg0: i32, %arg1: i32, %arg2: i32) -> (i32, i32, i32) {
    %c0_i32 = arith.constant 0 : i32
    %c0_i32_0 = arith.constant 0 : i32
    %c0_i32_1 = arith.constant 0 : i32
    %c0_i32_2 = arith.constant 0 : i32
    return %c0_i32, %c0_i32_0, %c0_i32_1 : i32, i32, i32
  }
  func.func @transform_6(%arg0: i32, %arg1: i32, %arg2: i32) -> (i32, i32, i32) {
    %c0_i32 = arith.constant 0 : i32
    %c0_i32_0 = arith.constant 0 : i32
    %c0_i32_1 = arith.constant 0 : i32
    %c0_i32_2 = arith.constant 0 : i32
    return %c0_i32, %c0_i32_0, %c0_i32_1 : i32, i32, i32
  }
  func.func @transform_7(%arg0: i32, %arg1: i32, %arg2: i32) -> (i32, i32, i32) {
    %c0_i32 = arith.constant 0 : i32
    %c0_i32_0 = arith.constant 0 : i32
    %c0_i32_1 = arith.constant 0 : i32
    %c0_i32_2 = arith.constant 0 : i32
    return %c0_i32, %c0_i32_0, %c0_i32_1 : i32, i32, i32
  }
  func.func @transform_8(%arg0: i32, %arg1: i32, %arg2: i32) -> (i32, i32, i32) {
    %c0_i32 = arith.constant 0 : i32
    %c0_i32_0 = arith.constant 0 : i32
    return %arg0, %arg1, %c0_i32 : i32, i32, i32
  }
}

module attributes {stable_mosaic.version = 11 : i64} {
  func.func @_ffn_kernel(%arg0: i32, %arg1: i32, %arg2: i32, %arg3: memref<1x8x32xbf16, #tpu.memory_space<vmem>>, %arg4: memref<1x32xf32, #tpu.memory_space<vmem>>, %arg5: memref<1x32xf32, #tpu.memory_space<vmem>>, %arg6: memref<32x128xbf16, #tpu.memory_space<vmem>>, %arg7: memref<1x128xf32, #tpu.memory_space<vmem>>, %arg8: memref<128x32xbf16, #tpu.memory_space<vmem>>, %arg9: memref<1x32xf32, #tpu.memory_space<vmem>>, %arg10: memref<1x8x32xbf16, #tpu.memory_space<vmem>>, %arg11: memref<8x32xbf16, #tpu.memory_space<vmem>>, %arg12: memref<8x32xf32, #tpu.memory_space<vmem>>) attributes {dimension_semantics = [#tpu.dimension_semantics<parallel>, #tpu.dimension_semantics<parallel>, #tpu.dimension_semantics<arbitrary>], iteration_bounds = array<i64: 2, 3, 1>, scalar_prefetch = 0 : i64, scratch_operands = 2 : i64, tpu.core_type = #tpu.core_type<tc>, window_params = [{transform_indices = @transform_0, window_bounds = array<i64: 1, 8, 32>}, {pipeline_mode = #tpu.pipeline_mode<synchronous>, transform_indices = @transform_1, window_bounds = array<i64: 1, 32>}, {pipeline_mode = #tpu.pipeline_mode<synchronous>, transform_indices = @transform_2, window_bounds = array<i64: 1, 32>}, {transform_indices = @transform_3, window_bounds = array<i64: 32, 128>}, {transform_indices = @transform_4, window_bounds = array<i64: 1, 128>}, {transform_indices = @transform_5, window_bounds = array<i64: 128, 32>}, {pipeline_mode = #tpu.pipeline_mode<synchronous>, transform_indices = @transform_6, window_bounds = array<i64: 1, 32>}, {transform_indices = @transform_7, window_bounds = array<i64: 1, 8, 32>}]} {
    %c0_i32 = arith.constant 0 : i32
    %0 = arith.cmpi eq, %arg2, %c0_i32 : i32
    %1 = arith.extui %0 : i1 to i32
    %c0_i32_0 = arith.constant 0 : i32
    %2 = arith.cmpi ne, %1, %c0_i32_0 : i32
    scf.if %2 {
      %c0_19 = arith.constant 0 : index
      %c0_20 = arith.constant 0 : index
      %c0_21 = arith.constant 0 : index
      %31 = vector.load %arg3[%c0_19, %c0_20, %c0_21] : memref<1x8x32xbf16, #tpu.memory_space<vmem>>, vector<1x8x32xbf16>
      %32 = vector.shape_cast %31 : vector<1x8x32xbf16> to vector<8x32xbf16>
      %33 = arith.extf %32 : vector<8x32xbf16> to vector<8x32xf32>
      %c0_22 = arith.constant 0 : index
      %c0_23 = arith.constant 0 : index
      %34 = vector.load %arg4[%c0_22, %c0_23] : memref<1x32xf32, #tpu.memory_space<vmem>>, vector<1x32xf32>
      %c0_24 = arith.constant 0 : index
      %c0_25 = arith.constant 0 : index
      %35 = vector.load %arg5[%c0_24, %c0_25] : memref<1x32xf32, #tpu.memory_space<vmem>>, vector<1x32xf32>
      %cst_26 = arith.constant dense<0.000000e+00> : vector<8xf32>
      %36 = vector.multi_reduction <add>, %33, %cst_26 [1] : vector<8x32xf32> to vector<8xf32>
      %37 = vector.shape_cast %36 : vector<8xf32> to vector<8x1xf32>
      %cst_27 = arith.constant 3.200000e+01 : f32
      %38 = vector.broadcast %cst_27 : f32 to vector<8x1xf32>
      %39 = arith.divf %37, %38 : vector<8x1xf32>
      %40 = vector.broadcast %39 : vector<8x1xf32> to vector<8x32xf32>
      %41 = arith.subf %33, %40 : vector<8x32xf32>
      %42 = arith.mulf %41, %41 : vector<8x32xf32>
      %cst_28 = arith.constant dense<0.000000e+00> : vector<8xf32>
      %43 = vector.multi_reduction <add>, %42, %cst_28 [1] : vector<8x32xf32> to vector<8xf32>
      %44 = vector.shape_cast %43 : vector<8xf32> to vector<8x1xf32>
      %cst_29 = arith.constant 3.200000e+01 : f32
      %45 = vector.broadcast %cst_29 : f32 to vector<8x1xf32>
      %46 = arith.divf %44, %45 : vector<8x1xf32>
      %47 = vector.broadcast %39 : vector<8x1xf32> to vector<8x32xf32>
      %48 = arith.subf %33, %47 : vector<8x32xf32>
      %cst_30 = arith.constant 9.99999974E-6 : f32
      %49 = vector.broadcast %cst_30 : f32 to vector<8x1xf32>
      %50 = arith.addf %46, %49 : vector<8x1xf32>
      %51 = math.rsqrt %50 : vector<8x1xf32>
      %52 = vector.broadcast %51 : vector<8x1xf32> to vector<8x32xf32>
      %53 = arith.mulf %48, %52 : vector<8x32xf32>
      %54 = vector.broadcast %34 : vector<1x32xf32> to vector<8x32xf32>
      %55 = arith.mulf %53, %54 : vector<8x32xf32>
      %56 = vector.broadcast %35 : vector<1x32xf32> to vector<8x32xf32>
      %57 = arith.addf %55, %56 : vector<8x32xf32>
      %58 = arith.truncf %57 : vector<8x32xf32> to vector<8x32xbf16>
      %c0_31 = arith.constant 0 : index
      %c0_32 = arith.constant 0 : index
      %59 = vector.load %arg11[%c0_31, %c0_32] : memref<8x32xbf16, #tpu.memory_space<vmem>>, vector<8x32xbf16>
      tpu.vector_store %arg11[%c0_31, %c0_32], %58 {strides = array<i32>} : memref<8x32xbf16, #tpu.memory_space<vmem>>, vector<8x32xbf16>,
      %cst_33 = arith.constant 0.000000e+00 : f32
      %60 = vector.broadcast %cst_33 : f32 to vector<8x32xf32>
      %c0_34 = arith.constant 0 : index
      %c0_35 = arith.constant 0 : index
      %61 = vector.load %arg12[%c0_34, %c0_35] : memref<8x32xf32, #tpu.memory_space<vmem>>, vector<8x32xf32>
      tpu.vector_store %arg12[%c0_34, %c0_35], %60 {strides = array<i32>} : memref<8x32xf32, #tpu.memory_space<vmem>>, vector<8x32xf32>,
    } else {
    }
    %c0 = arith.constant 0 : index
    %c0_1 = arith.constant 0 : index
    %3 = vector.load %arg11[%c0, %c0_1] : memref<8x32xbf16, #tpu.memory_space<vmem>>, vector<8x32xbf16>
    %c0_2 = arith.constant 0 : index
    %c0_3 = arith.constant 0 : index
    %4 = vector.load %arg6[%c0_2, %c0_3] : memref<32x128xbf16, #tpu.memory_space<vmem>>, vector<32x128xbf16>
    %cst = arith.constant dense<0.000000e+00> : vector<8x128xf32>
    %5 = tpu.matmul %3, %4, %cst {dimension_numbers = #tpu.dot_dimension_numbers<[1], [0], [0], [1], [0, 0, 1, 1], [], []>} : vector<8x32xbf16>, vector<32x128xbf16>, vector<8x128xf32> -> vector<8x128xf32>
    %c0_4 = arith.constant 0 : index
    %c0_5 = arith.constant 0 : index
    %6 = vector.load %arg7[%c0_4, %c0_5] : memref<1x128xf32, #tpu.memory_space<vmem>>, vector<1x128xf32>
    %7 = vector.broadcast %6 : vector<1x128xf32> to vector<8x128xf32>
    %8 = arith.addf %5, %7 : vector<8x128xf32>
    %9 = arith.mulf %8, %8 : vector<8x128xf32>
    %10 = arith.mulf %8, %9 : vector<8x128xf32>
    %cst_6 = arith.constant 4.471500e-02 : f32
    %11 = vector.broadcast %cst_6 : f32 to vector<8x128xf32>
    %12 = arith.mulf %11, %10 : vector<8x128xf32>
    %13 = arith.addf %8, %12 : vector<8x128xf32>
    %cst_7 = arith.constant 0.797884583 : f32
    %14 = vector.broadcast %cst_7 : f32 to vector<8x128xf32>
    %15 = arith.mulf %14, %13 : vector<8x128xf32>
    %16 = math.tanh %15 : vector<8x128xf32>
    %cst_8 = arith.constant 1.000000e+00 : f32
    %17 = vector.broadcast %cst_8 : f32 to vector<8x128xf32>
    %18 = arith.addf %17, %16 : vector<8x128xf32>
    %cst_9 = arith.constant 5.000000e-01 : f32
    %19 = vector.broadcast %cst_9 : f32 to vector<8x128xf32>
    %20 = arith.mulf %19, %18 : vector<8x128xf32>
    %21 = arith.mulf %8, %20 : vector<8x128xf32>
    %c0_10 = arith.constant 0 : index
    %c0_11 = arith.constant 0 : index
    %22 = vector.load %arg12[%c0_10, %c0_11] : memref<8x32xf32, #tpu.memory_space<vmem>>, vector<8x32xf32>
    %23 = arith.truncf %21 : vector<8x128xf32> to vector<8x128xbf16>
    %c0_12 = arith.constant 0 : index
    %c0_13 = arith.constant 0 : index
    %24 = vector.load %arg8[%c0_12, %c0_13] : memref<128x32xbf16, #tpu.memory_space<vmem>>, vector<128x32xbf16>
    %cst_14 = arith.constant dense<0.000000e+00> : vector<8x32xf32>
    %25 = tpu.matmul %23, %24, %cst_14 {dimension_numbers = #tpu.dot_dimension_numbers<[1], [0], [0], [1], [0, 0, 1, 1], [], []>} : vector<8x128xbf16>, vector<128x32xbf16>, vector<8x32xf32> -> vector<8x32xf32>
    %26 = arith.addf %22, %25 : vector<8x32xf32>
    %c0_15 = arith.constant 0 : index
    %c0_16 = arith.constant 0 : index
    %27 = vector.load %arg12[%c0_15, %c0_16] : memref<8x32xf32, #tpu.memory_space<vmem>>, vector<8x32xf32>
    tpu.vector_store %arg12[%c0_15, %c0_16], %26 {strides = array<i32>} : memref<8x32xf32, #tpu.memory_space<vmem>>, vector<8x32xf32>,
    %c0_i32_17 = arith.constant 0 : i32
    %28 = arith.cmpi eq, %arg2, %c0_i32_17 : i32
    %29 = arith.extui %28 : i1 to i32
    %c0_i32_18 = arith.constant 0 : i32
    %30 = arith.cmpi ne, %29, %c0_i32_18 : i32
    scf.if %30 {
      %c0_19 = arith.constant 0 : index
      %c0_20 = arith.constant 0 : index
      %c0_21 = arith.constant 0 : index
      %31 = vector.load %arg3[%c0_19, %c0_20, %c0_21] : memref<1x8x32xbf16, #tpu.memory_space<vmem>>, vector<1x8x32xbf16>
      %32 = vector.shape_cast %31 : vector<1x8x32xbf16> to vector<8x32xbf16>
      %33 = arith.extf %32 : vector<8x32xbf16> to vector<8x32xf32>
      %c0_22 = arith.constant 0 : index
      %c0_23 = arith.constant 0 : index
      %34 = vector.load %arg12[%c0_22, %c0_23] : memref<8x32xf32, #tpu.memory_space<vmem>>, vector<8x32xf32>
      %35 = arith.addf %33, %34 : vector<8x32xf32>
      %c0_24 = arith.constant 0 : index
      %c0_25 = arith.constant 0 : index
      %36 = vector.load %arg9[%c0_24, %c0_25] : memref<1x32xf32, #tpu.memory_space<vmem>>, vector<1x32xf32>
      %37 = vector.broadcast %36 : vector<1x32xf32> to vector<8x32xf32>
      %38 = arith.addf %35, %37 : vector<8x32xf32>
      %39 = arith.truncf %38 : vector<8x32xf32> to vector<8x32xbf16>
      %c0_26 = arith.constant 0 : index
      %c0_27 = arith.constant 0 : index
      %c0_28 = arith.constant 0 : index
      %40 = vector.load %arg10[%c0_26, %c0_27, %c0_28] : memref<1x8x32xbf16, #tpu.memory_space<vmem>>, vector<1x8x32xbf16>
      %41 = vector.shape_cast %40 : vector<1x8x32xbf16> to vector<8x32xbf16>
      %42 = vector.shape_cast %39 : vector<8x32xbf16> to vector<1x8x32xbf16>
      tpu.vector_store %arg10[%c0_26, %c0_27, %c0_28], %42 {strides = array<i32>} : memref<1x8x32xbf16, #tpu.memory_space<vmem>>, vector<1x8x32xbf16>,
    } else {
    }
    return
  }
  func.func @transform_0(%arg0: i32, %arg1: i32, %arg2: i32) -> (i32, i32, i32) {
    %c0_i32 = arith.constant 0 : i32
    %c0_i32_0 = arith.constant 0 : i32
    return %arg0, %arg1, %c0_i32 : i32, i32, i32
  }
  func.func @transform_1(%arg0: i32, %arg1: i32, %arg2: i32) -> (i32, i32) {
    %c0_i32 = arith.constant 0 : i32
    %c0_i32_0 = arith.constant 0 : i32
    %c0_i32_1 = arith.constant 0 : i32
    return %c0_i32, %c0_i32_0 : i32, i32
  }
  func.func @transform_2(%arg0: i32, %arg1: i32, %arg2: i32) -> (i32, i32) {
    %c0_i32 = arith.constant 0 : i32
    %c0_i32_0 = arith.constant 0 : i32
    %c0_i32_1 = arith.constant 0 : i32
    return %c0_i32, %c0_i32_0 : i32, i32
  }
  func.func @transform_3(%arg0: i32, %arg1: i32, %arg2: i32) -> (i32, i32) {
    %c0_i32 = arith.constant 0 : i32
    %c0_i32_0 = arith.constant 0 : i32
    return %c0_i32, %arg2 : i32, i32
  }
  func.func @transform_4(%arg0: i32, %arg1: i32, %arg2: i32) -> (i32, i32) {
    %c0_i32 = arith.constant 0 : i32
    %c0_i32_0 = arith.constant 0 : i32
    return %c0_i32, %arg2 : i32, i32
  }
  func.func @transform_5(%arg0: i32, %arg1: i32, %arg2: i32) -> (i32, i32) {
    %c0_i32 = arith.constant 0 : i32
    %c0_i32_0 = arith.constant 0 : i32
    return %arg2, %c0_i32 : i32, i32
  }
  func.func @transform_6(%arg0: i32, %arg1: i32, %arg2: i32) -> (i32, i32) {
    %c0_i32 = arith.constant 0 : i32
    %c0_i32_0 = arith.constant 0 : i32
    %c0_i32_1 = arith.constant 0 : i32
    return %c0_i32, %c0_i32_0 : i32, i32
  }
  func.func @transform_7(%arg0: i32, %arg1: i32, %arg2: i32) -> (i32, i32, i32) {
    %c0_i32 = arith.constant 0 : i32
    %c0_i32_0 = arith.constant 0 : i32
    return %arg0, %arg1, %c0_i32 : i32, i32, i32
  }
}

module attributes {stable_mosaic.version = 11 : i64} {
  func.func @_out_fuse_kernel(%arg0: i32, %arg1: memref<1x24x32xbf16, #tpu.memory_space<vmem>>, %arg2: memref<4x32xbf16, #tpu.memory_space<vmem>>, %arg3: memref<1x4x16xf32, #tpu.memory_space<vmem>>) attributes {dimension_semantics = [#tpu.dimension_semantics<parallel>], iteration_bounds = array<i64: 2>, scalar_prefetch = 0 : i64, scratch_operands = 0 : i64, tpu.core_type = #tpu.core_type<tc>, window_params = [{transform_indices = @transform_0, window_bounds = array<i64: 1, 24, 32>}, {pipeline_mode = #tpu.pipeline_mode<synchronous>, transform_indices = @transform_1, window_bounds = array<i64: 4, 32>}, {transform_indices = @transform_2, window_bounds = array<i64: 1, 4, 16>}]} {
    %c0 = arith.constant 0 : index
    %c8 = arith.constant 8 : index
    %c0_0 = arith.constant 0 : index
    %0 = vector.load %arg1[%c0, %c8, %c0_0] : memref<1x24x32xbf16, #tpu.memory_space<vmem>>, vector<1x16x32xbf16>
    %1 = vector.shape_cast %0 : vector<1x16x32xbf16> to vector<16x32xbf16>
    %c0_1 = arith.constant 0 : index
    %c0_2 = arith.constant 0 : index
    %2 = vector.load %arg2[%c0_1, %c0_2] : memref<4x32xbf16, #tpu.memory_space<vmem>>, vector<4x32xbf16>
    %cst = arith.constant dense<0.000000e+00> : vector<4x16xf32>
    %3 = tpu.matmul %2, %1, %cst {dimension_numbers = #tpu.dot_dimension_numbers<[1], [1], [0], [0], [0, 0, 1, 0], [], []>} : vector<4x32xbf16>, vector<16x32xbf16>, vector<4x16xf32> -> vector<4x16xf32>
    %c0_3 = arith.constant 0 : index
    %c0_4 = arith.constant 0 : index
    %c0_5 = arith.constant 0 : index
    %4 = vector.load %arg3[%c0_3, %c0_4, %c0_5] : memref<1x4x16xf32, #tpu.memory_space<vmem>>, vector<1x4x16xf32>
    %5 = vector.shape_cast %4 : vector<1x4x16xf32> to vector<4x16xf32>
    %6 = vector.shape_cast %3 : vector<4x16xf32> to vector<1x4x16xf32>
    tpu.vector_store %arg3[%c0_3, %c0_4, %c0_5], %6 {strides = array<i32>} : memref<1x4x16xf32, #tpu.memory_space<vmem>>, vector<1x4x16xf32>,
    return
  }
  func.func @transform_0(%arg0: i32) -> (i32, i32, i32) {
    %c0_i32 = arith.constant 0 : i32
    %c0_i32_0 = arith.constant 0 : i32
    %c0_i32_1 = arith.constant 0 : i32
    return %arg0, %c0_i32, %c0_i32_0 : i32, i32, i32
  }
  func.func @transform_1(%arg0: i32) -> (i32, i32) {
    %c0_i32 = arith.constant 0 : i32
    %c0_i32_0 = arith.constant 0 : i32
    %c0_i32_1 = arith.constant 0 : i32
    return %c0_i32, %c0_i32_0 : i32, i32
  }
  func.func @transform_2(%arg0: i32) -> (i32, i32, i32) {
    %c0_i32 = arith.constant 0 : i32
    %c0_i32_0 = arith.constant 0 : i32
    %c0_i32_1 = arith.constant 0 : i32
    return %arg0, %c0_i32, %c0_i32_0 : i32, i32, i32
  }
}

</mosaic_0001>

<bundles_post_ra>
// kernel: dit_uncond_forward.8
= control target key start
LH: loop header
LB: loop body
LE: loop exit
PB: predicated region body
PF: predicated region fallthrough
CT: control target
= control target key end

     0   :  { %8 = vsyncpa [#allocation3], 0  ;;  %s612_s0 = inlined_call_operand.vmem [shape: f32[2,16,4], index: 0, kind: input, shape index: {}]   ;;  %s613_s1 = inlined_call_operand.vmem [shape: bf16[2,1,32], index: 1, kind: input, shape index: {}]   ;;  %s614_s2 = inlined_call_operand.vmem [shape: bf16[4,32], index: 2, kind: input, shape index: {}]   ;;  %s615_s3 = inlined_call_operand.hbm [shape: bf16[2,24,32], index: 3, kind: output, shape index: {}]  }
   0x1   :  { %10 = vsyncpa [#allocation3 + $0x1], 0  ;;  %s500_s12 = smov 0   ;;  %s502_s13 = smov 0  }
   0x2   :  { %s504_s14 = smov 0   ;;  %s506_s15 = smov 0  }
   0x3 LB: > { %s521_s16 = sadd.s32 4294967295, %s472_s15   ;;  %s341_s17 = sadd.s32 4294967294, %s472_s15   ;;  %s472_s15 = sphi %s506_s15, %s621_s15   ;;  %s468_s14 = sphi %s504_s14, %s620_s14   ;;  %s464_s13 = sphi %s502_s13, %s619_s13   ;;  %s460_s12 = sphi %s500_s12, %s618_s12  }
   0x4   : > { %s525_s18 = sadd.s32 1, %s472_s15   ;;  %s96_s19 = sadd.s32 1, %s468_s14 }
   0x5   : > { %s93_s20 = ssub.s32 %s472_s15, %s525_s18  ;;  %p106_p0 = scmp.ne.s32.totalorder %s468_s14, %s464_s13 }
   0x6   : > { %p94_p1 = scmp.eq.s32.totalorder %s93_s20, 0  ;;  %p107_p2 = scmp.eq.s32.totalorder %s521_s16, 1 }
   0x7   : > { %p112_p3 = scmp.ne.s32.totalorder %s464_s13, %s460_s12  ;;  %p113_p4 = scmp.eq.s32.totalorder %s341_s17, 1 }
   0x8   : > { %s536_s21 = scalar_select %p94_p1, %s468_s14, %s96_s19  }
   0x9   : > { %p538_p5 = por %p107_p2, %p106_p0  ;;  %p542_p6 = por %p113_p4, %p112_p3 }
   0xa   : > { %p344_p7 = scmp.ge.s32.totalorder %s472_s15, 1  ;;  %p148_p8 = scmp.lt.s32.totalorder %s472_s15, 3 }
   0xc   : > { %p149_p9 = pnand %p344_p7, %p148_p8 }
   0xd   : > { %v187_v0 = vld [vmem:[%s614_s2] sm:$0x3] (!%p149_p9)  ;;  %vm192_vm0 = vcmask (!%p149_p9), 1041408   ;;  %p175_p10 = scmp.lt.s32.totalorder (!%p149_p9), %s521_s16, 1  ;;  %v474_v1 = vmov (!%p149_p9), 0.0   ;;  %vm475_vm1 = vmmov (!%p149_p9), 0  }
   0xe   : > { %152 = sbr.rel (%p149_p9) target bundleno = 259 (0x103), region = 32  ;;  %358 = vmatprep.subr.bf16.mxu0 (!%p149_p9), %v474_v1  ;;  %v194_v2 = vsel (!%p149_p9), %vm192_vm0, %v187_v0, 0  ;;  %360 = vmatprep.mubr.msk.bf16.mxu0 (!%p149_p9), %vm475_vm1, %v474_v1  ;;  %vm188_vm2 = vcmask (!%p149_p9), 31744   ;;  %s172_s4 = sand.u32 (!%p149_p9), 1, %s464_s13   ;;  %vm237_vm3 = vcmask (!%p149_p9), 257024   ;;  %v476_v6 = vmov (!%p149_p9), 0  }
   0xf   : > { %359 = vmatpush3.bf16.msra.mxu0 (!%p149_p9), %v194_v2  ;;  %s364_s5 = smul.u32 (!%p149_p9), 12, %s172_s4  ;;  %vm240_vm4 = vcmask (!%p149_p9), 253952   ;;  %vm241_vm5 = vsmask.f32 (!%p149_p9), 256  ;;  %s477_s25 = smov (!%p149_p9), [#allocation2]  }
  0x10   : > { %vm242_vm6 = vmand (!%p149_p9), %vm240_vm4, %vm241_vm5  ;;  %s365_s10 = smul.u32 (!%p149_p9), 192, %s521_s16 }
  0x11   : > { %s174_s6 = scalar_lea.vmem (!%p149_p9), [#allocation2], %s364_s5 }
  0x12   : > { %238 = vst.msk [vmem:[%s174_s6] sm:$0xf] (!%p149_p9), %vm237_vm3, %v476_v6  ;;  %s270_s11 = sshll.u32 (!%p149_p9), %s174_s6, 4  ;;  %s565_s20 = scalar_lea.hbm (!%p149_p9), %s615_s3, %s365_s10  ;;  %s567_s11 = int_to_ptr.vmem [resolvable:$true] %s270_s11 }
  0x13   : > { %s410_s24 = scalar_lea.vmem (!%p149_p9), %s567_s11, 192 }
  0x14   : > { %p411_p11 = scmp.ne.s32.totalorder (!%p149_p9), %s567_s11, %s410_s24 }
  0x15   : > { %s176_s26 = scalar_select %p175_p10, %s521_s16, 1 }
  0x16   : > { %s571_s16 = scalar_lea.sflag [#allocation3], %s172_s4  ;;  %p412_p12 = pnand %p411_p11, %p538_p5 }
  0x17   : > { %s353_s27 = sshll.u32 %s176_s26, 4  ;;  %s182_s9 = scalar_lea.vmem %s613_s1, %s176_s26 }
  0x18   : > { %s179_s30 = scalar_lea.vmem %s612_s0, %s353_s27  ;;  %v239_v7 = vld [vmem:[%s182_s9] sm:$0x1]  ;;  %p413_p13 = pneg %p412_p12 }
  0x19   : > { %v184_v3 = vld [vmem:[%s179_s30] sm:$0xff]  ;;  %v185_v4 = vld [vmem:[%s179_s30 + $0x8] sm:$0xff]  ;;  %s414_s26 = sshll.u32 %s477_s25, 4  ;;  %s415_s26 = int_to_ptr.vmem [resolvable:$false] %s414_s26 }
  0x1a   : > { %v186_v5 = vpack.c.bf16 %v185_v4, %v184_v3  ;;  %v243_v8 = vld [vmem:[%s174_s6] sm:$0x1]  ;;  %s416_s27 = scalar_lea.vmem %s415_s26, 384  ;;  %p417_p0 = scmp.lt.s32.totalorder %s567_s11, %s415_s26 }
  0x1b   : > { %v244_v9 = vsel %vm242_vm6, %v239_v7, %v243_v8  ;;  %p418_p1 = scmp.lt.s32.totalorder %s416_s27, %s410_s24 }
  0x1c   : > { %361 = vmatmul.mubr.msk.bf16.vlgmr.msra.gmra.mrb[0].mxu0 %vm188_vm2, %v186_v5  ;;  %245 = vst [vmem:[%s174_s6] sm:$0x1] %v244_v9 }
  0x1d   : > { %p419_p2 = por %p418_p1, %p417_p0 }
  0x1f   : > { %p420_p3 = pnand %p419_p2, %p413_p13 }
  0xef   : > { %v230_v10 = vpop.f32.mrb[0].mxu0 }
  0xf0   : > { %v354_v11 = vpack.c.bf16 %v230_v10, %v230_v10  ;;  %v362_v12 = vpop.f32.mrb[1].mxu0 }
  0xf1   : > { %v233_v13 = vpop.f32.mrb[2].mxu0 }
  0xf2   : > { %254 = vst.msk [vmem:[%s174_s6 + $0x4] sm:$0xf] %vm237_vm3, %v354_v11  ;;  %v355_v14 = vpack.c.bf16 %v233_v13, %v233_v13  ;;  %v363_v15 = vpop.f32.mrb[3].mxu0 }
  0xf4   : > { %255 = vst.msk [vmem:[%s174_s6 + $0x8] sm:$0xf] %vm237_vm3, %v355_v14 }
  0xf5   : > { %423 = shalt.err (!%p420_p3)
}
  0xf6   : > { %s424_s28 = scalar_lea.hbm %s565_s20, 192  ;;  %s428_s4 = scalar_lea.hbm %s615_s3, 384 }
  0xf7   : > { %p425_p4 = scmp.ne.s32.totalorder %s565_s20, %s424_s28  ;;  %p429_p9 = scmp.lt.u32.totalorder %s565_s20, %s615_s3 }
  0xf8   : > { %p430_p10 = scmp.lt.u32.totalorder %s428_s4, %s424_s28  ;;  %p432_p12 = scmp.lt.u32.totalorder %s424_s28, %s565_s20 }
  0xf9   : > { %p426_p7 = pnand %p425_p4, %p538_p5 }
  0xfa   : > { %p431_p11 = por %p430_p10, %p429_p9 }
  0xfb   : > { %p427_p8 = pneg %p426_p7 }
  0xfc   : > { %p433_p13 = por %p432_p12, %p431_p11 }
  0xfe   : > { %p434_p0 = pnand %p433_p13, %p427_p8 }
 0x100   : > { %437 = shalt.err (!%p434_p0)
}
 0x101   : > { %s478_s7 = smov 64   ;;  %s479_s8 = smov 4  }
 0x102   : > { %366 = dma.vmem_to_hbm [thread:$0]  (%p538_p5), %s567_s11, 192, %s565_s20, %s571_s16, %s478_s7, %s478_s7, %s479_s8  }
 0x103 PF: > { %p372_p1 = scmp.ge.s32.totalorder %s472_s15, 2  ;;  %s285_s9 = sand.u32 1, %s460_s12  }
 0x104   : > { %s286_s10 = scalar_lea.sflag [#allocation3], %s285_s9 }
 0x105   : > { %p369_p2 = pnand %p372_p1, %p542_p6 }
 0x107   : > { %455 = dma.done.wait (!%p369_p2), %s286_s10, 192  }
 0x108   : > { %457 = vsyncadd (!%p369_p2), %s286_s10, 4294967104  ;;  %p13_p3 = scmp.ge.s32.totalorder %s525_s18, 4   ;;  %s618_s12 = smov %s464_s13 }
 0x109   : > { %s619_s13 = smov %s468_s14  ;;  %s620_s14 = smov %s536_s21 }
 0x10a   : > { %s621_s15 = smov %s525_s18  ;;  %15 = sbr.rel (!%p13_p3) target bundleno = 3 (0x3), region = 70 }
 0x111   :  { %291 = vsyncpa [#allocation3], 1 }
 0x112   :  { %293 = vsyncpa [#allocation3 + $0x1], 1 }

// kernel: dit_uncond_forward.7
= control target key start
LH: loop header
LB: loop body
LE: loop exit
PB: predicated region body
PF: predicated region fallthrough
CT: control target
= control target key end

     0   :  { %v372_v21 = vmov 0.0   ;;  %vm373_vm0 = vmmov 0   ;;  %vm241_vm1 = vcmask 261120   ;;  %vm286_vm2 = vcmask 253952   ;;  %s470_s1 = inlined_call_operand.vmem [shape: bf16[256,32], index: 1, kind: input, shape index: {}]   ;;  %s471_s0 = inlined_call_operand.vmem [shape: f32[2,256], index: 0, kind: input, shape index: {}]   ;;  %s472_s3 = inlined_call_operand.vmem [shape: bf16[32,32], index: 3, kind: input, shape index: {}]   ;;  %s473_s2 = inlined_call_operand.vmem [shape: f32[1,32], index: 2, kind: input, shape index: {}]   ;;  %s474_s4 = inlined_call_operand.vmem [shape: f32[1,32], index: 4, kind: input, shape index: {}]   ;;  %s475_s5 = inlined_call_operand.vmem [shape: bf16[2,32], index: 5, kind: output, shape index: {}]  }
   0x1   :  { %v350_v0 = vld [vmem:[%s470_s1 + $0x40] sm:$0xff]   ;;  %v352_v2 = vld [vmem:[%s470_s1 + $0x48] sm:$0xff]   ;;  %v354_v4 = vld [vmem:[%s470_s1 + $0x50] sm:$0xff]   ;;  %340 = vmatprep.subr.bf16.mxu1 %v372_v21  ;;  %344 = vmatprep.mubr.msk.bf16.mxu1 %vm373_vm0, %v372_v21 }
   0x2   :  { %v351_v1 = vld [vmem:[%s470_s1] sm:$0xff]   ;;  %315 = vmatprep.subr.bf16.mxu0 %v350_v0  ;;  %v353_v3 = vld [vmem:[%s470_s1 + $0x8] sm:$0xff]   ;;  %v355_v5 = vld [vmem:[%s470_s1 + $0x10] sm:$0xff]  }
   0x3   :  { %316 = vmatpush3.bf16.msra.mxu0 %v351_v1  ;;  %v356_v6 = vld [vmem:[%s470_s1 + $0x58] sm:$0xff]   ;;  %v358_v8 = vld [vmem:[%s470_s1 + $0x60] sm:$0xff]   ;;  %v360_v10 = vld [vmem:[%s470_s1 + $0x68] sm:$0xff]  }
   0x4   :  { %317 = vmatprep.subr.bf16.mxu0 %v352_v2  ;;  %v357_v7 = vld [vmem:[%s470_s1 + $0x18] sm:$0xff]   ;;  %v359_v9 = vld [vmem:[%s470_s1 + $0x20] sm:$0xff]   ;;  %v361_v13 = vld [vmem:[%s470_s1 + $0x28] sm:$0xff]  }
   0x5   :  { %v292_v11 = vld.sshfl [vmem:[%s471_s0] sm:$0x33 pattern:$0x76325410]  ;;  %v362_v15 = vld [vmem:[%s470_s1 + $0x70] sm:$0xff]   ;;  %v364_v17 = vld [vmem:[%s470_s1 + $0x78] sm:$0xff]  }
   0x6   :  { %v30_v12 = vcombine.high %v292_v11, %v292_v11  ;;  %v363_v16 = vld [vmem:[%s470_s1 + $0x30] sm:$0xff]   ;;  %v365_v18 = vld [vmem:[%s470_s1 + $0x38] sm:$0xff]   ;;  %v33_v19 = vpack.c.bf16 %v292_v11, %v292_v11  ;;  %v366_v20 = vld [vmem:[%s472_s3] sm:$0xff]  }
   0x7   :  { %318 = vmatpush3.bf16.msra.mxu0 %v353_v3  ;;  %341 = vmatpush3.bf16.msra.mxu1 %v366_v20  ;;  %v367_v22 = vld [vmem:[%s472_s3 + $0x8] sm:$0xff]   ;;  %v293_v24 = vld [vmem:[%s473_s2] ss:$0 sm:$0xff] }
   0x8   :  { %319 = vmatprep.subr.bf16.mxu0 %v354_v4  ;;  %v34_v14 = vpack.c.bf16 %v30_v12, %v30_v12  ;;  %342 = vmatprep.subr.bf16.mxu1 %v372_v21  ;;  %v311_v36 = vld [vmem:[%s474_s4] ss:$0 sm:$0xff] }
   0xa   :  { %202 = vmatprep.mubr.bf16.mxu0 %v34_v14 }
   0xb   :  { %320 = vmatpush3.bf16.msra.mxu0 %v355_v5  ;;  %343 = vmatpush3.bf16.msra.mxu1 %v367_v22 }
   0xc   :  { %321 = vmatprep.subr.bf16.mxu0 %v356_v6 }
   0xf   :  { %322 = vmatpush3.bf16.msra.mxu0 %v357_v7 }
  0x10   :  { %323 = vmatprep.subr.bf16.mxu0 %v358_v8 }
  0x13   :  { %324 = vmatpush3.bf16.msra.mxu0 %v359_v9 }
  0x14   :  { %325 = vmatprep.subr.bf16.mxu0 %v360_v10 }
  0x17   :  { %326 = vmatpush3.bf16.msra.mxu0 %v361_v13 }
  0x18   :  { %327 = vmatprep.subr.bf16.mxu0 %v362_v15 }
  0x1b   :  { %328 = vmatpush3.bf16.msra.mxu0 %v363_v16 }
  0x1c   :  { %329 = vmatprep.subr.bf16.mxu0 %v364_v17 }
  0x1f   :  { %330 = vmatpush3.bf16.msra.mxu0 %v365_v18 }
  0x22   :  { %203 = vmatmul.mubr.bf16.vlgmr.msra.gmra.mrb[0].mxu0 %v33_v19 }
  0xf5   :  { %v331_v23 = vpop.f32.mrb[0].mxu0 }
  0xf6   :  { %v332_v25 = vpop.f32.mrb[1].mxu0 }
  0xf7   :  { %v333_v26 = vadd.f32 %v332_v25, %v331_v23  ;;  %v334_v27 = vpop.f32.mrb[2].mxu0 }
  0xf8   :  { %v335_v28 = vpop.f32.mrb[3].mxu0 }
  0xf9   :  { %v205_v29 = vadd.f32 %v333_v26, %v293_v24 }
  0xfb   :  { %v310_v30 = vmul.f32 -1.442695, %v205_v29 }
  0xfd   :  { %368 = vpow2.f32 %v310_v30 }
 0x107   :  { %v369_v31 = vpop.eup %368 }
 0x108   :  { %v213_v32 = vadd.f32 1.0, %v369_v31 }
 0x10a   :  { %370 = vrcp.f32 %v213_v32 }
 0x114   :  { %v371_v33 = vpop.eup %370 }
 0x115   :  { %v216_v34 = vmul.f32 %v371_v33, %v205_v29 }
 0x117   :  { %v217_v35 = vpack.c.bf16 %v216_v34, %v216_v34 }
 0x119   :  { %345 = vmatmul.mubr.msk.bf16.vlgmr.msra.gmra.mrb[0].mxu1 %vm241_vm1, %v217_v35 }
 0x1ec   :  { %v279_v37 = vpop.f32.mrb[0].mxu1 }
 0x1ed   :  { %v280_v38 = vadd.f32 %v311_v36, %v279_v37  ;;  %v346_v39 = vpop.f32.mrb[1].mxu1 }
 0x1ee   :  { %v282_v40 = vpop.f32.mrb[2].mxu1 }
 0x1ef   :  { %v285_v41 = vpack.c.bf16 %v280_v38, %v280_v38  ;;  %v347_v42 = vpop.f32.mrb[3].mxu1 }
 0x1f1   :  { %287 = vst.msk [vmem:[%s475_s5] sm:$0x1] %vm286_vm2, %v285_v41 }

// kernel: dit_uncond_forward.10
= control target key start
LH: loop header
LB: loop body
LE: loop exit
PB: predicated region body
PF: predicated region fallthrough
CT: control target
= control target key end

     0   :  { %s1799_s0 = inlined_call_operand.hbm [shape: bf16[2,24,32], index: 0, kind: input, shape index: {}]   ;;  %s1800_s1 = inlined_call_operand.hbm [shape: f32[1,32], index: 1, kind: input, shape index: {}]   ;;  %s1801_s2 = inlined_call_operand.hbm [shape: f32[1,32], index: 2, kind: input, shape index: {}]   ;;  %s1802_s3 = inlined_call_operand.hbm [shape: bf16[32,128], index: 3, kind: input, shape index: {}]   ;;  %s1803_s4 = inlined_call_operand.hbm [shape: f32[1,128], index: 4, kind: input, shape index: {}]   ;;  %s1804_s5 = inlined_call_operand.hbm [shape: bf16[128,32], index: 5, kind: input, shape index: {}]   ;;  %s1805_s6 = inlined_call_operand.hbm [shape: f32[1,32], index: 6, kind: input, shape index: {}]   ;;  %s1806_s7 = inlined_call_operand.hbm [shape: bf16[2,24,32], index: 7, kind: output, shape index: {}]  }
   0x1   :  { %1813 = sst [smem:[#allocation23_spill]] %s1800_s1 }
   0x2   :  { %1814 = sst [smem:[#allocation24_spill]] %s1801_s2 }
   0x3   :  { %1815 = sst [smem:[#allocation25_spill]] %s1802_s3 }
   0x4   :  { %1816 = sst [smem:[#allocation26_spill]] %s1803_s4 }
   0x5   :  { %1817 = sst [smem:[#allocation27_spill]] %s1806_s7 }
   0x6   :  { %12 = vsyncpa [#allocation5], 0 }
   0x7   :  { %14 = vsyncpa [#allocation5 + $0x1], 0 }
   0x8   :  { %15 = vsyncpa [#allocation8], 0 }
   0x9   :  { %16 = vsyncpa [#allocation11], 0 }
   0xa   :  { %17 = vsyncpa [#allocation14], 0 }
   0xb   :  { %18 = vsyncpa [#allocation6], 0 }
   0xc   :  { %20 = vsyncpa [#allocation6 + $0x1], 0  ;;  %s1434_s24 = smov 0   ;;  %s1436_s25 = smov 0  }
   0xd   :  { %s1438_s26 = smov 0   ;;  %s1440_s27 = smov 0  }
   0xe   :  { %s1442_s28 = smov 0   ;;  %s1444_s29 = smov 0  }
   0xf   :  { %s1446_s30 = smov 0   ;;  %s1448_s8 = smov 0  }
  0x10 LB: > { %1818 = sst [smem:[#allocation22_spill]] %s1364_s27  ;;  %s1810_s9 = sadd.s32 4294967295, %s1380_s8   ;;  %s1380_s8 = sphi %s1448_s8, %s26_s8   ;;  %s1376_s30 = sphi %s1446_s30, %s1846_s30   ;;  %s1372_s29 = sphi %s1444_s29, %s1845_s29   ;;  %s1368_s28 = sphi %s1442_s28, %s1844_s28   ;;  %s1364_s27 = sphi %s1440_s27, %s1843_s27   ;;  %s1360_s26 = sphi %s1438_s26, %s1842_s26   ;;  %s1356_s25 = sphi %s1436_s25, %s1841_s25   ;;  %s1352_s24 = sphi %s1434_s24, %s1840_s24  }
  0x11   : > { %p835_p0 = scmp.ge.s32.totalorder %s1380_s8, 1  ;;  %p1478_p1 = scmp.eq.s32.totalorder %s1810_s9, 0 }
  0x12   : > { %p247_p2 = scmp.lt.s32.totalorder %s1380_s8, 7  ;;  %s1382_s12 = smov [#allocation7]  }
  0x13   : > { %s1819_s10 = scalar_select %p1478_p1, 1, 0 }
  0x14   : > { %p1483_p3 = pnand %p835_p0, %p247_p2  ;;  %s260_s13 = sshll.u32 %s1382_s12, 4  ;;  %s261_s13 = int_to_ptr.vmem [resolvable:$true] %s260_s13 }
  0x15   : > { %s1383_s14 = smov [#allocation10]   ;;  %s1384_s17 = smov [#allocation13]  }
  0x16   : > { %s1820_s11 = scalar_select %p1483_p3, 1, 0 }
  0x17   : > { %p943_p4 = pneg %p1483_p3  ;;  %s283_s15 = sshll.u32 %s1383_s14, 4  ;;  %s1495_s15 = int_to_ptr.vmem [resolvable:$true] %s283_s15 }
  0x18   : > { %s1497_s18 = sshll.u32 %s1384_s17, 4  ;;  %s1822_s1 = sld [smem:[#allocation23_spill]]  ;;  %s313_s18 = int_to_ptr.vmem [resolvable:$true] %s1497_s18 }
  0x19   : > { %p1491_p5 = pnand %p943_p4, %p1478_p1 }
  0x1b   : > { %p1507_p7 = pneg %p1491_p5 }
  0x1e   : > { %s1072_s21 = scalar_lea.hbm %s1822_s1, 16 }
  0x1f   : > { %p1073_p6 = scmp.ne.s32.totalorder %s1822_s1, %s1072_s21  ;;  %p1079_p10 = scmp.lt.u32.totalorder %s1072_s21, %s1822_s1 }
  0x21   : > { %p1075_p8 = pnand %p1507_p7, %p1073_p6 }
  0x23   : > { %p1076_p9 = pneg %p1075_p8 }
  0x25   : > { %p1081_p11 = pnand %p1079_p10, %p1076_p9 }
  0x27   : > { %1084 = shalt.err (!%p1081_p11)
}
  0x28   : > { %s1085_s19 = scalar_lea.vmem %s261_s13, 16  ;;  %s1092_s20 = scalar_lea.vmem %s261_s13, 32 }
  0x29   : > { %p1086_p12 = scmp.ne.s32.totalorder %s261_s13, %s1085_s19  ;;  %p1093_p2 = scmp.lt.s32.totalorder %s261_s13, %s261_s13 }
  0x2a   : > { %p1094_p4 = scmp.lt.s32.totalorder %s1092_s20, %s1085_s19 }
  0x2b   : > { %p1088_p13 = pnand %p1086_p12, %p1507_p7 }
  0x2c   : > { %p1095_p3 = por %p1094_p4, %p1093_p2 }
  0x2d   : > { %p1089_p0 = pneg %p1088_p13 }
  0x2f   : > { %p1096_p1 = pnand %p1095_p3, %p1089_p0 }
  0x31   : > { %1099 = shalt.err (!%p1096_p1)
}
  0x32   : > { %946 = dma.hbm_to_vmem [thread:$0]  (!%p1491_p5), %s1822_s1, 16, %s261_s13, [#allocation8]  }
  0x33   : > { %s1824_s3 = sld [smem:[#allocation25_spill]] }
  0x39   : > { %s1100_s17 = scalar_lea.hbm %s1824_s3, 256 }
  0x3a   : > { %p1101_p6 = scmp.ne.s32.totalorder %s1824_s3, %s1100_s17  ;;  %p1107_p1 = scmp.lt.u32.totalorder %s1100_s17, %s1824_s3 }
  0x3c   : > { %p1103_p8 = pnand %p1101_p6, %p1507_p7 }
  0x3e   : > { %p1104_p9 = pneg %p1103_p8 }
  0x40   : > { %p1109_p3 = pnand %p1107_p1, %p1104_p9 }
  0x42   : > { %1112 = shalt.err (!%p1109_p3)
}
  0x43   : > { %s1113_s13 = scalar_lea.vmem %s1495_s15, 256  ;;  %p1121_p13 = scmp.lt.s32.totalorder %s1495_s15, %s1495_s15 }
  0x44   : > { %p1114_p10 = scmp.ne.s32.totalorder %s1495_s15, %s1113_s13  ;;  %p1122_p0 = scmp.lt.s32.totalorder %s1113_s13, %s1113_s13 }
  0x46   : > { %p1116_p11 = pnand %p1114_p10, %p1507_p7  ;;  %p1123_p2 = por %p1122_p0, %p1121_p13 }
  0x48   : > { %p1117_p12 = pneg %p1116_p11 }
  0x4a   : > { %p1124_p4 = pnand %p1123_p2, %p1117_p12 }
  0x4c   : > { %1127 = shalt.err (!%p1124_p4)
}
  0x4d   : > { %s1385_s7 = smov 64   ;;  %s1386_s9 = smov 4  }
  0x4e   : > { %952 = dma.hbm_to_vmem [thread:$0]  (!%p1491_p5), %s1824_s3, 256, %s1495_s15, [#allocation11], %s1385_s7, %s1385_s7, %s1386_s9  }
  0x4f   : > { %s1128_s17 = scalar_lea.hbm %s1804_s5, 1024 }
  0x50   : > { %p1129_p6 = scmp.ne.s32.totalorder %s1804_s5, %s1128_s17  ;;  %p1135_p1 = scmp.lt.u32.totalorder %s1128_s17, %s1804_s5 }
  0x52   : > { %p1131_p8 = pnand %p1129_p6, %p1507_p7 }
  0x54   : > { %p1132_p9 = pneg %p1131_p8 }
  0x56   : > { %p1137_p3 = pnand %p1135_p1, %p1132_p9 }
  0x58   : > { %1140 = shalt.err (!%p1137_p3)
}
  0x59   : > { %s1141_s22 = scalar_lea.vmem %s313_s18, 1024  ;;  %p1149_p13 = scmp.lt.s32.totalorder %s313_s18, %s313_s18 }
  0x5a   : > { %p1142_p10 = scmp.ne.s32.totalorder %s313_s18, %s1141_s22  ;;  %p1150_p0 = scmp.lt.s32.totalorder %s1141_s22, %s1141_s22 }
  0x5c   : > { %p1144_p11 = pnand %p1142_p10, %p1507_p7  ;;  %p1151_p2 = por %p1150_p0, %p1149_p13 }
  0x5e   : > { %p1145_p12 = pneg %p1144_p11 }
  0x60   : > { %p1152_p4 = pnand %p1151_p2, %p1145_p12 }
  0x62   : > { %1155 = shalt.err (!%p1152_p4)
}
  0x63   : > { %958 = dma.hbm_to_vmem [thread:$0]  (!%p1491_p5), %s1804_s5, 1024, %s313_s18, [#allocation14], %s1385_s7, %s1385_s7, %s1386_s9  }
  0x64   : > { %s1387_s1 = smov [#allocation9]   ;;  %s1388_s14 = smov [#allocation12]  }
  0x65   : > { %s271_s21 = sshll.u32 %s1387_s1, 4  ;;  %s299_s17 = sshll.u32 %s1388_s14, 4  ;;  %s272_s21 = int_to_ptr.vmem [resolvable:$true] %s271_s21  ;;  %s300_s17 = int_to_ptr.vmem [resolvable:$true] %s299_s17 }
  0x66   : > { %s1825_s2 = sld [smem:[#allocation24_spill]] }
  0x6c   : > { %s1156_s13 = scalar_lea.hbm %s1825_s2, 16 }
  0x6d   : > { %p1157_p6 = scmp.ne.s32.totalorder %s1825_s2, %s1156_s13  ;;  %p1163_p1 = scmp.lt.u32.totalorder %s1156_s13, %s1825_s2 }
  0x6f   : > { %p1159_p8 = pnand %p1157_p6, %p1507_p7 }
  0x71   : > { %p1160_p9 = pneg %p1159_p8 }
  0x73   : > { %p1165_p3 = pnand %p1163_p1, %p1160_p9 }
  0x75   : > { %1168 = shalt.err (!%p1165_p3)
}
  0x76   : > { %s1169_s18 = scalar_lea.vmem %s272_s21, 16  ;;  %s1176_s7 = scalar_lea.vmem %s272_s21, 32 }
  0x77   : > { %p1170_p10 = scmp.ne.s32.totalorder %s272_s21, %s1169_s18  ;;  %p1177_p13 = scmp.lt.s32.totalorder %s272_s21, %s272_s21 }
  0x78   : > { %p1178_p0 = scmp.lt.s32.totalorder %s1176_s7, %s1169_s18 }
  0x79   : > { %p1172_p11 = pnand %p1170_p10, %p1507_p7 }
  0x7a   : > { %p1179_p2 = por %p1178_p0, %p1177_p13 }
  0x7b   : > { %p1173_p12 = pneg %p1172_p11 }
  0x7d   : > { %p1180_p4 = pnand %p1179_p2, %p1173_p12 }
  0x7f   : > { %1183 = shalt.err (!%p1180_p4)
}
  0x80   : > { %949 = dma.hbm_to_vmem [thread:$0]  (!%p1491_p5), %s1825_s2, 16, %s272_s21, [#allocation8]  }
  0x81   : > { %s1826_s4 = sld [smem:[#allocation26_spill]] }
  0x87   : > { %s1184_s1 = scalar_lea.hbm %s1826_s4, 16 }
  0x88   : > { %p1185_p6 = scmp.ne.s32.totalorder %s1826_s4, %s1184_s1  ;;  %p1191_p1 = scmp.lt.u32.totalorder %s1184_s1, %s1826_s4 }
  0x8a   : > { %p1187_p8 = pnand %p1185_p6, %p1507_p7 }
  0x8c   : > { %p1188_p9 = pneg %p1187_p8 }
  0x8e   : > { %p1193_p3 = pnand %p1191_p1, %p1188_p9 }
  0x90   : > { %1196 = shalt.err (!%p1193_p3)
}
  0x91   : > { %s1197_s22 = scalar_lea.vmem %s300_s17, 16  ;;  %s1204_s21 = scalar_lea.vmem %s300_s17, 32 }
  0x92   : > { %p1198_p10 = scmp.ne.s32.totalorder %s300_s17, %s1197_s22  ;;  %p1205_p13 = scmp.lt.s32.totalorder %s300_s17, %s300_s17 }
  0x93   : > { %p1206_p0 = scmp.lt.s32.totalorder %s1204_s21, %s1197_s22 }
  0x94   : > { %p1200_p11 = pnand %p1198_p10, %p1507_p7 }
  0x95   : > { %p1207_p2 = por %p1206_p0, %p1205_p13 }
  0x96   : > { %p1201_p12 = pneg %p1200_p11 }
  0x98   : > { %p1208_p4 = pnand %p1207_p2, %p1201_p12 }
  0x9a   : > { %1211 = shalt.err (!%p1208_p4)
}
  0x9b   : > { %955 = dma.hbm_to_vmem [thread:$0]  (!%p1491_p5), %s1826_s4, 16, %s300_s17, [#allocation11]  }
  0x9c   : > { %s1389_s7 = smov [#allocation15]   ;;  %s1212_s23 = scalar_lea.hbm %s1805_s6, 16 }
  0x9d   : > { %s326_s3 = sshll.u32 %s1389_s7, 4  ;;  %p1213_p6 = scmp.ne.s32.totalorder %s1805_s6, %s1212_s23  ;;  %s327_s3 = int_to_ptr.vmem [resolvable:$true] %s326_s3 }
  0x9e   : > { %p1219_p1 = scmp.lt.u32.totalorder %s1212_s23, %s1805_s6 }
  0x9f   : > { %p1215_p8 = pnand %p1213_p6, %p1507_p7 }
  0xa1   : > { %p1216_p9 = pneg %p1215_p8 }
  0xa3   : > { %p1221_p3 = pnand %p1219_p1, %p1216_p9 }
  0xa5   : > { %1224 = shalt.err (!%p1221_p3)
}
  0xa6   : > { %s1225_s17 = scalar_lea.vmem %s327_s3, 16  ;;  %s1232_s13 = scalar_lea.vmem %s327_s3, 32 }
  0xa7   : > { %p1226_p10 = scmp.ne.s32.totalorder %s327_s3, %s1225_s17  ;;  %p1233_p13 = scmp.lt.s32.totalorder %s327_s3, %s327_s3 }
  0xa8   : > { %p1234_p0 = scmp.lt.s32.totalorder %s1232_s13, %s1225_s17 }
  0xa9   : > { %p1228_p11 = pnand %p1226_p10, %p1507_p7 }
  0xaa   : > { %p1235_p2 = por %p1234_p0, %p1233_p13 }
  0xab   : > { %p1229_p12 = pneg %p1228_p11 }
  0xad   : > { %p1236_p4 = pnand %p1235_p2, %p1229_p12 }
  0xaf   : > { %1239 = shalt.err (!%p1236_p4)
}
  0xb0   : > { %961 = dma.hbm_to_vmem [thread:$0]  (!%p1491_p5), %s1805_s6, 16, %s327_s3, [#allocation14]  }
  0xb1   : > { %s41_s12 = sadd.s32 1, %s1372_s29  ;;  %s45_s16 = sadd.s32 1, %s1376_s30 }
  0xb2   : > { %p43_p7 = scmp.ge.s32.totalorder %s41_s12, 3  ;;  %s834_s15 = sadd.s32 4294967294, %s1380_s8  }
  0xb3   : > { %s54_s18 = sadd.s32 1, %s1360_s26  ;;  %p61_p6 = scmp.ne.s32.totalorder %s1360_s26, %s1356_s25 }
  0xb4   : > { %s1848_s12 = smov (%p43_p7, %s41_s12), 0  ;;  %s1850_s16 = smov (!%p43_p7, %s45_s16), %s1376_s30 }
  0xb5   : > { %s50_s7 = ssub.s32 %s1372_s29, %s1848_s12  ;;  %p47_p8 = scmp.ge.s32.totalorder %s1850_s16, 2 }
  0xb6   : > { %p67_p9 = scmp.ne.s32.totalorder %s1356_s25, %s1352_s24  ;;  %p62_p1 = scmp.eq.s32.totalorder %s1380_s8, 0 }
  0xb7   : > { %s1827_s3 = sadd.s32 4294967295, %s1380_s8   ;;  %s1852_s16 = smov (%p47_p8, %s1850_s16), 0 }
  0xb8   : > { %p234_p5 = scmp.eq.s32.totalorder %s1827_s3, 5  ;;  %p1828_p3 = scmp.ne.s32.totalorder %s1819_s10, 0 }
  0xb9   : > { %s49_s23 = ssub.s32 %s1376_s30, %s1852_s16  ;;  %p240_p12 = scmp.eq.s32.totalorder %s834_s15, 5 }
  0xba   : > { %p1639_p10 = por %p1828_p3, %p67_p9  ;;  %p1643_p11 = por %p234_p5, %p61_p6 }
  0xbb   : > { %s51_s1 = sor.u32 %s50_s7, %s49_s23  ;;  %p1649_p13 = por %p62_p1, %p61_p6 }
  0xbc   : > { %s1830_s27 = scalar_select %p1643_p11, 1, 0 }
  0xbd   : > { %p52_p0 = scmp.eq.s32.totalorder %s51_s1, 0  ;;  %p1653_p2 = por %p240_p12, %p67_p9 }
  0xbe   : > { %s337_s20 = sand.u32 1, %s1360_s26   ;;  %s913_s17 = smul.u32 3, %s1376_s30 }
  0xbf   : > { %s1832_s19 = scalar_select %p1653_p2, 1, 0 }
  0xc0   : > { %s1660_s13 = scalar_select %p52_p0, %s1360_s26, %s54_s18  }
  0xc1   : > { %p976_p4 = scmp.lt.s32.totalorder %s1380_s8, 6  ;;  %s843_s22 = sshll.u32 %s337_s20, 2 }
  0xc2   : > { %s346_s21 = sadd.s32 %s1372_s29, %s913_s17  ;;  %s341_s15 = scalar_lea.vmem [#allocation4], %s843_s22 }
  0xc3   : > { %s844_s3 = sshll.u32 %s346_s21, 6  ;;  %s350_s7 = sshll.u32 %s341_s15, 4  ;;  %s1669_s7 = int_to_ptr.vmem [resolvable:$true] %s350_s7 }
  0xc4   : > { %s1667_s4 = scalar_lea.hbm %s1799_s0, %s844_s3  ;;  %p1673_p7 = pnand %p976_p4, %p1649_p13 }
  0xc5   : > { %s338_s1 = scalar_lea.sflag [#allocation5], %s337_s20  ;;  %s1240_s17 = scalar_lea.hbm %s1667_s4, 64 }
  0xc6   : > { %p1241_p6 = scmp.ne.s32.totalorder %s1667_s4, %s1240_s17  ;;  %p1242_p8 = pneg %p1673_p7 }
  0xc7   : > { %s1245_s21 = scalar_lea.hbm %s1799_s0, 384  ;;  %p1246_p5 = scmp.lt.u32.totalorder %s1667_s4, %s1799_s0 }
  0xc8   : > { %p1243_p9 = pnand %p1242_p8, %p1241_p6  ;;  %p1247_p3 = scmp.lt.u32.totalorder %s1245_s21, %s1240_s17 }
  0xc9   : > { %p1249_p13 = scmp.lt.u32.totalorder %s1240_s17, %s1667_s4 }
  0xca   : > { %p1244_p1 = pneg %p1243_p9  ;;  %p1248_p12 = por %p1247_p3, %p1246_p5 }
  0xcc   : > { %p1250_p0 = por %p1249_p13, %p1248_p12 }
  0xce   : > { %p1251_p4 = pnand %p1250_p0, %p1244_p1 }
  0xd0   : > { %1254 = shalt.err (!%p1251_p4)
}
  0xd1   : > { %s1255_s20 = scalar_lea.vmem %s1669_s7, 64  ;;  %s1390_s15 = smov [#allocation4]  }
  0xd2   : > { %p1256_p6 = scmp.ne.s32.totalorder %s1669_s7, %s1255_s20  ;;  %s1260_s23 = sshll.u32 %s1390_s15, 4  ;;  %s1261_s23 = int_to_ptr.vmem [resolvable:$false] %s1260_s23 }
  0xd3   : > { %s1262_s2 = scalar_lea.vmem %s1261_s23, 128  ;;  %p1263_p11 = scmp.lt.s32.totalorder %s1669_s7, %s1261_s23 }
  0xd4   : > { %p1258_p9 = pnand %p1256_p6, %p1242_p8  ;;  %p1264_p5 = scmp.lt.s32.totalorder %s1262_s2, %s1255_s20 }
  0xd6   : > { %p1259_p2 = pneg %p1258_p9  ;;  %p1265_p3 = por %p1264_p5, %p1263_p11 }
  0xd8   : > { %p1266_p12 = pnand %p1265_p3, %p1259_p2 }
  0xda   : > { %1269 = shalt.err (!%p1266_p12)
}
  0xdb   : > { %965 = dma.hbm_to_vmem [thread:$0]  (!%p1673_p7), %s1667_s4, 64, %s1669_s7, %s338_s1  }
  0xdc   : > { %p1834_p1 = scmp.ne.s32.totalorder %s1820_s11, 0 }
  0xdd   : > { %s1705_s17 = sand.u32 (!%p1834_p1), 1, %s1356_s25  }
  0xde   : > { %359 = sbr.rel (%p1834_p1) target bundleno = 1048 (0x418), region = 48  ;;  %s846_s22 = sshll.u32 (!%p1834_p1), %s1705_s17, 2 }
  0xdf   : > { %s362_s21 = scalar_lea.sflag (!%p1834_p1), [#allocation5], %s1705_s17  ;;  %s1711_s14 = scalar_lea.vmem (!%p1834_p1), [#allocation4], %s846_s22 }
  0xe5   : > { %1331 = dma.done.wait (%p1639_p10), %s362_s21, 64  }
  0xe6   : > { %1333 = vsyncadd (%p1639_p10), %s362_s21, 4294967232  ;;  %p1835_p11 = scmp.ne.s32.totalorder %s1819_s10, 0 }
  0xe8   : > { %1335 = dma.done.wait (%p1835_p11), [#allocation8], 32  }
  0xe9   : > { %1337 = vsyncadd (%p1835_p11), [#allocation8], 4294967264 }
  0xea   : > { %1339 = dma.done.wait (%p1835_p11), [#allocation11], 272  }
  0xeb   : > { %1341 = vsyncadd (%p1835_p11), [#allocation11], 4294967024 }
  0xec   : > { %1343 = dma.done.wait (%p1835_p11), [#allocation14], 1040  }
  0xed   : > { %1345 = vsyncadd (%p1835_p11), [#allocation14], 4294966256  ;;  %vm430_vm0 = vcmask 261120   ;;  %v1391_v0 = vmov 0.0   ;;  %v426_v1 = vld [vmem:[%s1711_s14] sm:$0xf] }
  0xee   : > { %462 = vst.msk [vmem:[#allocation3] sm:$0xff] %vm430_vm0, %v1391_v0  ;;  %885 = vmatprep.subr.bf16.mxu0 %v1391_v0  ;;  %893 = vmatprep.subr.bf16.mxu1 %v1391_v0  ;;  %v427_v2 = vunpack.c.l.bf16 %v426_v1  ;;  %v1058_v9 = vld [vmem:[#allocation10] sm:$0xff]   ;;  %v1059_v10 = vld [vmem:[#allocation10 + $0x8] sm:$0xff]   ;;  %vm1392_vm1 = vmmov 0   ;;  %v854_v15 = vld [vmem:[#allocation7] ss:$0 sm:$0xff] }
  0xef   : > { %886 = vmatpush3.bf16.msra.mxu0 %v1058_v9  ;;  %889 = vmatprep.mubr.msk.bf16.mxu0 %vm1392_vm1, %v1391_v0  ;;  %v855_v17 = vld [vmem:[#allocation9] ss:$0 sm:$0xff]  ;;  %vm460_vm2 = vcmask 257024   ;;  %v1060_v22 = vld [vmem:[#allocation13] sm:$0xff]   ;;  %v1062_v24 = vld [vmem:[#allocation13 + $0x10] sm:$0xff]   ;;  %s1836_s4 = sld [smem:[#allocation22_spill]] }
  0xf0   : > { %v431_v3 = vsel %vm430_vm0, %v427_v2, 0.0  ;;  %887 = vmatprep.subr.bf16.mxu0 %v1391_v0  ;;  %909 = vmatprep.mubr.msk.bf16.mxu1 %vm1392_vm1, %v1391_v0  ;;  %v1061_v23 = vld [vmem:[#allocation13 + $0x8] sm:$0xff]   ;;  %v1063_v25 = vld [vmem:[#allocation13 + $0x18] sm:$0xff]   ;;  %v1064_v26 = vld [vmem:[#allocation13 + $0x20] sm:$0xff]   ;;  %s914_s10 = smul.u32 3, %s1368_s28  ;;  %s419_s7 = scalar_lea.vmem [#allocation16], %s846_s22 }
  0xf1   : > { %432 = vadd.xlane.f32.xlu0 %v431_v3  ;;  %894 = vmatpush3.bf16.msra.mxu1 %v1060_v22  ;;  %v1065_v27 = vld [vmem:[#allocation13 + $0x28] sm:$0xff]   ;;  %v1066_v28 = vld [vmem:[#allocation13 + $0x30] sm:$0xff]   ;;  %v1067_v29 = vld [vmem:[#allocation13 + $0x38] sm:$0xff]   ;;  %s682_s18 = sshll.u32 %s419_s7, 4  ;;  %s1837_s20 = sld [smem:[#allocation27_spill]]  ;;  %s1746_s18 = int_to_ptr.vmem [resolvable:$true] %s682_s18 }
  0xf2   : > { %895 = vmatprep.subr.bf16.mxu1 %v1391_v0  ;;  %v856_v30 = vld [vmem:[#allocation12] ss:$0 sm:$0xff]  ;;  %v651_v52 = vld [vmem:[%s1711_s14] sm:$0xf]  ;;  %v868_v55 = vld [vmem:[#allocation15] ss:$0 sm:$0xff] }
  0xf3   : > { %888 = vmatpush3.bf16.msra.mxu0 %v1059_v10  ;;  %v652_v53 = vunpack.c.l.bf16 %v651_v52  ;;  %s667_s28 = scalar_lea.sflag [#allocation6], %s1705_s17  ;;  %s1270_s23 = scalar_lea.vmem %s1746_s18, 64 }
  0xf4   : > { %p1271_p10 = scmp.ne.s32.totalorder %s1746_s18, %s1270_s23  ;;  %p1838_p2 = scmp.ne.s32.totalorder %s1830_s27, 0 }
  0xf5   : > { %896 = vmatpush3.bf16.msra.mxu1 %v1061_v23  ;;  %v540_v46 = vld [vmem:[#allocation3] sm:$0xff]  ;;  %s678_s11 = sadd.s32 %s1836_s4, %s914_s10  ;;  %s1393_s2 = smov [#allocation16]  }
  0xf6   : > { %897 = vmatprep.subr.bf16.mxu1 %v1391_v0  ;;  %s870_s9 = sshll.u32 %s678_s11, 6  ;;  %p1272_p7 = pnand %p1271_p10, %p1838_p2 }
  0xf7   : > { %s1744_s15 = scalar_lea.hbm %s1837_s20, %s870_s9  ;;  %s1274_s22 = sshll.u32 %s1393_s2, 4  ;;  %s1275_s22 = int_to_ptr.vmem [resolvable:$false] %s1274_s22 }
  0xf8   : > { %p1273_p8 = pneg %p1272_p7  ;;  %s1276_s21 = scalar_lea.vmem %s1275_s22, 128 }
  0xf9   : > { %898 = vmatpush3.bf16.msra.mxu1 %v1062_v24  ;;  %p1277_p13 = scmp.lt.s32.totalorder %s1746_s18, %s1275_s22  ;;  %p1278_p0 = scmp.lt.s32.totalorder %s1276_s21, %s1270_s23 }
  0xfa   : > { %899 = vmatprep.subr.bf16.mxu1 %v1391_v0 }
  0xfb   : > { %p1279_p4 = por %p1278_p0, %p1277_p13 }
  0xfd   : > { %900 = vmatpush3.bf16.msra.mxu1 %v1063_v25  ;;  %p1280_p6 = pnand %p1279_p4, %p1273_p8 }
  0xfe   : > { %901 = vmatprep.subr.bf16.mxu1 %v1391_v0 }
 0x101   : > { %902 = vmatpush3.bf16.msra.mxu1 %v1064_v26 }
 0x102   : > { %903 = vmatprep.subr.bf16.mxu1 %v1391_v0 }
 0x105   : > { %904 = vmatpush3.bf16.msra.mxu1 %v1065_v27 }
 0x106   : > { %905 = vmatprep.subr.bf16.mxu1 %v1391_v0 }
 0x109   : > { %906 = vmatpush3.bf16.msra.mxu1 %v1066_v28 }
 0x10a   : > { %907 = vmatprep.subr.bf16.mxu1 %v1391_v0 }
 0x10d   : > { %908 = vmatpush3.bf16.msra.mxu1 %v1067_v29 }
 0x17e   : > { %v433_v4 = vpop.xlane.xlu0 %432 }
 0x17f   : > { %v435_v5 = vmul.f32 0.03125, %v433_v4 }
 0x181   : > { %v436_v6 = vsub.f32 %v427_v2, %v435_v5 }
 0x183   : > { %v437_v7 = vmul.f32 %v436_v6, %v436_v6 }
 0x185   : > { %v438_v8 = vsel %vm430_vm0, %v437_v7, 0.0 }
 0x186   : > { %439 = vadd.xlane.f32.xlu0 %v438_v8 }
 0x213   : > { %v440_v11 = vpop.xlane.xlu0 %439 }
 0x214   : > { %v441_v12 = vmul.f32 0.03125, %v440_v11 }
 0x216   : > { %v442_v13 = vadd.f32 1e-05, %v441_v12 }
 0x218   : > { %1068 = vrsqrt.f32 %v442_v13 }
 0x222   : > { %v1069_v14 = vpop.eup %1068 }
 0x223   : > { %v444_v16 = vmul.f32 %v1069_v14, %v436_v6 }
 0x225   : > { %v451_v18 = vmul.f32 %v854_v15, %v444_v16 }
 0x227   : > { %v458_v19 = vadd.f32 %v855_v17, %v451_v18 }
 0x229   : > { %v459_v20 = vpack.c.bf16 %v458_v19, %v458_v19 }
 0x22b   : > { %461 = vst.msk [vmem:[#allocation2] sm:$0xf] %vm460_vm2, %v459_v20 }
 0x232   : > { %v463_v21 = vld [vmem:[#allocation2] sm:$0xf] }
 0x233   : > { %890 = vmatmul.mubr.msk.bf16.vlgmr.msra.gmra.mrb[0].mxu0 %vm430_vm0, %v463_v21 }
 0x306   : > { %v525_v31 = vpop.f32.mrb[0].mxu0 }
 0x307   : > { %v526_v32 = vadd.f32 %v856_v30, %v525_v31  ;;  %v891_v33 = vpop.f32.mrb[1].mxu0 }
 0x308   : > { %v528_v34 = vpop.f32.mrb[2].mxu0 }
 0x309   : > { %v531_v35 = vmul.f32 %v526_v32, %v526_v32  ;;  %v892_v36 = vpop.f32.mrb[3].mxu0 }
 0x30b   : > { %v532_v37 = vmul.f32 %v531_v35, %v526_v32 }
 0x30d   : > { %v533_v38 = vmul.f32 0.044715, %v532_v37 }
 0x30f   : > { %v534_v39 = vadd.f32 %v533_v38, %v526_v32 }
 0x311   : > { %v535_v40 = vmul.f32 0.7978846, %v534_v39 }
 0x313   : > { %1070 = vtanh.f32 %v535_v40 }
 0x31d   : > { %v1071_v41 = vpop.eup %1070 }
 0x31e   : > { %v537_v42 = vadd.f32 1.0, %v1071_v41 }
 0x320   : > { %v538_v43 = vmul.f32 0.5, %v537_v42 }
 0x322   : > { %v539_v44 = vmul.f32 %v538_v43, %v526_v32 }
 0x324   : > { %v541_v45 = vpack.c.bf16 %v539_v44, %v539_v44 }
 0x326   : > { %910 = vmatmul.mubr.bf16.vlgmr.msra.gmra.mrb[0].mxu1 %v541_v45 }
 0x3f9   : > { %v640_v47 = vpop.f32.mrb[0].mxu1 }
 0x3fa   : > { %v646_v48 = vadd.f32 %v640_v47, %v540_v46  ;;  %v911_v49 = vpop.f32.mrb[1].mxu1 }
 0x3fb   : > { %v643_v50 = vpop.f32.mrb[2].mxu1 }
 0x3fc   : > { %647 = vst.msk [vmem:[#allocation3] sm:$0xff] %vm430_vm0, %v646_v48  ;;  %v912_v51 = vpop.f32.mrb[3].mxu1 }
 0x403   : > { %v653_v54 = vld [vmem:[#allocation3] sm:$0xff] }
 0x404   : > { %v654_v56 = vadd.f32 %v653_v54, %v652_v53 }
 0x406   : > { %v662_v57 = vadd.f32 %v868_v55, %v654_v56 }
 0x408   : > { %v663_v58 = vpack.c.bf16 %v662_v57, %v662_v57 }
 0x40a   : > { %665 = vst.msk [vmem:[%s419_s7] sm:$0xf] %vm460_vm2, %v663_v58 }
 0x40b   : > { %1283 = shalt.err (!%p1280_p6)
}
 0x40c   : > { %s1284_s17 = scalar_lea.hbm %s1744_s15, 64  ;;  %s1288_s10 = scalar_lea.hbm %s1837_s20, 384 }
 0x40d   : > { %p1285_p9 = scmp.ne.s32.totalorder %s1744_s15, %s1284_s17  ;;  %p1289_p12 = scmp.lt.u32.totalorder %s1744_s15, %s1837_s20 }
 0x40e   : > { %p1290_p1 = scmp.lt.u32.totalorder %s1288_s10, %s1284_s17  ;;  %p1292_p10 = scmp.lt.u32.totalorder %s1284_s17, %s1744_s15 }
 0x40f   : > { %p1286_p5 = pnand %p1285_p9, %p1838_p2 }
 0x410   : > { %p1291_p11 = por %p1290_p1, %p1289_p12 }
 0x411   : > { %p1287_p3 = pneg %p1286_p5 }
 0x412   : > { %p1293_p7 = por %p1292_p10, %p1291_p11 }
 0x414   : > { %p1294_p8 = pnand %p1293_p7, %p1287_p3 }
 0x416   : > { %1297 = shalt.err (!%p1294_p8)
}
 0x417   : > { %941 = dma.vmem_to_hbm [thread:$0]  (%p1838_p2), %s1746_s18, 64, %s1744_s15, %s667_s28  }
 0x418 PF: > { %p983_p13 = scmp.ge.s32.totalorder %s1380_s8, 2  ;;  %s694_s7 = sand.u32 1, %s1352_s24  }
 0x419   : > { %p1839_p0 = scmp.ne.s32.totalorder %s1832_s19, 0  ;;  %s695_s1 = scalar_lea.sflag [#allocation6], %s694_s7 }
 0x41b   : > { %p967_p4 = pnand %p983_p13, %p1839_p0 }
 0x41d   : > { %1347 = dma.done.wait (!%p967_p4), %s695_s1, 64  }
 0x41e   : > { %1349 = vsyncadd (!%p967_p4), %s695_s1, 4294967232  ;;  %s26_s8 = sadd.s32 1, %s1380_s8   ;;  %s1840_s24 = smov %s1356_s25 }
 0x41f   : > { %p23_p6 = scmp.ge.s32.totalorder %s26_s8, 8   ;;  %s1841_s25 = smov %s1360_s26 }
 0x420   : > { %s1842_s26 = smov %s1660_s13  ;;  %s1843_s27 = smov %s1372_s29 }
 0x421   : > { %s1844_s28 = smov %s1376_s30  ;;  %s1845_s29 = smov %s1848_s12 }
 0x422   : > { %s1846_s30 = smov %s1852_s16  ;;  %25 = sbr.rel (!%p23_p6) target bundleno = 16 (0x10), region = 128 }
 0x429   :  { %700 = vsyncpa [#allocation5], 1 }
 0x42a   :  { %702 = vsyncpa [#allocation5 + $0x1], 1 }
 0x42b   :  { %703 = vsyncpa [#allocation8], 1 }
 0x42c   :  { %704 = vsyncpa [#allocation11], 1 }
 0x42d   :  { %705 = vsyncpa [#allocation14], 1 }
 0x42e   :  { %706 = vsyncpa [#allocation6], 1 }
 0x42f   :  { %708 = vsyncpa [#allocation6 + $0x1], 1 }

// kernel: dit_uncond_forward.13
= control target key start
LH: loop header
LB: loop body
LE: loop exit
PB: predicated region body
PF: predicated region fallthrough
CT: control target
= control target key end

     0   :  { %7 = vsyncpa [#allocation3], 0  ;;  %s763_s0 = inlined_call_operand.hbm [shape: bf16[2,24,32], index: 0, kind: input, shape index: {}]   ;;  %s764_s1 = inlined_call_operand.hbm [shape: bf16[4,32], index: 1, kind: input, shape index: {}]   ;;  %s765_s2 = inlined_call_operand.hbm [shape: f32[2,4,16], index: 2, kind: output, shape index: {}]  }
   0x1   :  { %9 = vsyncpa [#allocation3 + $0x1], 0 }
   0x2   :  { %10 = vsyncpa [#allocation6], 0 }
   0x3   :  { %11 = vsyncpa [#allocation4], 0 }
   0x4   :  { %13 = vsyncpa [#allocation4 + $0x1], 0  ;;  %s566_s9 = smov 0   ;;  %s568_s10 = smov 0  }
   0x5   :  { %s570_s11 = smov 0   ;;  %s572_s12 = smov 0  }
   0x6 LB: > { %s587_s13 = sadd.s32 4294967295, %s542_s12   ;;  %s327_s14 = sadd.s32 4294967294, %s542_s12   ;;  %s542_s12 = sphi %s572_s12, %s790_s12   ;;  %s538_s11 = sphi %s570_s11, %s789_s11   ;;  %s534_s10 = sphi %s568_s10, %s788_s10   ;;  %s530_s9 = sphi %s566_s9, %s787_s9  }
   0x7   : > { %s591_s15 = sadd.s32 1, %s542_s12   ;;  %s26_s16 = sadd.s32 1, %s538_s11 }
   0x8   : > { %s23_s17 = ssub.s32 %s542_s12, %s591_s15  ;;  %p33_p0 = scmp.ne.s32.totalorder %s538_s11, %s534_s10 }
   0x9   : > { %p24_p1 = scmp.eq.s32.totalorder %s23_s17, 0  ;;  %p34_p2 = scmp.eq.s32.totalorder %s542_s12, 0 }
   0xa   : > { %p39_p3 = scmp.ne.s32.totalorder %s534_s10, %s530_s9  ;;  %p766_p4 = scmp.eq.s32.totalorder %s587_s13, 0 }
   0xb   : > { %s603_s18 = scalar_select %p24_p1, %s538_s11, %s26_s16  }
   0xc   : > { %p605_p5 = por %p34_p2, %p33_p0  ;;  %p611_p6 = por %p766_p4, %p39_p3 }
   0xd   : > { %p84_p7 = scmp.eq.s32.totalorder %s587_s13, 1  ;;  %p90_p8 = scmp.eq.s32.totalorder %s327_s14, 1 }
   0xe   : > { %s772_s20 = scalar_select %p611_p6, 1, 0 }
   0xf   : > { %p328_p9 = scmp.ge.s32.totalorder %s542_s12, 1  ;;  %p97_p10 = scmp.lt.s32.totalorder %s542_s12, 3 }
  0x10   : > { %p618_p11 = por %p84_p7, %p33_p0  ;;  %p622_p12 = por %p90_p8, %p39_p3 }
  0x11   : > { %p626_p13 = pnand %p328_p9, %p97_p10  ;;  %s544_s24 = smov [#allocation5]  }
  0x12   : > { %s773_s21 = scalar_select %p618_p11, 1, 0 }
  0x13   : > { %s774_s22 = scalar_select %p622_p12, 1, 0 }
  0x14   : > { %s775_s23 = scalar_select %p626_p13, 1, 0 }
  0x15   : > { %p360_p2 = pneg %p626_p13  ;;  %s110_s25 = sshll.u32 %s544_s24, 4  ;;  %s111_s25 = int_to_ptr.vmem [resolvable:$true] %s110_s25 }
  0x16   : > { %p373_p4 = scmp.lt.s32.totalorder %s542_s12, 2  ;;  %p776_p0 = scmp.eq.s32.totalorder %s587_s13, 0 }
  0x17   : > { %s121_s27 = sand.u32 1, %s538_s11   ;;  %s414_s4 = scalar_lea.hbm %s764_s1, 32 }
  0x18   : > { %p636_p7 = pnand %p360_p2, %p776_p0  ;;  %p643_p3 = pnand %p373_p4, %p605_p5 }
  0x19   : > { %s349_s29 = smul.u32 12, %s121_s27  ;;  %p415_p8 = scmp.ne.s32.totalorder %s764_s1, %s414_s4 }
  0x1a   : > { %s778_s28 = scalar_select %p643_p3, 1, 0 }
  0x1b   : > { %p416_p9 = pneg %p636_p7  ;;  %p421_p4 = scmp.lt.u32.totalorder %s414_s4, %s764_s1 }
  0x1d   : > { %p417_p10 = pnand %p416_p9, %p415_p8 }
  0x1f   : > { %p418_p2 = pneg %p417_p10 }
  0x21   : > { %p423_p5 = pnand %p421_p4, %p418_p2 }
  0x23   : > { %426 = shalt.err (!%p423_p5)
}
  0x24   : > { %s427_s14 = scalar_lea.vmem %s111_s25, 32  ;;  %p435_p11 = scmp.lt.s32.totalorder %s111_s25, %s111_s25 }
  0x25   : > { %p428_p0 = scmp.ne.s32.totalorder %s111_s25, %s427_s14  ;;  %p436_p6 = scmp.lt.s32.totalorder %s427_s14, %s427_s14 }
  0x27   : > { %p430_p1 = pnand %p428_p0, %p416_p9  ;;  %p437_p13 = por %p436_p6, %p435_p11 }
  0x29   : > { %p431_p12 = pneg %p430_p1 }
  0x2b   : > { %p438_p3 = pnand %p437_p13, %p431_p12 }
  0x2d   : > { %441 = shalt.err (!%p438_p3)
}
  0x2e   : > { %363 = dma.hbm_to_vmem [thread:$0]  (!%p636_p7), %s764_s1, 32, %s111_s25, [#allocation6]  }
  0x2f   : > { %s350_s19 = smul.u32 192, %s542_s12  ;;  %s125_s24 = scalar_lea.vmem [#allocation2], %s349_s29 }
  0x30   : > { %s132_s30 = sshll.u32 %s125_s24, 4  ;;  %s671_s26 = scalar_lea.sflag [#allocation3], %s121_s27  ;;  %s664_s30 = int_to_ptr.vmem [resolvable:$true] %s132_s30 }
  0x31   : > { %s669_s5 = scalar_lea.hbm %s763_s0, %s350_s19  ;;  %p779_p11 = scmp.ne.s32.totalorder %s778_s28, 0 }
  0x32   : > { %s442_s6 = scalar_lea.hbm %s669_s5, 192  ;;  %s447_s7 = scalar_lea.hbm %s763_s0, 384 }
  0x33   : > { %p443_p6 = scmp.ne.s32.totalorder %s669_s5, %s442_s6  ;;  %p444_p12 = pneg %p779_p11 }
  0x34   : > { %p448_p7 = scmp.lt.u32.totalorder %s669_s5, %s763_s0  ;;  %p449_p3 = scmp.lt.u32.totalorder %s447_s7, %s442_s6 }
  0x35   : > { %p445_p13 = pnand %p444_p12, %p443_p6  ;;  %p451_p9 = scmp.lt.u32.totalorder %s442_s6, %s669_s5 }
  0x36   : > { %p450_p8 = por %p449_p3, %p448_p7 }
  0x37   : > { %p446_p1 = pneg %p445_p13 }
  0x38   : > { %p452_p10 = por %p451_p9, %p450_p8 }
  0x3a   : > { %p453_p2 = pnand %p452_p10, %p446_p1 }
  0x3c   : > { %456 = shalt.err (!%p453_p2)
}
  0x3d   : > { %s457_s27 = scalar_lea.vmem %s664_s30, 192  ;;  %s545_s16 = smov [#allocation2]  }
  0x3e   : > { %p458_p4 = scmp.ne.s32.totalorder %s664_s30, %s457_s27  ;;  %s462_s17 = sshll.u32 %s545_s16, 4  ;;  %s463_s17 = int_to_ptr.vmem [resolvable:$false] %s462_s17 }
  0x3f   : > { %s464_s19 = scalar_lea.vmem %s463_s17, 384  ;;  %p465_p6 = scmp.lt.s32.totalorder %s664_s30, %s463_s17 }
  0x40   : > { %p460_p5 = pnand %p458_p4, %p444_p12  ;;  %p466_p13 = scmp.lt.s32.totalorder %s464_s19, %s457_s27 }
  0x42   : > { %p461_p0 = pneg %p460_p5  ;;  %p467_p7 = por %p466_p13, %p465_p6 }
  0x44   : > { %p468_p3 = pnand %p467_p7, %p461_p0 }
  0x46   : > { %471 = shalt.err (!%p468_p3)
}
  0x47   : > { %s546_s24 = smov 64   ;;  %s547_s3 = smov 4  }
  0x48   : > { %367 = dma.hbm_to_vmem [thread:$0]  (!%p779_p11), %s669_s5, 192, %s664_s30, %s671_s26, %s546_s24, %s546_s24, %s547_s3  }
  0x49   : > { %p780_p12 = scmp.ne.s32.totalorder %s775_s23, 0 }
  0x4a   : > { %s702_s4 = sand.u32 (!%p780_p12), 1, %s534_s10   ;;  %p781_p1 = scmp.ne.s32.totalorder (!%p780_p12), %s772_s20, 0 }
  0x4b   : > { %144 = sbr.rel (%p780_p12) target bundleno = 322 (0x142), region = 28  ;;  %s147_s25 = scalar_lea.sflag (!%p780_p12), [#allocation3], %s702_s4 }
  0x4c   : > { %s351_s6 = smul.u32 (!%p780_p12), 12, %s702_s4 }
  0x4e   : > { %s150_s29 = scalar_lea.vmem (!%p780_p12), [#allocation2], %s351_s6 }
  0x52   : > { %517 = dma.done.wait (%p781_p1), %s147_s25, 192  }
  0x53   : > { %519 = vsyncadd (%p781_p1), %s147_s25, 4294967104  ;;  %p782_p8 = scmp.eq.s32.totalorder %s587_s13, 0 }
  0x55   : > { %521 = dma.done.wait (%p782_p8), [#allocation6], 32   ;;  %p783_p11 = pmov %p782_p8 }
  0x56   : > { %v548_v0 = vmov 0.0   ;;  %vm549_vm0 = vmmov 0   ;;  %vm184_vm1 = vcmask 261120   ;;  %v413_v1 = vld [vmem:[%s150_s29 + $0x4] sm:$0xff]   ;;  %v178_v3 = vld [vmem:[#allocation5] sm:$0x3] }
  0x57   : > { %523 = vsyncadd (%p783_p11), [#allocation6], 4294967264  ;;  %343 = vmatprep.subr.bf16.mxu0 %v548_v0  ;;  %345 = vmatprep.mubr.msk.bf16.mxu0 %vm549_vm0, %v548_v0  ;;  %v189_v2 = vsel %vm184_vm1, %v413_v1, 0  ;;  %s334_s20 = sshll.u32 %s702_s4, 2  ;;  %s338_s23 = sshll.u32 %s587_s13, 6  ;;  %vm231_vm2 = vcmask 125952  }
  0x58   : > { %344 = vmatpush3.bf16.xpose.msra.mxu0 %v189_v2  ;;  %s174_s28 = scalar_lea.vmem [#allocation7], %s334_s20  ;;  %s719_s7 = scalar_lea.hbm %s765_s2, %s338_s23 }
  0x59   : > { %s247_s30 = sshll.u32 %s174_s28, 4  ;;  %s234_s8 = scalar_lea.sflag [#allocation4], %s702_s4  ;;  %s721_s30 = int_to_ptr.vmem [resolvable:$true] %s247_s30 }
  0x5a   : > { %s472_s14 = scalar_lea.vmem %s721_s30, 64  ;;  %p784_p10 = scmp.ne.s32.totalorder %s773_s21, 0 }
  0x5b   : > { %p473_p9 = scmp.ne.s32.totalorder %s721_s30, %s472_s14  ;;  %s550_s13 = smov [#allocation7]  }
  0x5c   : > { %s476_s27 = sshll.u32 %s550_s13, 4  ;;  %s477_s27 = int_to_ptr.vmem [resolvable:$false] %s476_s27 }
  0x5d   : > { %p474_p2 = pnand %p473_p9, %p784_p10  ;;  %s478_s16 = scalar_lea.vmem %s477_s27, 128 }
  0x5e   : > { %p479_p5 = scmp.lt.s32.totalorder %s721_s30, %s477_s27  ;;  %p480_p0 = scmp.lt.s32.totalorder %s478_s16, %s472_s14 }
  0x5f   : > { %346 = vmatmul.mubr.msk.bf16.vlgmr.msra.gmra.mrb[0].mxu0 %vm184_vm1, %v178_v3  ;;  %p475_p4 = pneg %p474_p2 }
  0x60   : > { %p481_p6 = por %p480_p0, %p479_p5 }
  0x62   : > { %p482_p13 = pnand %p481_p6, %p475_p4 }
 0x132   : > { %v225_v4 = vpop.f32.mrb[0].mxu0 }
 0x133   : > { %232 = vst.msk [vmem:[%s174_s28] sm:$0xf] %vm231_vm2, %v225_v4  ;;  %v347_v5 = vpop.f32.mrb[1].mxu0 }
 0x134   : > { %v228_v6 = vpop.f32.mrb[2].mxu0 }
 0x135   : > { %485 = shalt.err (!%p482_p13)
}
 0x136   : > { %s486_s17 = scalar_lea.hbm %s719_s7, 64  ;;  %s490_s3 = scalar_lea.hbm %s765_s2, 128 }
 0x137   : > { %p487_p7 = scmp.ne.s32.totalorder %s719_s7, %s486_s17  ;;  %p491_p1 = scmp.lt.u32.totalorder %s719_s7, %s765_s2 }
 0x138   : > { %p492_p8 = scmp.lt.u32.totalorder %s490_s3, %s486_s17  ;;  %p494_p9 = scmp.lt.u32.totalorder %s486_s17, %s719_s7 }
 0x139   : > { %p488_p3 = pnand %p487_p7, %p784_p10 }
 0x13a   : > { %p493_p11 = por %p492_p8, %p491_p1 }
 0x13b   : > { %p489_p12 = pneg %p488_p3 }
 0x13c   : > { %p495_p2 = por %p494_p9, %p493_p11 }
 0x13e   : > { %p496_p4 = pnand %p495_p2, %p489_p12 }
 0x140   : > { %499 = shalt.err (!%p496_p4)
}
 0x141   : > { %358 = dma.vmem_to_hbm [thread:$0]  (%p784_p10), %s721_s30, 64, %s719_s7, %s234_s8   ;;  %v348_v7 = vpop.f32.mrb[3].mxu0 }
 0x142 PF: > { %s259_s25 = sand.u32 1, %s530_s9   ;;  %p785_p5 = scmp.ne.s32.totalorder %s774_s22, 0 }
 0x143   : > { %p786_p0 = scmp.ge.s32.totalorder %s542_s12, 2  ;;  %s260_s29 = scalar_lea.sflag [#allocation4], %s259_s25 }
 0x145   : > { %p369_p6 = pnand %p786_p0, %p785_p5 }
 0x147   : > { %525 = dma.done.wait (!%p369_p6), %s260_s29, 64  }
 0x148   : > { %527 = vsyncadd (!%p369_p6), %s260_s29, 4294967232  ;;  %p16_p13 = scmp.ge.s32.totalorder %s591_s15, 4   ;;  %s787_s9 = smov %s534_s10 }
 0x149   : > { %s788_s10 = smov %s538_s11  ;;  %s789_s11 = smov %s603_s18 }
 0x14a   : > { %s790_s12 = smov %s591_s15  ;;  %18 = sbr.rel (!%p16_p13) target bundleno = 6 (0x6), region = 77 }
 0x151   :  { %265 = vsyncpa [#allocation3], 1 }
 0x152   :  { %267 = vsyncpa [#allocation3 + $0x1], 1 }
 0x153   :  { %268 = vsyncpa [#allocation6], 1 }
 0x154   :  { %269 = vsyncpa [#allocation4], 1 }
 0x155   :  { %271 = vsyncpa [#allocation4 + $0x1], 1 }

// kernel: dit_uncond_forward.9
= control target key start
LH: loop header
LB: loop body
LE: loop exit
PB: predicated region body
PF: predicated region fallthrough
CT: control target
= control target key end

     0   :  { %s4316_s0 = inlined_call_operand.hbm [shape: bf16[2,24,32], index: 0, kind: input, shape index: {}, may-alias: {0,1}]   ;;  %s4317_s1 = inlined_call_operand.hbm [shape: bf16[2,24,32], index: 1, kind: input, shape index: {}, may-alias: {0,1}]   ;;  %s4318_s2 = inlined_call_operand.hbm [shape: f32[1,32], index: 2, kind: input, shape index: {}]   ;;  %s4319_s3 = inlined_call_operand.hbm [shape: f32[1,32], index: 3, kind: input, shape index: {}]   ;;  %s4320_s4 = inlined_call_operand.hbm [shape: bf16[4,32,128], index: 4, kind: input, shape index: {}]   ;;  %s4321_s5 = inlined_call_operand.hbm [shape: bf16[4,32,128], index: 5, kind: input, shape index: {}]   ;;  %s4322_s6 = inlined_call_operand.hbm [shape: bf16[4,32,128], index: 6, kind: input, shape index: {}]   ;;  %s4323_s7 = inlined_call_operand.hbm [shape: bf16[4,128,32], index: 7, kind: input, shape index: {}]   ;;  %s4324_s8 = inlined_call_operand.hbm [shape: bf16[2,24,32], index: 8, kind: output, shape index: {}]  }
   0x1   :  { %4339 = sst [smem:[#allocation37_spill]] %s4316_s0 }
   0x2   :  { %4340 = sst [smem:[#allocation38_spill]] %s4317_s1 }
   0x3   :  { %4341 = sst [smem:[#allocation39_spill]] %s4318_s2 }
   0x4   :  { %4342 = sst [smem:[#allocation40_spill]] %s4319_s3 }
   0x5   :  { %4343 = sst [smem:[#allocation41_spill]] %s4320_s4 }
   0x6   :  { %4344 = sst [smem:[#allocation42_spill]] %s4321_s5 }
   0x7   :  { %4345 = sst [smem:[#allocation43_spill]] %s4322_s6 }
   0x8   :  { %4346 = sst [smem:[#allocation44_spill]] %s4323_s7 }
   0x9   :  { %4347 = sst [smem:[#allocation45_spill]] %s4324_s8 }
   0xa   :  { %13 = vsyncpa [#allocation7], 0 }
   0xb   :  { %15 = vsyncpa [#allocation7 + $0x1], 0 }
   0xc   :  { %16 = vsyncpa [#allocation10], 0 }
   0xd   :  { %18 = vsyncpa [#allocation10 + $0x1], 0 }
   0xe   :  { %19 = vsyncpa [#allocation13], 0 }
   0xf   :  { %20 = vsyncpa [#allocation16], 0 }
  0x10   :  { %21 = vsyncpa [#allocation19], 0 }
  0x11   :  { %22 = vsyncpa [#allocation8], 0 }
  0x12   :  { %24 = vsyncpa [#allocation8 + $0x1], 0  ;;  %s3586_s27 = smov 0   ;;  %s3588_s28 = smov 0  }
  0x13   :  { %s3590_s29 = smov 0   ;;  %s3592_s30 = smov 0  }
  0x14   :  { %s3594_s9 = smov 0   ;;  %s3596_s10 = smov 0  }
  0x15   :  { %s3598_s11 = smov 0   ;;  %s3600_s12 = smov 0  }
  0x16   :  { %s3602_s13 = smov 0   ;;  %s3604_s14 = smov 0  }
  0x17   :  { %s3606_s15 = smov 0   ;;  %s3608_s16 = smov 0  }
  0x18   :  { %s3610_s17 = smov 0  }
  0x19 LB: > { %4348 = sst [smem:[#allocation28_spill]] %s3472_s27  ;;  %s3652_s18 = sadd.s32 4294967295, %s3520_s17   ;;  %s3520_s17 = sphi %s3610_s17, %s30_s17   ;;  %s3516_s16 = sphi %s3608_s16, %s4423_s16   ;;  %s3512_s15 = sphi %s3606_s15, %s4422_s15   ;;  %s3508_s14 = sphi %s3604_s14, %s4421_s14   ;;  %s3504_s13 = sphi %s3602_s13, %s4420_s13   ;;  %s3500_s12 = sphi %s3600_s12, %s4419_s12   ;;  %s3496_s11 = sphi %s3598_s11, %s4418_s11   ;;  %s3492_s10 = sphi %s3596_s10, %s4417_s10   ;;  %s3488_s9 = sphi %s3594_s9, %s4416_s9   ;;  %s3484_s30 = sphi %s3592_s30, %s4415_s30   ;;  %s3480_s29 = sphi %s3590_s29, %s4414_s29   ;;  %s3476_s28 = sphi %s3588_s28, %s4413_s28   ;;  %s3472_s27 = sphi %s3586_s27, %s4407_s27  }
  0x1a   : > { %4349 = sst [smem:[#allocation29_spill]] %s3476_s28  ;;  %p2432_p0 = scmp.ge.s32.totalorder %s3520_s17, 1 }
  0x1b   : > { %4350 = sst [smem:[#allocation30_spill]] %s3480_s29  ;;  %p4328_p1 = scmp.eq.s32.totalorder %s3652_s18, 0 }
  0x1c   : > { %4351 = sst [smem:[#allocation31_spill]] %s3496_s11  ;;  %p264_p2 = scmp.lt.s32.totalorder %s3520_s17, 19 }
  0x1d   : > { %4352 = sst [smem:[#allocation32_spill]] %s3500_s12  ;;  %s3522_s20 = smov [#allocation11]  }
  0x1e   : > { %4353 = sst [smem:[#allocation33_spill]] %s3504_s13  ;;  %p3657_p3 = pnand %p2432_p0, %p264_p2 }
  0x1f   : > { %s277_s21 = sshll.u32 %s3522_s20, 4  ;;  %s3523_s22 = smov [#allocation12]   ;;  %s278_s21 = int_to_ptr.vmem [resolvable:$true] %s277_s21 }
  0x20   : > { %s4354_s19 = scalar_select %p3657_p3, 1, 0 }
  0x21   : > { %p2882_p4 = pneg %p3657_p3  ;;  %s288_s23 = sshll.u32 %s3523_s22, 4  ;;  %s3669_s23 = int_to_ptr.vmem [resolvable:$true] %s288_s23 }
  0x22   : > { %4355 = sst [smem:[#allocation34_spill]] %s4354_s19  ;;  %s3524_s25 = smov [#allocation15]  }
  0x23   : > { %p3665_p5 = pnand %p2882_p4, %p4328_p1  ;;  %s3671_s26 = sshll.u32 %s3524_s25, 4  ;;  %s312_s26 = int_to_ptr.vmem [resolvable:$true] %s3671_s26 }
  0x24   : > { %s4357_s2 = sld [smem:[#allocation39_spill]] }
  0x25   : > { %p3681_p7 = pneg %p3665_p5 }
  0x2a   : > { %s3134_s20 = scalar_lea.hbm %s4357_s2, 16 }
  0x2b   : > { %p3135_p6 = scmp.ne.s32.totalorder %s4357_s2, %s3134_s20  ;;  %p3141_p10 = scmp.lt.u32.totalorder %s3134_s20, %s4357_s2 }
  0x2d   : > { %p3137_p8 = pnand %p3681_p7, %p3135_p6 }
  0x2f   : > { %p3138_p9 = pneg %p3137_p8 }
  0x31   : > { %p3143_p11 = pnand %p3141_p10, %p3138_p9 }
  0x33   : > { %3146 = shalt.err (!%p3143_p11)
}
  0x34   : > { %s3147_s8 = scalar_lea.vmem %s278_s21, 16  ;;  %s3154_s11 = scalar_lea.vmem %s278_s21, 32 }
  0x35   : > { %p3148_p12 = scmp.ne.s32.totalorder %s278_s21, %s3147_s8  ;;  %p3155_p2 = scmp.lt.s32.totalorder %s278_s21, %s278_s21 }
  0x36   : > { %p3156_p4 = scmp.lt.s32.totalorder %s3154_s11, %s3147_s8 }
  0x37   : > { %p3150_p13 = pnand %p3148_p12, %p3681_p7 }
  0x38   : > { %p3157_p1 = por %p3156_p4, %p3155_p2 }
  0x39   : > { %p3151_p0 = pneg %p3150_p13 }
  0x3b   : > { %p3158_p3 = pnand %p3157_p1, %p3151_p0 }
  0x3d   : > { %3161 = shalt.err (!%p3158_p3)
}
  0x3e   : > { %2885 = dma.hbm_to_vmem [thread:$0]  (!%p3665_p5), %s4357_s2, 16, %s278_s21, [#allocation10]  }
  0x3f   : > { %s4359_s3 = sld [smem:[#allocation40_spill]] }
  0x45   : > { %s3162_s25 = scalar_lea.hbm %s4359_s3, 16 }
  0x46   : > { %p3163_p6 = scmp.ne.s32.totalorder %s4359_s3, %s3162_s25  ;;  %p3169_p1 = scmp.lt.u32.totalorder %s3162_s25, %s4359_s3 }
  0x48   : > { %p3165_p8 = pnand %p3163_p6, %p3681_p7 }
  0x4a   : > { %p3166_p9 = pneg %p3165_p8 }
  0x4c   : > { %p3171_p3 = pnand %p3169_p1, %p3166_p9 }
  0x4e   : > { %3174 = shalt.err (!%p3171_p3)
}
  0x4f   : > { %s3175_s21 = scalar_lea.vmem %s3669_s23, 16  ;;  %s3182_s1 = scalar_lea.vmem %s3669_s23, 32 }
  0x50   : > { %p3176_p10 = scmp.ne.s32.totalorder %s3669_s23, %s3175_s21  ;;  %p3183_p13 = scmp.lt.s32.totalorder %s3669_s23, %s3669_s23 }
  0x51   : > { %p3184_p0 = scmp.lt.s32.totalorder %s3182_s1, %s3175_s21 }
  0x52   : > { %p3178_p11 = pnand %p3176_p10, %p3681_p7 }
  0x53   : > { %p3185_p2 = por %p3184_p0, %p3183_p13 }
  0x54   : > { %p3179_p12 = pneg %p3178_p11 }
  0x56   : > { %p3186_p4 = pnand %p3185_p2, %p3179_p12 }
  0x58   : > { %3189 = shalt.err (!%p3186_p4)
}
  0x59   : > { %2888 = dma.hbm_to_vmem [thread:$0]  (!%p3665_p5), %s4359_s3, 16, %s3669_s23, [#allocation13]  }
  0x5a   : > { %s4360_s5 = sld [smem:[#allocation42_spill]] }
  0x60   : > { %s3190_s20 = scalar_lea.hbm %s4360_s5, 1024 }
  0x61   : > { %p3191_p6 = scmp.ne.s32.totalorder %s4360_s5, %s3190_s20  ;;  %p3197_p1 = scmp.lt.u32.totalorder %s3190_s20, %s4360_s5 }
  0x63   : > { %p3193_p8 = pnand %p3191_p6, %p3681_p7 }
  0x65   : > { %p3194_p9 = pneg %p3193_p8 }
  0x67   : > { %p3199_p3 = pnand %p3197_p1, %p3194_p9 }
  0x69   : > { %3202 = shalt.err (!%p3199_p3)
}
  0x6a   : > { %s3203_s1 = scalar_lea.vmem %s312_s26, 1024  ;;  %p3211_p13 = scmp.lt.s32.totalorder %s312_s26, %s312_s26 }
  0x6b   : > { %p3204_p10 = scmp.ne.s32.totalorder %s312_s26, %s3203_s1  ;;  %p3212_p0 = scmp.lt.s32.totalorder %s3203_s1, %s3203_s1 }
  0x6d   : > { %p3206_p11 = pnand %p3204_p10, %p3681_p7  ;;  %p3213_p2 = por %p3212_p0, %p3211_p13 }
  0x6f   : > { %p3207_p12 = pneg %p3206_p11 }
  0x71   : > { %p3214_p4 = pnand %p3213_p2, %p3207_p12 }
  0x73   : > { %3217 = shalt.err (!%p3214_p4)
}
  0x74   : > { %s3525_s23 = smov 64   ;;  %s3526_s27 = smov 4  }
  0x75   : > { %2894 = dma.hbm_to_vmem [thread:$0]  (!%p3665_p5), %s4360_s5, 1024, %s312_s26, [#allocation16], %s3525_s23, %s3525_s23, %s3526_s27  }
  0x76   : > { %s3527_s19 = smov [#allocation14]   ;;  %s3528_s25 = smov [#allocation17]  }
  0x77   : > { %s298_s20 = sshll.u32 %s3527_s19, 4  ;;  %s324_s8 = sshll.u32 %s3528_s25, 4  ;;  %s299_s20 = int_to_ptr.vmem [resolvable:$true] %s298_s20  ;;  %s325_s8 = int_to_ptr.vmem [resolvable:$true] %s324_s8 }
  0x78   : > { %s4361_s4 = sld [smem:[#allocation41_spill]] }
  0x7e   : > { %s3218_s1 = scalar_lea.hbm %s4361_s4, 1024 }
  0x7f   : > { %p3219_p6 = scmp.ne.s32.totalorder %s4361_s4, %s3218_s1  ;;  %p3225_p1 = scmp.lt.u32.totalorder %s3218_s1, %s4361_s4 }
  0x81   : > { %p3221_p8 = pnand %p3219_p6, %p3681_p7 }
  0x83   : > { %p3222_p9 = pneg %p3221_p8 }
  0x85   : > { %p3227_p3 = pnand %p3225_p1, %p3222_p9 }
  0x87   : > { %3230 = shalt.err (!%p3227_p3)
}
  0x88   : > { %s3231_s26 = scalar_lea.vmem %s299_s20, 1024  ;;  %p3239_p13 = scmp.lt.s32.totalorder %s299_s20, %s299_s20 }
  0x89   : > { %p3232_p10 = scmp.ne.s32.totalorder %s299_s20, %s3231_s26  ;;  %p3240_p0 = scmp.lt.s32.totalorder %s3231_s26, %s3231_s26 }
  0x8b   : > { %p3234_p11 = pnand %p3232_p10, %p3681_p7  ;;  %p3241_p2 = por %p3240_p0, %p3239_p13 }
  0x8d   : > { %p3235_p12 = pneg %p3234_p11 }
  0x8f   : > { %p3242_p4 = pnand %p3241_p2, %p3235_p12 }
  0x91   : > { %3245 = shalt.err (!%p3242_p4)
}
  0x92   : > { %2891 = dma.hbm_to_vmem [thread:$0]  (!%p3665_p5), %s4361_s4, 1024, %s299_s20, [#allocation13], %s3525_s23, %s3525_s23, %s3526_s27  }
  0x93   : > { %s4362_s6 = sld [smem:[#allocation43_spill]] }
  0x99   : > { %s3246_s12 = scalar_lea.hbm %s4362_s6, 1024 }
  0x9a   : > { %p3247_p6 = scmp.ne.s32.totalorder %s4362_s6, %s3246_s12  ;;  %p3253_p1 = scmp.lt.u32.totalorder %s3246_s12, %s4362_s6 }
  0x9c   : > { %p3249_p8 = pnand %p3247_p6, %p3681_p7 }
  0x9e   : > { %p3250_p9 = pneg %p3249_p8 }
  0xa0   : > { %p3255_p3 = pnand %p3253_p1, %p3250_p9 }
  0xa2   : > { %3258 = shalt.err (!%p3255_p3)
}
  0xa3   : > { %s3259_s21 = scalar_lea.vmem %s325_s8, 1024  ;;  %p3267_p13 = scmp.lt.s32.totalorder %s325_s8, %s325_s8 }
  0xa4   : > { %p3260_p10 = scmp.ne.s32.totalorder %s325_s8, %s3259_s21  ;;  %p3268_p0 = scmp.lt.s32.totalorder %s3259_s21, %s3259_s21 }
  0xa6   : > { %p3262_p11 = pnand %p3260_p10, %p3681_p7  ;;  %p3269_p2 = por %p3268_p0, %p3267_p13 }
  0xa8   : > { %p3263_p12 = pneg %p3262_p11 }
  0xaa   : > { %p3270_p4 = pnand %p3269_p2, %p3263_p12 }
  0xac   : > { %3273 = shalt.err (!%p3270_p4)
}
  0xad   : > { %2897 = dma.hbm_to_vmem [thread:$0]  (!%p3665_p5), %s4362_s6, 1024, %s325_s8, [#allocation16], %s3525_s23, %s3525_s23, %s3526_s27  }
  0xae   : > { %s3529_s26 = smov [#allocation18]   ;;  %s4363_s7 = sld [smem:[#allocation44_spill]] }
  0xaf   : > { %s337_s2 = sshll.u32 %s3529_s26, 4  ;;  %s338_s2 = int_to_ptr.vmem [resolvable:$true] %s337_s2 }
  0xb4   : > { %s3274_s29 = scalar_lea.hbm %s4363_s7, 4096 }
  0xb5   : > { %p3275_p6 = scmp.ne.s32.totalorder %s4363_s7, %s3274_s29  ;;  %p3281_p1 = scmp.lt.u32.totalorder %s3274_s29, %s4363_s7 }
  0xb7   : > { %p3277_p8 = pnand %p3275_p6, %p3681_p7 }
  0xb9   : > { %p3278_p9 = pneg %p3277_p8 }
  0xbb   : > { %p3283_p3 = pnand %p3281_p1, %p3278_p9 }
  0xbd   : > { %3286 = shalt.err (!%p3283_p3)
}
  0xbe   : > { %s3287_s8 = scalar_lea.vmem %s338_s2, 4096  ;;  %p3295_p13 = scmp.lt.s32.totalorder %s338_s2, %s338_s2 }
  0xbf   : > { %p3288_p10 = scmp.ne.s32.totalorder %s338_s2, %s3287_s8  ;;  %p3296_p0 = scmp.lt.s32.totalorder %s3287_s8, %s3287_s8 }
  0xc1   : > { %p3290_p11 = pnand %p3288_p10, %p3681_p7  ;;  %p3297_p2 = por %p3296_p0, %p3295_p13 }
  0xc3   : > { %p3291_p12 = pneg %p3290_p11 }
  0xc5   : > { %p3298_p4 = pnand %p3297_p2, %p3291_p12 }
  0xc7   : > { %3301 = shalt.err (!%p3298_p4)
}
  0xc8   : > { %2900 = dma.hbm_to_vmem [thread:$0]  (!%p3665_p5), %s4363_s7, 4096, %s338_s2, [#allocation19], %s3525_s23, %s3525_s23, %s3526_s27  }
  0xc9   : > { %s2431_s24 = sadd.s32 4294967294, %s3520_s17   ;;  %s45_s22 = sadd.s32 1, %s3512_s15 }
  0xca   : > { %s49_s20 = sadd.s32 1, %s3516_s16  ;;  %p65_p7 = scmp.ne.s32.totalorder %s3492_s10, %s3488_s9 }
  0xcb   : > { %p4334_p6 = scmp.eq.s32.totalorder %s3520_s17, 0  ;;  %p71_p8 = scmp.ne.s32.totalorder %s3488_s9, %s3484_s30 }
  0xcc   : > { %p251_p9 = scmp.eq.s32.totalorder %s3652_s18, 17  ;;  %p257_p3 = scmp.eq.s32.totalorder %s2431_s24, 17 }
  0xcd   : > { %p3817_p1 = por %p4334_p6, %p65_p7  ;;  %p4365_p10 = scmp.eq.s32.totalorder %s3652_s18, 0 }
  0xce   : > { %p3827_p5 = por %p251_p9, %p65_p7  ;;  %p3831_p12 = por %p257_p3, %p71_p8 }
  0xcf   : > { %p3823_p11 = por %p4365_p10, %p71_p8  ;;  %p4333_p13 = scmp.lt.s32.totalorder %s3520_s17, 18 }
  0xd0   : > { %s4367_s27 = scalar_select %p3827_p5, 1, 0 }
  0xd1   : > { %s4368_s26 = scalar_select %p3831_p12, 1, 0 }
  0xd2   : > { %s351_s2 = sand.u32 1, %s3492_s10   ;;  %s2849_s3 = smul.u32 3, %s3516_s16 }
  0xd3   : > { %s2440_s28 = sshll.u32 %s351_s2, 2  ;;  %s4369_s0 = sld [smem:[#allocation37_spill]] }
  0xd4   : > { %s360_s29 = sadd.s32 %s3512_s15, %s2849_s3  ;;  %s355_s13 = scalar_lea.vmem [#allocation6], %s2440_s28 }
  0xd5   : > { %s2441_s12 = sshll.u32 %s360_s29, 6  ;;  %s364_s19 = sshll.u32 %s355_s13, 4  ;;  %s3846_s19 = int_to_ptr.vmem [resolvable:$true] %s364_s19 }
  0xd6   : > { %p3852_p0 = pnand %p4333_p13, %p3817_p1  ;;  %s352_s24 = scalar_lea.sflag [#allocation7], %s351_s2 }
  0xd8   : > { %p3304_p4 = pneg %p3852_p0 }
  0xd9   : > { %s3844_s11 = scalar_lea.hbm %s4369_s0, %s2441_s12  ;;  %s3307_s1 = scalar_lea.hbm %s4369_s0, 384 }
  0xda   : > { %s3302_s28 = scalar_lea.hbm %s3844_s11, 64  ;;  %p3308_p9 = scmp.lt.u32.totalorder %s3844_s11, %s4369_s0 }
  0xdb   : > { %p3303_p2 = scmp.ne.s32.totalorder %s3844_s11, %s3302_s28  ;;  %p3309_p1 = scmp.lt.u32.totalorder %s3307_s1, %s3302_s28 }
  0xdc   : > { %p3311_p10 = scmp.lt.u32.totalorder %s3302_s28, %s3844_s11 }
  0xdd   : > { %p3305_p7 = pnand %p3304_p4, %p3303_p2  ;;  %p3310_p3 = por %p3309_p1, %p3308_p9 }
  0xdf   : > { %p3306_p8 = pneg %p3305_p7  ;;  %p3312_p13 = por %p3311_p10, %p3310_p3 }
  0xe1   : > { %p3313_p6 = pnand %p3312_p13, %p3306_p8 }
  0xe3   : > { %3316 = shalt.err (!%p3313_p6)
}
  0xe4   : > { %s3317_s2 = scalar_lea.vmem %s3846_s19, 64  ;;  %s3530_s8 = smov [#allocation6]  }
  0xe5   : > { %p3318_p2 = scmp.ne.s32.totalorder %s3846_s19, %s3317_s2  ;;  %s3322_s29 = sshll.u32 %s3530_s8, 4  ;;  %s3323_s29 = int_to_ptr.vmem [resolvable:$false] %s3322_s29 }
  0xe6   : > { %s3324_s12 = scalar_lea.vmem %s3323_s29, 128  ;;  %p3325_p5 = scmp.lt.s32.totalorder %s3846_s19, %s3323_s29 }
  0xe7   : > { %p3320_p7 = pnand %p3318_p2, %p3304_p4  ;;  %p3326_p9 = scmp.lt.s32.totalorder %s3324_s12, %s3317_s2 }
  0xe9   : > { %p3321_p12 = pneg %p3320_p7  ;;  %p3327_p1 = por %p3326_p9, %p3325_p5 }
  0xeb   : > { %p3328_p3 = pnand %p3327_p1, %p3321_p12 }
  0xed   : > { %3331 = shalt.err (!%p3328_p3)
}
  0xee   : > { %s4371_s28 = sld [smem:[#allocation30_spill]]  ;;  %s4372_s1 = sld [smem:[#allocation29_spill]] }
  0xef   : > { %s4373_s13 = sld [smem:[#allocation28_spill]]  ;;  %s42_s25 = sadd.s32 1, %s3508_s14 }
  0xf0   : > { %2904 = dma.hbm_to_vmem [thread:$0]  (!%p3852_p0), %s3844_s11, 64, %s3846_s19, %s352_s24  }
  0xf1   : > { %p43_p6 = scmp.ge.s32.totalorder %s42_s25, 3  ;;  %s371_s29 = sand.u32 1, %s3520_s17  }
  0xf2   : > { %p4375_p0 = scmp.eq.s32.totalorder %s3652_s18, 0  ;;  %p4377_p8 = scmp.eq.s32.totalorder %s3520_s17, 0 }
  0xf3   : > { %s4425_s25 = smov (%p43_p6, %s42_s25), 0  ;;  %s4427_s22 = smov (!%p43_p6, %s45_s22), %s3512_s15 }
  0xf4   : > { %p93_p5 = scmp.ne.s32.totalorder %s4371_s28, %s4372_s1  ;;  %4374 = sst [smem:[#allocation35_spill]] %s4425_s25 }
  0xf5   : > { %p99_p12 = scmp.ne.s32.totalorder %s4372_s1, %s4373_s13  ;;  %s82_s8 = ssub.s32 %s3508_s14, %s4425_s25 }
  0xf6   : > { %p47_p13 = scmp.ge.s32.totalorder %s4427_s22, 3  ;;  %p3904_p10 = por %p93_p5, %p4377_p8 }
  0xf7   : > { %p3898_p4 = por %p99_p12, %p4375_p0  ;;  %s373_s24 = sand.u32 1, %s4371_s28  }
  0xf8   : > { %s4429_s22 = smov (%p47_p13, %s4427_s22), 0  ;;  %s4431_s20 = smov (!%p47_p13, %s49_s20), %s3516_s16 }
  0xf9   : > { %s4376_s19 = scalar_select %p3898_p4, 1, 0 }
  0xfa   : > { %4379 = sst [smem:[#allocation36_spill]] %s4429_s22  ;;  %s54_s12 = ssub.s32 %s3512_s15, %s4429_s22 }
  0xfb   : > { %s2442_s1 = sshll.u32 %s373_s24, 2  ;;  %p51_p2 = scmp.ge.s32.totalorder %s4431_s20, 2 }
  0xfc   : > { %s380_s13 = sadd.s32 %s3508_s14, %s2849_s3  ;;  %s375_s2 = scalar_lea.vmem [#allocation9], %s2442_s1 }
  0xfd   : > { %s384_s21 = sshll.u32 %s375_s2, 4  ;;  %s4433_s20 = smov (%p51_p2, %s4431_s20), 0  ;;  %s3923_s21 = int_to_ptr.vmem [resolvable:$true] %s384_s21 }
  0xfe   : > { %s2443_s0 = sshll.u32 %s380_s13, 6  ;;  %s53_s4 = ssub.s32 %s3516_s16, %s4433_s20 }
  0xff   : > { %s55_s5 = sor.u32 %s54_s12, %s53_s4  ;;  %s83_s6 = sor.u32 %s82_s8, %s53_s4 }
 0x100   : > { %p56_p7 = scmp.eq.s32.totalorder %s55_s5, 0  ;;  %p84_p9 = scmp.eq.s32.totalorder %s83_s6, 0 }
 0x101   : > { %s4380_s22 = sld [smem:[#allocation38_spill]]  ;;  %p4381_p1 = scmp.lt.s32.totalorder %s3520_s17, 18 }
 0x102   : > { %s4383_s2 = sadd.s32 1, %s3492_s10  ;;  %s4384_s5 = sadd.s32 1, %s4371_s28 }
 0x103   : > { %p3934_p3 = pnand %p4381_p1, %p3904_p10  ;;  %s4435_s28 = smov (!%p84_p9, %s4371_s28), %s4384_s5 }
 0x104   : > { %s3941_s4 = scalar_select %p56_p7, %s3492_s10, %s4383_s2  }
 0x105   : > { %p3334_p5 = pneg %p3934_p3 }
 0x107   : > { %s3928_s25 = scalar_lea.hbm %s4380_s22, %s2443_s0  ;;  %s372_s0 = scalar_lea.sflag [#allocation10], %s371_s29 }
 0x108   : > { %s3332_s6 = scalar_lea.hbm %s3928_s25, 64  ;;  %s3337_s11 = scalar_lea.hbm %s4380_s22, 384 }
 0x109   : > { %p3333_p6 = scmp.ne.s32.totalorder %s3928_s25, %s3332_s6  ;;  %p3338_p0 = scmp.lt.u32.totalorder %s3928_s25, %s4380_s22 }
 0x10a   : > { %p3339_p8 = scmp.lt.u32.totalorder %s3337_s11, %s3332_s6  ;;  %p3341_p2 = scmp.lt.u32.totalorder %s3332_s6, %s3928_s25 }
 0x10b   : > { %p3335_p12 = pnand %p3334_p5, %p3333_p6 }
 0x10c   : > { %p3340_p10 = por %p3339_p8, %p3338_p0 }
 0x10d   : > { %p3336_p13 = pneg %p3335_p12 }
 0x10e   : > { %p3342_p7 = por %p3341_p2, %p3340_p10 }
 0x110   : > { %p3343_p9 = pnand %p3342_p7, %p3336_p13 }
 0x112   : > { %3346 = shalt.err (!%p3343_p9)
}
 0x113   : > { %s3347_s29 = scalar_lea.vmem %s3923_s21, 64  ;;  %s3531_s13 = smov [#allocation9]  }
 0x114   : > { %p3348_p1 = scmp.ne.s32.totalorder %s3923_s21, %s3347_s29  ;;  %s3352_s24 = sshll.u32 %s3531_s13, 4  ;;  %s3353_s24 = int_to_ptr.vmem [resolvable:$false] %s3352_s24 }
 0x115   : > { %s3354_s2 = scalar_lea.vmem %s3353_s24, 128  ;;  %p3355_p4 = scmp.lt.s32.totalorder %s3923_s21, %s3353_s24 }
 0x116   : > { %p3350_p6 = pnand %p3348_p1, %p3334_p5  ;;  %p3356_p0 = scmp.lt.s32.totalorder %s3354_s2, %s3347_s29 }
 0x118   : > { %p3351_p12 = pneg %p3350_p6  ;;  %p3357_p8 = por %p3356_p0, %p3355_p4 }
 0x11a   : > { %p3358_p10 = pnand %p3357_p8, %p3351_p12 }
 0x11c   : > { %3361 = shalt.err (!%p3358_p10)
}
 0x11d   : > { %2907 = dma.hbm_to_vmem [thread:$0]  (!%p3934_p3), %s3928_s25, 64, %s3923_s21, %s372_s0  }
 0x11e   : > { %s4385_s5 = sld [smem:[#allocation34_spill]] }
 0x124   : > { %p4386_p13 = scmp.ne.s32.totalorder %s4385_s5, 0 }
 0x125   : > { %s3976_s6 = sand.u32 (!%p4386_p13), 1, %s3488_s9  }
 0x126   : > { %393 = sbr.rel (%p4386_p13) target bundleno = 4437 (0x1155), region = 52  ;;  %s2445_s7 = sshll.u32 (!%p4386_p13), %s3976_s6, 2 }
 0x127   : > { %s396_s8 = scalar_lea.sflag (!%p4386_p13), [#allocation7], %s3976_s6  ;;  %s3980_s11 = scalar_lea.vmem (!%p4386_p13), [#allocation6], %s2445_s7 }
 0x12d   : > { %3443 = dma.done.wait (%p3823_p11), %s396_s8, 64  }
 0x12e   : > { %3445 = vsyncadd (%p3823_p11), %s396_s8, 4294967232  ;;  %s4387_s21 = sld [smem:[#allocation29_spill]]  ;;  %s404_s25 = sand.u32 1, %s3652_s18  }
 0x12f   : > { %s405_s12 = scalar_lea.sflag [#allocation10], %s404_s25  ;;  %p4388_p4 = scmp.ne.s32.totalorder %s4376_s19, 0 }
 0x134   : > { %s406_s3 = sand.u32 1, %s4387_s21  }
 0x135   : > { %s3988_s0 = sshll.u32 %s406_s3, 2 }
 0x136   : > { %s408_s1 = scalar_lea.vmem [#allocation9], %s3988_s0 }
 0x137   : > { %3447 = dma.done.wait (%p4388_p4), %s405_s12, 64  }
 0x138   : > { %3449 = vsyncadd (%p4388_p4), %s405_s12, 4294967232  ;;  %p4389_p3 = scmp.eq.s32.totalorder %s3652_s18, 0 }
 0x13a   : > { %3451 = dma.done.wait (%p4389_p3), [#allocation10], 16   ;;  %p4390_p11 = pmov %p4389_p3 }
 0x13b   : > { %p4391_p5 = pmov %p4389_p3 }
 0x13c   : > { %3453 = vsyncadd (%p4390_p11), [#allocation10], 4294967280 }
 0x13d   : > { %3455 = dma.done.wait (%p4391_p5), [#allocation13], 1040   ;;  %p4392_p2 = pmov %p4389_p3 }
 0x13f   : > { %3457 = vsyncadd (%p4392_p2), [#allocation13], 4294966256  ;;  %p4393_p7 = pmov %p4392_p2 }
 0x140   : > { %p4394_p9 = pmov %p4392_p2 }
 0x141   : > { %3459 = dma.done.wait (%p4393_p7), [#allocation16], 2048  }
 0x142   : > { %3461 = vsyncadd (%p4394_p9), [#allocation16], 4294965248  ;;  %p4395_p1 = pmov %p4392_p2 }
 0x144   : > { %3463 = dma.done.wait (%p4395_p1), [#allocation19], 4096   ;;  %p4396_p6 = pmov %p4395_p1 }
 0x145   : > { %s4011_s23 = scalar_lea.vmem [#allocation20], %s2445_s7  ;;  %s4397_s19 = sld [smem:[#allocation31_spill]] }
 0x146   : > { %3465 = vsyncadd (%p4396_p6), [#allocation19], 4294963200 }
 0x14b   : > { %p2454_p12 = scmp.ne.s32.totalorder %s4397_s19, 0 }
 0x14c   : > { %v475_v0 = vld [vmem:[%s3980_s11] sm:$0xf] (!%p2454_p12)  ;;  %vm479_vm0 = vcmask (!%p2454_p12), 261120   ;;  %vm511_vm1 = vcmask (!%p2454_p12), 7168   ;;  %v3532_v8 = vmov (!%p2454_p12), -inf   ;;  %v3533_v9 = vmov (!%p2454_p12), 0.0  }
 0x14d   : > { %474 = sbr.rel (%p2454_p12) target bundleno = 651 (0x28b), region = 88  ;;  %v476_v1 = vunpack.c.l.bf16 (!%p2454_p12), %v475_v0  ;;  %512 = vst.msk [vmem:[#allocation3] sm:$0xff] (!%p2454_p12), %vm511_vm1, %v3532_v8  ;;  %513 = vst.msk [vmem:[#allocation3 + $0x8] sm:$0xff] (!%p2454_p12), %vm511_vm1, %v3532_v8  ;;  %v2455_v14 = vld [vmem:[#allocation11] ss:$0 sm:$0xff] (!%p2454_p12)  ;;  %vm509_vm2 = vcmask (!%p2454_p12), 257024  }
 0x14e   : > { %514 = vst.msk [vmem:[#allocation3 + $0x10] sm:$0xff] (!%p2454_p12), %vm511_vm1, %v3532_v8  ;;  %515 = vst.msk [vmem:[#allocation3 + $0x18] sm:$0xff] (!%p2454_p12), %vm511_vm1, %v3532_v8  ;;  %v2456_v16 = vld [vmem:[#allocation12] ss:$0 sm:$0xff] (!%p2454_p12) }
 0x14f   : > { %v480_v2 = vsel (!%p2454_p12), %vm479_vm0, %v476_v1, 0.0  ;;  %516 = vst.msk [vmem:[#allocation4] sm:$0xff] (!%p2454_p12), %vm511_vm1, %v3533_v9  ;;  %517 = vst.msk [vmem:[#allocation4 + $0x8] sm:$0xff] (!%p2454_p12), %vm511_vm1, %v3533_v9 }
 0x150   : > { %481 = vadd.xlane.f32.xlu0 (!%p2454_p12), %v480_v2  ;;  %518 = vst.msk [vmem:[#allocation4 + $0x10] sm:$0xff] (!%p2454_p12), %vm511_vm1, %v3533_v9  ;;  %519 = vst.msk [vmem:[#allocation4 + $0x18] sm:$0xff] (!%p2454_p12), %vm511_vm1, %v3533_v9 }
 0x151   : > { %520 = vst [vmem:[#allocation5] sm:$0xff] (!%p2454_p12), %v3533_v9  ;;  %521 = vst [vmem:[#allocation5 + $0x8] sm:$0xff] (!%p2454_p12), %v3533_v9 }
 0x152   : > { %522 = vst [vmem:[#allocation5 + $0x10] sm:$0xff] (!%p2454_p12), %v3533_v9  ;;  %523 = vst [vmem:[#allocation5 + $0x18] sm:$0xff] (!%p2454_p12), %v3533_v9 }
 0x1dd   : > { %v482_v3 = vpop.xlane.xlu0 %481 }
 0x1de   : > { %v484_v4 = vmul.f32 0.03125, %v482_v3 }
 0x1e0   : > { %v485_v5 = vsub.f32 %v476_v1, %v484_v4 }
 0x1e2   : > { %v486_v6 = vmul.f32 %v485_v5, %v485_v5 }
 0x1e4   : > { %v487_v7 = vsel %vm479_vm0, %v486_v6, 0.0 }
 0x1e5   : > { %488 = vadd.xlane.f32.xlu0 %v487_v7 }
 0x272   : > { %v489_v10 = vpop.xlane.xlu0 %488 }
 0x273   : > { %v490_v11 = vmul.f32 0.03125, %v489_v10 }
 0x275   : > { %v491_v12 = vadd.f32 1e-05, %v490_v11 }
 0x277   : > { %3046 = vrsqrt.f32 %v491_v12 }
 0x281   : > { %v3047_v13 = vpop.eup %3046 }
 0x282   : > { %v493_v15 = vmul.f32 %v3047_v13, %v485_v5 }
 0x284   : > { %v500_v17 = vmul.f32 %v2455_v14, %v493_v15 }
 0x286   : > { %v507_v18 = vadd.f32 %v2456_v16, %v500_v17 }
 0x288   : > { %v508_v19 = vpack.c.bf16 %v507_v18, %v507_v18 }
 0x28a   : > { %510 = vst.msk [vmem:[#allocation2] sm:$0xf] %vm509_vm2, %v508_v19 }
 0x28b PF: > { %v524_v20 = vld [vmem:[%s408_s1] sm:$0xf]  ;;  %vm528_vm3 = vcmask 261120   ;;  %v3050_v28 = vld [vmem:[#allocation14] sm:$0xff]   ;;  %v3534_v29 = vmov 0.0   ;;  %v3051_v30 = vld [vmem:[#allocation14 + $0x8] sm:$0xff]   ;;  %v559_v2 = vlaneseq }
 0x28c   : > { %v525_v21 = vunpack.c.l.bf16 %v524_v20  ;;  %2625 = vmatprep.subr.bf16.mxu0 %v3534_v29  ;;  %2633 = vmatprep.subr.bf16.mxu1 %v3534_v29  ;;  %vm3535_vm4 = vmmov 0   ;;  %v3052_v32 = vld [vmem:[#allocation15] sm:$0xff]   ;;  %v3054_v34 = vld [vmem:[#allocation15 + $0x8] sm:$0xff]   ;;  %v2457_v40 = vld [vmem:[#allocation11] ss:$0 sm:$0xff]  ;;  %vm826_vm5 = vcmask 1043456  }
 0x28d   : > { %2626 = vmatpush3.bf16.msra.mxu0 %v3050_v28  ;;  %2629 = vmatprep.mubr.msk.bf16.mxu0 %vm3535_vm4, %v3534_v29  ;;  %v3053_v33 = vld [vmem:[#allocation17] sm:$0xff]   ;;  %v3055_v35 = vld [vmem:[#allocation17 + $0x8] sm:$0xff]   ;;  %v2458_v42 = vld [vmem:[#allocation12] ss:$0 sm:$0xff]  ;;  %s4398_s18 = sld [smem:[#allocation31_spill]]  ;;  %v560_v3 = vand.u32 127, %v559_v2 }
 0x28e   : > { %v529_v22 = vsel %vm528_vm3, %v525_v21, 0.0  ;;  %2627 = vmatprep.subr.bf16.mxu0 %v3534_v29  ;;  %2637 = vmatprep.mubr.msk.bf16.mxu1 %vm3535_vm4, %v3534_v29  ;;  %v3056_v62 = vld [vmem:[#allocation14 + $0x10] sm:$0xff]   ;;  %v3057_v63 = vld [vmem:[#allocation14 + $0x18] sm:$0xff]   ;;  %vm790_vm11 = vcmask 64512   ;;  %vm812_vm12 = vcmask 7168  }
 0x28f   : > { %530 = vadd.xlane.f32.xlu0 %v529_v22  ;;  %2634 = vmatpush3.bf16.msra.mxu1 %v3052_v32  ;;  %v3058_v0 = vld [vmem:[#allocation17 + $0x10] sm:$0xff]   ;;  %v3059_v1 = vld [vmem:[#allocation17 + $0x18] sm:$0xff]  }
 0x290   : > { %2635 = vmatprep.subr.bf16.mxu1 %v3534_v29 }
 0x291   : > { %2628 = vmatpush3.bf16.msra.mxu0 %v3051_v30  ;;  %v4025_v31 = vld [vmem:[#allocation2] sm:$0xf] }
 0x292   : > { %2641 = vmatprep.subr.bf16.mxu0 %v3534_v29 }
 0x293   : > { %2636 = vmatpush3.bf16.msra.mxu1 %v3054_v34  ;;  %s2459_s29 = sshll.u32 %s4398_s18, 3  ;;  %p2500_p0 = scmp.ne.s32.totalorder %s4398_s18, 2 }
 0x294   : > { %2630 = vmatmul.mubr.msk.bf16.vlgmr.msra.gmra.mrb[0].mxu0 %vm528_vm3, %v4025_v31  ;;  %2649 = vmatprep.subr.bf16.mxu1 %v3534_v29  ;;  %v561_v4 = vstv %s2459_s29  ;;  %vm3539_vm13 = vmmov (!%p2500_p0), 0   ;;  %vm2239_vm14 = vcmask (!%p2500_p0), 257024  }
 0x295   : > { %2642 = vmatpush3.bf16.msra.mxu0 %v3053_v33  ;;  %2645 = vmatprep.mubr.msk.bf16.mxu0 %vm3535_vm4, %v3534_v29  ;;  %v562_v5 = vadd.s32 %v561_v4, %v560_v3 }
 0x296   : > { %2643 = vmatprep.subr.bf16.mxu0 %v3534_v29 }
 0x297   : > { %vm564_vm6 = vcmp.ge.s32.totalorder %v562_v5, 8  ;;  %vm565_vm7 = vcmp.lt.s32.totalorder %v562_v5, 24  ;;  %vm563_vm8 = vcmp.eq.s32.totalorder %v562_v5, 0 }
 0x298   : > { %vm566_vm9 = vmand %vm564_vm6, %vm565_vm7 }
 0x299   : > { %2644 = vmatpush3.bf16.msra.mxu0 %v3055_v35  ;;  %vm4065_vm10 = vmor %vm563_vm8, %vm566_vm9  ;;  %v3060_v35 = vld [vmem:[#allocation15 + $0x10] sm:$0xff]  }
 0x29a   : > { %2655 = vmatprep.subr.bf16.mxu0 %v3534_v29 }
 0x31c   : > { %v531_v23 = vpop.xlane.xlu0 %530 }
 0x31d   : > { %v533_v24 = vmul.f32 0.03125, %v531_v23 }
 0x31f   : > { %v534_v25 = vsub.f32 %v525_v21, %v533_v24  ;;  %v3536_v24 = vmov 0  }
 0x320   : > { %3048 = vset.pattern.permute.xlu1 %v3536_v24  ;;  %3049 = vset.pattern.permute.xlu0 %v3536_v24 }
 0x321   : > { %v535_v26 = vmul.f32 %v534_v25, %v534_v25 }
 0x323   : > { %v536_v27 = vsel %vm528_vm3, %v535_v26, 0.0 }
 0x324   : > { %537 = vadd.xlane.f32.xlu0 %v536_v27 }
 0x367   : > { %v622_v46 = vpop.f32.mrb[0].mxu0 }
 0x368   : > { %v2631_v47 = vpop.f32.mrb[1].mxu0  ;;  %v743_v61 = vpack.c.bf16 %v622_v46, %v622_v46 }
 0x369   : > { %v625_v48 = vpop.f32.mrb[2].mxu0 }
 0x36a   : > { %v2632_v49 = vpop.f32.mrb[3].mxu0 }
 0x36b   : > { %v3062_v49 = vld [vmem:[#allocation14 + $0x20] sm:$0xff]  }
 0x3b1   : > { %v538_v36 = vpop.xlane.xlu0 %537 }
 0x3b2   : > { %v539_v37 = vmul.f32 0.03125, %v538_v36 }
 0x3b4   : > { %v540_v38 = vadd.f32 1e-05, %v539_v37  ;;  %v3061_v37 = vld [vmem:[#allocation15 + $0x18] sm:$0xff]  }
 0x3b6   : > { %3074 = vrsqrt.f32 %v540_v38 }
 0x3c0   : > { %v3075_v39 = vpop.eup %3074 }
 0x3c1   : > { %v542_v41 = vmul.f32 %v3075_v39, %v534_v25  ;;  %v4074_v25 = vld [vmem:[#allocation3] sm:$0xff] }
 0x3c3   : > { %v549_v43 = vmul.f32 %v2457_v40, %v542_v41 }
 0x3c5   : > { %v556_v44 = vadd.f32 %v2458_v42, %v549_v43 }
 0x3c7   : > { %v4037_v45 = vpack.c.bf16 %v556_v44, %v556_v44 }
 0x3c9   : > { %2638 = vmatmul.mubr.msk.bf16.vlgmr.msra.gmra.mrb[0].mxu1 %vm528_vm3, %v4037_v45  ;;  %2646 = vmatmul.mubr.msk.bf16.vlgmr.msra.gmra.mrb[4].mxu0 %vm528_vm3, %v4037_v45 }
 0x3ca   : > { %2651 = vmatprep.mubr.msk.bf16.mxu1 %vm3535_vm4, %v3534_v29  ;;  %2657 = vmatprep.mubr.msk.bf16.mxu0 %vm3535_vm4, %v3534_v29 }
 0x49c   : > { %v681_v50 = vpop.f32.mrb[0].mxu1  ;;  %v737_v51 = vpop.f32.mrb[4].mxu0 }
 0x49d   : > { %v744_v52 = vpack.c.bf16 %v681_v50, %v681_v50  ;;  %v822_v53 = vpack.c.bf16 %v737_v51, %v737_v51  ;;  %v2639_v54 = vpop.f32.mrb[1].mxu1  ;;  %v2647_v55 = vpop.f32.mrb[5].mxu0  ;;  %v3063_v50 = vld [vmem:[#allocation14 + $0x28] sm:$0xff]   ;;  %v3064_v51 = vld [vmem:[#allocation17 + $0x20] sm:$0xff]  }
 0x49e   : > { %v684_v56 = vpop.f32.mrb[2].mxu1  ;;  %v740_v57 = vpop.f32.mrb[6].mxu0 }
 0x49f   : > { %v828_v58 = vsel %vm826_vm5, %v822_v53, 0  ;;  %v2640_v59 = vpop.f32.mrb[3].mxu1  ;;  %v2648_v60 = vpop.f32.mrb[7].mxu0  ;;  %2650 = vmatpush3.bf16.xpose.msra.mxu1 %v744_v52  ;;  %v3065_v52 = vld [vmem:[#allocation17 + $0x28] sm:$0xff]  }
 0x4a0   : > { %2656 = vmatpush3.bf16.msra.mxu0 %v828_v58  ;;  %2661 = vmatprep.subr.bf16.mxu1 %v3534_v29 }
 0x4a1   : > { %2669 = vmatprep.subr.bf16.mxu0 %v3534_v29 }
 0x4a6   : > { %2652 = vmatmul.mubr.bf16.vlgmr.msra.gmra.mrb[4].mxu1 %v743_v61 }
 0x4a7   : > { %2662 = vmatpush3.bf16.msra.mxu1 %v3056_v62  ;;  %2665 = vmatprep.mubr.msk.bf16.mxu1 %vm3535_vm4, %v3534_v29 }
 0x4a8   : > { %2663 = vmatprep.subr.bf16.mxu1 %v3534_v29 }
 0x4ab   : > { %2664 = vmatpush3.bf16.msra.mxu1 %v3057_v63 }
 0x4ac   : > { %2677 = vmatprep.subr.bf16.mxu1 %v3534_v29 }
 0x4ae   : > { %2666 = vmatmul.mubr.msk.bf16.vlgmr.msra.gmra.mrb[8].mxu1 %vm528_vm3, %v4025_v31 }
 0x4af   : > { %2678 = vmatpush3.bf16.msra.mxu1 %v3058_v0  ;;  %2681 = vmatprep.mubr.msk.bf16.mxu1 %vm3535_vm4, %v3534_v29 }
 0x4b0   : > { %2679 = vmatprep.subr.bf16.mxu1 %v3534_v29 }
 0x4b3   : > { %2680 = vmatpush3.bf16.msra.mxu1 %v3059_v1 }
 0x4b4   : > { %2691 = vmatprep.subr.bf16.mxu1 %v3534_v29 }
 0x4b6   : > { %2682 = vmatmul.mubr.msk.bf16.vlgmr.msra.gmra.mrb[12].mxu1 %vm528_vm3, %v4037_v45 }
 0x4b7   : > { %2693 = vmatprep.mubr.msk.bf16.mxu1 %vm3535_vm4, %v3534_v29 }
 0x579   : > { %v779_v6 = vpop.f32.mrb[4].mxu1 }
 0x57a   : > { %v785_v8 = vmul.f32 0.35355338, %v779_v6  ;;  %v2653_v9 = vpop.f32.mrb[5].mxu1  ;;  %v4119_v6 = vld [vmem:[#allocation3 + $0x8] sm:$0xff] }
 0x57b   : > { %v782_v10 = vpop.f32.mrb[6].mxu1 }
 0x57c   : > { %v2654_v11 = vpop.f32.mrb[7].mxu1  ;;  %v788_v12 = vsel %vm4065_vm10, %v785_v8, -1e+30 }
 0x57d   : > { %v791_v13 = vsel %vm790_vm11, %v788_v12, -inf }
 0x57e   : > { %792 = vmax.xlane.f32.xlu1 %v791_v13 }
 0x581   : > { %v924_v14 = vpop.f32.mrb[8].mxu1 }
 0x582   : > { %v2667_v15 = vpop.f32.mrb[9].mxu1  ;;  %v1044_v48 = vpack.c.bf16 %v924_v14, %v924_v14 }
 0x583   : > { %v927_v16 = vpop.f32.mrb[10].mxu1  ;;  %v3066_v15 = vld [vmem:[#allocation15 + $0x20] sm:$0xff]  }
 0x584   : > { %v2668_v17 = vpop.f32.mrb[11].mxu1 }
 0x585   : > { %v3067_v17 = vld [vmem:[#allocation15 + $0x28] sm:$0xff]  }
 0x589   : > { %v1038_v18 = vpop.f32.mrb[12].mxu1 }
 0x58a   : > { %v1122_v19 = vpack.c.bf16 %v1038_v18, %v1038_v18  ;;  %v2683_v20 = vpop.f32.mrb[13].mxu1 }
 0x58b   : > { %v1041_v21 = vpop.f32.mrb[14].mxu1 }
 0x58c   : > { %v1127_v22 = vsel %vm826_vm5, %v1122_v19, 0  ;;  %v2684_v23 = vpop.f32.mrb[15].mxu1 }
 0x58d   : > { %2692 = vmatpush3.bf16.msra.mxu1 %v1127_v22 }
 0x58e   : > { %2705 = vmatprep.subr.bf16.mxu1 %v3534_v29 }
 0x60b   : > { %v793_v26 = vpop.xlane.xlu1 %792 }
 0x60c   : > { %v4077_v27 = vmax.f32 %v4074_v25, %v793_v26 }
 0x60e   : > { %v795_v28 = vsub.f32 %v4074_v25, %v4077_v27  ;;  %872 = vst.msk [vmem:[#allocation3] sm:$0xff] %vm812_vm12, %v4077_v27  ;;  %800 = vperm.xlu1 %3048, %v4077_v27   ;;  %v1106_v25 = vld [vmem:[#allocation4 + $0x8] sm:$0xff] }
 0x610   : > { %v796_v7 = vmul.f32 1.442695, %v795_v28 }
 0x68d   : > { %v801_v30 = vpop.permute.xlu1 %800 }
 0x68e   : > { %v803_v32 = vsub.f32 %v788_v12, %v801_v30 }
 0x690   : > { %v804_v33 = vmul.f32 1.442695, %v803_v32 }
 0x692   : > { %3076 = vpow2.f32 %v804_v33  ;;  %v3068_v33 = vld [vmem:[#allocation14 + $0x30] sm:$0xff]  }
 0x69c   : > { %v4084_v34 = vpop.eup %3076 }
 0x69d   : > { %v821_v36 = vpack.c.bf16 %v4084_v34, %v4084_v34 }
 0x69f   : > { %2658 = vmatmul.mubr.msk.bf16.vlgmr.msra.gmra.mrb[8].mxu0 %vm790_vm11, %v821_v36  ;;  %v3070_v36 = vld [vmem:[#allocation17 + $0x30] sm:$0xff]  }
 0x6a0   : > { %2670 = vmatpush3.bf16.msra.mxu0 %v3060_v35  ;;  %2673 = vmatprep.mubr.msk.bf16.mxu0 %vm3535_vm4, %v3534_v29  ;;  %v3069_v35 = vld [vmem:[#allocation14 + $0x38] sm:$0xff]  }
 0x6a1   : > { %2671 = vmatprep.subr.bf16.mxu0 %v3534_v29 }
 0x6a4   : > { %2672 = vmatpush3.bf16.msra.mxu0 %v3061_v37  ;;  %v3071_v37 = vld [vmem:[#allocation17 + $0x38] sm:$0xff]  }
 0x6a5   : > { %2685 = vmatprep.subr.bf16.mxu0 %v3534_v29 }
 0x6a7   : > { %2674 = vmatmul.mubr.msk.bf16.vlgmr.msra.gmra.mrb[12].mxu0 %vm528_vm3, %v4037_v45 }
 0x6a8   : > { %2687 = vmatprep.mubr.msk.bf16.mxu0 %vm3535_vm4, %v3534_v29 }
 0x772   : > { %v4097_v38 = vpop.f32.mrb[8].mxu0 }
 0x773   : > { %v2659_v39 = vpop.f32.mrb[9].mxu0 }
 0x774   : > { %v867_v40 = vpop.f32.mrb[10].mxu0 }
 0x775   : > { %v2660_v41 = vpop.f32.mrb[11].mxu0 }
 0x77a   : > { %v981_v42 = vpop.f32.mrb[12].mxu0 }
 0x77b   : > { %v1045_v43 = vpack.c.bf16 %v981_v42, %v981_v42  ;;  %v2675_v44 = vpop.f32.mrb[13].mxu0 }
 0x77c   : > { %v984_v46 = vpop.f32.mrb[14].mxu0 }
 0x77d   : > { %v2676_v47 = vpop.f32.mrb[15].mxu0  ;;  %2686 = vmatpush3.bf16.xpose.msra.mxu0 %v1045_v43 }
 0x77e   : > { %2697 = vmatprep.subr.bf16.mxu0 %v3534_v29 }
 0x784   : > { %2688 = vmatmul.mubr.bf16.vlgmr.msra.gmra.mrb[16].mxu0 %v1044_v48 }
 0x785   : > { %2698 = vmatpush3.bf16.msra.mxu0 %v3062_v49  ;;  %2701 = vmatprep.mubr.msk.bf16.mxu0 %vm3535_vm4, %v3534_v29 }
 0x786   : > { %2699 = vmatprep.subr.bf16.mxu0 %v3534_v29 }
 0x789   : > { %2700 = vmatpush3.bf16.msra.mxu0 %v3063_v50 }
 0x78a   : > { %2713 = vmatprep.subr.bf16.mxu0 %v3534_v29 }
 0x78c   : > { %2702 = vmatmul.mubr.msk.bf16.vlgmr.msra.gmra.mrb[20].mxu0 %vm528_vm3, %v4025_v31 }
 0x78d   : > { %2714 = vmatpush3.bf16.msra.mxu0 %v3064_v51  ;;  %2717 = vmatprep.mubr.msk.bf16.mxu0 %vm3535_vm4, %v3534_v29 }
 0x78e   : > { %2715 = vmatprep.subr.bf16.mxu0 %v3534_v29 }
 0x791   : > { %2716 = vmatpush3.bf16.msra.mxu0 %v3065_v52 }
 0x792   : > { %2727 = vmatprep.subr.bf16.mxu0 %v3534_v29 }
 0x794   : > { %2718 = vmatmul.mubr.msk.bf16.vlgmr.msra.gmra.mrb[24].mxu0 %vm528_vm3, %v4037_v45 }
 0x795   : > { %2729 = vmatprep.mubr.msk.bf16.mxu0 %vm3535_vm4, %v3534_v29 }
 0x857   : > { %v1080_v53 = vpop.f32.mrb[16].mxu0 }
 0x858   : > { %v1086_v54 = vmul.f32 0.35355338, %v1080_v53  ;;  %v2689_v55 = vpop.f32.mrb[17].mxu0 }
 0x859   : > { %v1083_v56 = vpop.f32.mrb[18].mxu0 }
 0x85a   : > { %v2690_v57 = vpop.f32.mrb[19].mxu0  ;;  %v1087_v58 = vsel %vm4065_vm10, %v1086_v54, -1e+30  ;;  %v1388_v56 = vld [vmem:[#allocation3 + $0x10] sm:$0xff] }
 0x85b   : > { %v1090_v59 = vsel %vm790_vm11, %v1087_v58, -inf }
 0x85c   : > { %1091 = vmax.xlane.f32.xlu0 %v1090_v59 }
 0x85f   : > { %v1223_v60 = vpop.f32.mrb[20].mxu0 }
 0x860   : > { %v2703_v61 = vpop.f32.mrb[21].mxu0  ;;  %v1343_v32 = vpack.c.bf16 %v1223_v60, %v1223_v60 }
 0x861   : > { %v1226_v62 = vpop.f32.mrb[22].mxu0 }
 0x862   : > { %v2704_v63 = vpop.f32.mrb[23].mxu0 }
 0x867   : > { %v1337_v0 = vpop.f32.mrb[24].mxu0 }
 0x868   : > { %v1421_v1 = vpack.c.bf16 %v1337_v0, %v1337_v0  ;;  %v2719_v2 = vpop.f32.mrb[25].mxu0  ;;  %v3072_v0 = vld [vmem:[#allocation15 + $0x30] sm:$0xff]  }
 0x869   : > { %v1340_v3 = vpop.f32.mrb[26].mxu0  ;;  %v3073_v2 = vld [vmem:[#allocation15 + $0x38] sm:$0xff]  }
 0x86a   : > { %v1426_v4 = vsel %vm826_vm5, %v1421_v1, 0  ;;  %v2720_v5 = vpop.f32.mrb[27].mxu0 }
 0x86b   : > { %2728 = vmatpush3.bf16.msra.mxu0 %v1426_v4 }
 0x86c   : > { %2741 = vmatprep.subr.bf16.mxu0 %v3534_v29 }
 0x8e9   : > { %v1092_v8 = vpop.xlane.xlu0 %1091 }
 0x8ea   : > { %v4122_v9 = vmax.f32 %v4119_v6, %v1092_v8 }
 0x8ec   : > { %v1094_v10 = vsub.f32 %v4119_v6, %v4122_v9  ;;  %1171 = vst.msk [vmem:[#allocation3 + $0x8] sm:$0xff] %vm812_vm12, %v4122_v9  ;;  %1099 = vperm.xlu0 %3049, %v4122_v9  }
 0x96b   : > { %v1100_v11 = vpop.permute.xlu0 %1099 }
 0x96c   : > { %v1102_v12 = vsub.f32 %v1087_v58, %v1100_v11 }
 0x96e   : > { %v1103_v13 = vmul.f32 1.442695, %v1102_v12 }
 0x970   : > { %3078 = vpow2.f32 %v1103_v13 }
 0x97a   : > { %v4129_v14 = vpop.eup %3078 }
 0x97b   : > { %v1121_v16 = vpack.c.bf16 %v4129_v14, %v4129_v14 }
 0x97d   : > { %2694 = vmatmul.mubr.msk.bf16.vlgmr.msra.gmra.mrb[16].mxu1 %vm790_vm11, %v1121_v16 }
 0x97e   : > { %2706 = vmatpush3.bf16.msra.mxu1 %v3066_v15  ;;  %2709 = vmatprep.mubr.msk.bf16.mxu1 %vm3535_vm4, %v3534_v29 }
 0x97f   : > { %2707 = vmatprep.subr.bf16.mxu1 %v3534_v29 }
 0x982   : > { %2708 = vmatpush3.bf16.msra.mxu1 %v3067_v17 }
 0x983   : > { %2721 = vmatprep.subr.bf16.mxu1 %v3534_v29 }
 0x985   : > { %2710 = vmatmul.mubr.msk.bf16.vlgmr.msra.gmra.mrb[20].mxu1 %vm528_vm3, %v4037_v45 }
 0x986   : > { %2723 = vmatprep.mubr.msk.bf16.mxu1 %vm3535_vm4, %v3534_v29 }
 0xa50   : > { %v4142_v18 = vpop.f32.mrb[16].mxu1 }
 0xa51   : > { %v2695_v19 = vpop.f32.mrb[17].mxu1 }
 0xa52   : > { %v1166_v20 = vpop.f32.mrb[18].mxu1 }
 0xa53   : > { %v2696_v21 = vpop.f32.mrb[19].mxu1 }
 0xa58   : > { %v1280_v22 = vpop.f32.mrb[20].mxu1 }
 0xa59   : > { %v1344_v23 = vpack.c.bf16 %v1280_v22, %v1280_v22  ;;  %v2711_v24 = vpop.f32.mrb[21].mxu1 }
 0xa5a   : > { %v1283_v26 = vpop.f32.mrb[22].mxu1  ;;  %v808_v24 = vsel %vm790_vm11, %v4084_v34, 0.0  ;;  %v1095_v34 = vmul.f32 1.442695, %v1094_v10  ;;  %v1405_v10 = vld [vmem:[#allocation4 + $0x10] sm:$0xff] }
 0xa5b   : > { %v2712_v30 = vpop.f32.mrb[23].mxu1  ;;  %2722 = vmatpush3.bf16.xpose.msra.mxu1 %v1344_v23  ;;  %v1108_v26 = vsel %vm790_vm11, %v4129_v14, 0.0 }
 0xa5c   : > { %2733 = vmatprep.subr.bf16.mxu1 %v3534_v29 }
 0xa62   : > { %2724 = vmatmul.mubr.bf16.vlgmr.msra.gmra.mrb[24].mxu1 %v1343_v32 }
 0xa63   : > { %2734 = vmatpush3.bf16.msra.mxu1 %v3068_v33  ;;  %2737 = vmatprep.mubr.msk.bf16.mxu1 %vm3535_vm4, %v3534_v29 }
 0xa64   : > { %2735 = vmatprep.subr.bf16.mxu1 %v3534_v29 }
 0xa67   : > { %2736 = vmatpush3.bf16.msra.mxu1 %v3069_v35  ;;  %v1687_v35 = vld [vmem:[#allocation3 + $0x18] sm:$0xff] }
 0xa68   : > { %2749 = vmatprep.subr.bf16.mxu1 %v3534_v29 }
 0xa6a   : > { %2738 = vmatmul.mubr.msk.bf16.vlgmr.msra.gmra.mrb[28].mxu1 %vm528_vm3, %v4025_v31 }
 0xa6b   : > { %2750 = vmatpush3.bf16.msra.mxu1 %v3070_v36  ;;  %2753 = vmatprep.mubr.msk.bf16.mxu1 %vm3535_vm4, %v3534_v29 }
 0xa6c   : > { %2751 = vmatprep.subr.bf16.mxu1 %v3534_v29 }
 0xa6f   : > { %2752 = vmatpush3.bf16.msra.mxu1 %v3071_v37  ;;  %v806_v37 = vld [vmem:[#allocation4] sm:$0xff] }
 0xa70   : > { %2763 = vmatprep.subr.bf16.mxu1 %v3534_v29 }
 0xa72   : > { %2754 = vmatmul.mubr.msk.bf16.vlgmr.msra.gmra.mrb[32].mxu1 %vm528_vm3, %v4037_v45 }
 0xa73   : > { %2765 = vmatprep.mubr.msk.bf16.mxu1 %vm3535_vm4, %v3534_v29 }
 0xb35   : > { %v1379_v39 = vpop.f32.mrb[24].mxu1 }
 0xb36   : > { %v1385_v40 = vmul.f32 0.35355338, %v1379_v39  ;;  %v2725_v41 = vpop.f32.mrb[25].mxu1 }
 0xb37   : > { %v1382_v31 = vpop.f32.mrb[26].mxu1 }
 0xb38   : > { %v2726_v42 = vpop.f32.mrb[27].mxu1  ;;  %v1386_v43 = vsel %vm4065_vm10, %v1385_v40, -1e+30 }
 0xb39   : > { %v1389_v44 = vsel %vm790_vm11, %v1386_v43, -inf }
 0xb3a   : > { %1390 = vmax.xlane.f32.xlu1 %v1389_v44 }
 0xb3d   : > { %v1522_v46 = vpop.f32.mrb[28].mxu1 }
 0xb3e   : > { %v2739_v47 = vpop.f32.mrb[29].mxu1  ;;  %v1642_v17 = vpack.c.bf16 %v1522_v46, %v1522_v46 }
 0xb3f   : > { %v1525_v48 = vpop.f32.mrb[30].mxu1 }
 0xb40   : > { %v2740_v49 = vpop.f32.mrb[31].mxu1  ;;  %v1413_v48 = vld [vmem:[#allocation5 + $0x10] sm:$0xff] }
 0xb45   : > { %v1636_v50 = vpop.f32.mrb[32].mxu1 }
 0xb46   : > { %v1720_v51 = vpack.c.bf16 %v1636_v50, %v1636_v50  ;;  %v2755_v52 = vpop.f32.mrb[33].mxu1 }
 0xb47   : > { %v1639_v53 = vpop.f32.mrb[34].mxu1 }
 0xb48   : > { %v1725_v54 = vsel %vm826_vm5, %v1720_v51, 0  ;;  %v2756_v55 = vpop.f32.mrb[35].mxu1 }
 0xb49   : > { %2764 = vmatpush3.bf16.msra.mxu1 %v1725_v54  ;;  %v814_v55 = vld [vmem:[#allocation5] sm:$0xff] }
 0xbc7   : > { %v1391_v57 = vpop.xlane.xlu1 %1390 }
 0xbc8   : > { %v1392_v58 = vmax.f32 %v1388_v56, %v1391_v57 }
 0xbca   : > { %v1393_v59 = vsub.f32 %v1388_v56, %v1392_v58  ;;  %1470 = vst.msk [vmem:[#allocation3 + $0x10] sm:$0xff] %vm812_vm12, %v1392_v58  ;;  %1398 = vperm.xlu0 %3049, %v1392_v58  }
 0xbcc   : > { %v1394_v32 = vmul.f32 1.442695, %v1393_v59  ;;  %v1114_v59 = vld [vmem:[#allocation5 + $0x8] sm:$0xff] }
 0xc49   : > { %v1399_v60 = vpop.permute.xlu0 %1398 }
 0xc4a   : > { %v1401_v61 = vsub.f32 %v1386_v43, %v1399_v60 }
 0xc4c   : > { %v1402_v62 = vmul.f32 1.442695, %v1401_v61 }
 0xc4e   : > { %3080 = vpow2.f32 %v1402_v62 }
 0xc4f   : > { %3082 = vpow2.f32 %v1394_v32  ;;  %v3097_v32 = vld [vmem:[#allocation18 + $0x50] sm:$0xff] (!%p2500_p0)  }
 0xc50   : > { %3084 = vpow2.f32 %v796_v7 }
 0xc51   : > { %3086 = vpow2.f32 %v1095_v34 }
 0xc58   : > { %v3081_v63 = vpop.eup %3080 }
 0xc59   : > { %v1420_v1 = vpack.c.bf16 %v3081_v63, %v3081_v63  ;;  %v1407_v30 = vsel %vm790_vm11, %v3081_v63, 0.0  ;;  %v3083_v33 = vpop.eup %3082 }
 0xc5a   : > { %v3085_v14 = vpop.eup %3084  ;;  %v1406_v44 = vmul.f32 %v3083_v33, %v1405_v10 }
 0xc5b   : > { %2730 = vmatmul.mubr.msk.bf16.vlgmr.msra.gmra.mrb[28].mxu0 %vm790_vm11, %v1420_v1  ;;  %v807_v41 = vmul.f32 %v3085_v14, %v806_v37  ;;  %v3087_v31 = vpop.eup %3086 }
 0xc5c   : > { %2742 = vmatpush3.bf16.msra.mxu0 %v3072_v0  ;;  %2745 = vmatprep.mubr.msk.bf16.mxu0 %vm3535_vm4, %v3534_v29  ;;  %v1107_v6 = vmul.f32 %v3087_v31, %v1106_v25  ;;  %v3108_v25 = vld [vmem:[#allocation18 + $0x30] sm:$0xff] (!%p2500_p0)  }
 0xc5d   : > { %2743 = vmatprep.subr.bf16.mxu0 %v3534_v29 }
 0xc60   : > { %2744 = vmatpush3.bf16.msra.mxu0 %v3073_v2 }
 0xc61   : > { %2757 = vmatprep.subr.bf16.mxu0 %v3534_v29 }
 0xc63   : > { %2746 = vmatmul.mubr.msk.bf16.vlgmr.msra.gmra.mrb[32].mxu0 %vm528_vm3, %v4037_v45 }
 0xc64   : > { %2759 = vmatprep.mubr.msk.bf16.mxu0 %vm3535_vm4, %v3534_v29 }
 0xd2e   : > { %v4173_v3 = vpop.f32.mrb[28].mxu0 }
 0xd2f   : > { %v2731_v4 = vpop.f32.mrb[29].mxu0 }
 0xd30   : > { %v1465_v5 = vpop.f32.mrb[30].mxu0 }
 0xd31   : > { %v2732_v8 = vpop.f32.mrb[31].mxu0 }
 0xd36   : > { %v1579_v11 = vpop.f32.mrb[32].mxu0 }
 0xd37   : > { %v1643_v12 = vpack.c.bf16 %v1579_v11, %v1579_v11  ;;  %v2747_v13 = vpop.f32.mrb[33].mxu0 }
 0xd38   : > { %v1582_v15 = vpop.f32.mrb[34].mxu0 }
 0xd39   : > { %v2748_v16 = vpop.f32.mrb[35].mxu0  ;;  %2758 = vmatpush3.bf16.xpose.msra.mxu0 %v1643_v12 }
 0xd40   : > { %2760 = vmatmul.mubr.bf16.vlgmr.msra.gmra.mrb[36].mxu0 %v1642_v17 }
 0xe13   : > { %v1678_v19 = vpop.f32.mrb[36].mxu0 }
 0xe14   : > { %v1684_v20 = vmul.f32 0.35355338, %v1678_v19  ;;  %v2761_v21 = vpop.f32.mrb[37].mxu0 }
 0xe15   : > { %v1681_v45 = vpop.f32.mrb[38].mxu0 }
 0xe16   : > { %v2762_v22 = vpop.f32.mrb[39].mxu0  ;;  %v1685_v29 = vsel %vm4065_vm10, %v1684_v20, -1e+30  ;;  %v3537_v45 = vmov (!%p2500_p0), 0  }
 0xe17   : > { %v1688_v23 = vsel %vm790_vm11, %v1685_v29, -inf }
 0xe18   : > { %1689 = vmax.xlane.f32.xlu1 %v1688_v23  ;;  %v3094_v23 = vld [vmem:[#allocation18 + $0x40] sm:$0xff] (!%p2500_p0)  }
 0xe1c   : > { %809 = vadd.xlane.f32.xlu1 %v808_v24  ;;  %v3095_v24 = vld [vmem:[#allocation18 + $0x48] sm:$0xff] (!%p2500_p0)  }
 0xe20   : > { %1109 = vadd.xlane.f32.xlu1 %v1108_v26  ;;  %v3096_v26 = vld [vmem:[#allocation18] sm:$0xff] (!%p2500_p0)  }
 0xe24   : > { %1408 = vadd.xlane.f32.xlu1 %v1407_v30  ;;  %v3098_v30 = vld [vmem:[#allocation18 + $0x8] sm:$0xff] (!%p2500_p0)  }
 0xe35   : > { %1416 = vperm.xlu1 %3048, %v3083_v33   ;;  %v3100_v33 = vld [vmem:[#allocation18 + $0x10] sm:$0xff] (!%p2500_p0)  }
 0xea5   : > { %v1690_v36 = vpop.xlane.xlu1 %1689 }
 0xea6   : > { %v1691_v39 = vmax.f32 %v1687_v35, %v1690_v36  ;;  %v3102_v36 = vld [vmem:[#allocation18 + $0x18] sm:$0xff] (!%p2500_p0)  }
 0xea8   : > { %v1692_v40 = vsub.f32 %v1687_v35, %v1691_v39  ;;  %1769 = vst.msk [vmem:[#allocation3 + $0x18] sm:$0xff] %vm812_vm12, %v1691_v39  ;;  %1697 = vperm.xlu0 %3049, %v1691_v39   ;;  %v3099_v35 = vld [vmem:[#allocation18 + $0x58] sm:$0xff] (!%p2500_p0)   ;;  %v3101_v39 = vld [vmem:[#allocation18 + $0x60] sm:$0xff] (!%p2500_p0)  }
 0xea9   : > { %v810_v42 = vpop.xlane.xlu1 %809 }
 0xeaa   : > { %v1693_v27 = vmul.f32 1.442695, %v1692_v40  ;;  %v811_v28 = vadd.f32 %v810_v42, %v807_v41  ;;  %v3104_v40 = vld [vmem:[#allocation18 + $0x20] sm:$0xff] (!%p2500_p0)   ;;  %v3103_v41 = vld [vmem:[#allocation18 + $0x68] sm:$0xff] (!%p2500_p0)   ;;  %v3105_v42 = vld [vmem:[#allocation18 + $0x70] sm:$0xff] (!%p2500_p0)  }
 0xeac   : > { %3088 = vpow2.f32 %v1693_v27  ;;  %813 = vst.msk [vmem:[#allocation4] sm:$0xff] %vm812_vm12, %v811_v28  ;;  %817 = vperm.xlu0 %3049, %v3085_v14   ;;  %v3107_v27 = vld [vmem:[#allocation18 + $0x78] sm:$0xff] (!%p2500_p0)  }
 0xead   : > { %v1110_v9 = vpop.xlane.xlu1 %1109  ;;  %v3109_v28 = vld [vmem:[#allocation18 + $0x38] sm:$0xff] (!%p2500_p0)  }
 0xeae   : > { %v1111_v43 = vadd.f32 %v1110_v9, %v1107_v6 }
 0xeb0   : > { %1112 = vst.msk [vmem:[#allocation4 + $0x8] sm:$0xff] %vm812_vm12, %v1111_v43  ;;  %1117 = vperm.xlu0 %3049, %v3087_v31   ;;  %v3106_v31 = vld [vmem:[#allocation18 + $0x28] sm:$0xff] (!%p2500_p0)  }
 0xeb1   : > { %v1409_v46 = vpop.xlane.xlu1 %1408 }
 0xeb2   : > { %v1410_v47 = vadd.f32 %v1409_v46, %v1406_v44  ;;  %v3110_v44 = vld [vmem:[#allocation18 + $0x80] sm:$0xff] (!%p2500_p0)  }
 0xeb3   : > { %v1775_v20 = vld [vmem:[#allocation4] sm:$0xff] (!%p2500_p0) }
 0xeb4   : > { %1411 = vst.msk [vmem:[#allocation4 + $0x10] sm:$0xff] %vm812_vm12, %v1410_v47  ;;  %3092 = vset.pattern.permute.xlu0 (!%p2500_p0), %v3537_v45 }
 0xeb5   : > { %v1417_v49 = vpop.permute.xlu1 %1416 }
 0xeb6   : > { %v3089_v50 = vpop.eup %3088  ;;  %v1419_v51 = vmul.f32 %v1417_v49, %v1413_v48  ;;  %v3111_v49 = vld [vmem:[#allocation18 + $0x88] sm:$0xff] (!%p2500_p0)  }
 0xeb7   : > { %1715 = vperm.xlu1 %3048, %v3089_v50   ;;  %v1801_v19 = vld [vmem:[#allocation4 + $0x8] sm:$0xff] (!%p2500_p0) }
 0xeb8   : > { %v1468_v52 = vadd.f32 %v4173_v3, %v1419_v51  ;;  %v1704_v3 = vld [vmem:[#allocation4 + $0x18] sm:$0xff] }
 0xeb9   : > { %v1705_v4 = vmul.f32 %v3089_v50, %v1704_v3  ;;  %v3112_v50 = vld [vmem:[#allocation18 + $0xc0] sm:$0xff] (!%p2500_p0)  }
 0xeba   : > { %1469 = vst [vmem:[#allocation5 + $0x10] sm:$0xff] %v1468_v52  ;;  %v3113_v52 = vld [vmem:[#allocation18 + $0x90] sm:$0xff] (!%p2500_p0)  }
 0xebb   : > { %v2004_v21 = vld [vmem:[#allocation4 + $0x10] sm:$0xff] (!%p2500_p0)  ;;  %3093 = vset.pattern.permute.xlu1 (!%p2500_p0), %v3537_v45 }
 0xf27   : > { %v1698_v53 = vpop.permute.xlu0 %1697 }
 0xf28   : > { %v1700_v54 = vsub.f32 %v1685_v29, %v1698_v53  ;;  %v3538_v29 = vmov (!%p2500_p0), 0.0   ;;  %v3114_v53 = vld [vmem:[#allocation18 + $0xc8] sm:$0xff] (!%p2500_p0)  }
 0xf29   : > { %2769 = vmatprep.subr.bf16.mxu0 (!%p2500_p0), %v3538_v29  ;;  %2789 = vmatprep.subr.bf16.mxu1 (!%p2500_p0), %v3538_v29 }
 0xf2a   : > { %v1701_v56 = vmul.f32 1.442695, %v1700_v54  ;;  %2770 = vmatpush3.bf16.msra.mxu0 (!%p2500_p0), %v3094_v23  ;;  %2785 = vmatprep.mubr.msk.bf16.mxu0 (!%p2500_p0), %vm3539_vm13, %v3538_v29  ;;  %v3115_v54 = vld [vmem:[#allocation18 + $0x98] sm:$0xff] (!%p2500_p0)  }
 0xf2b   : > { %v818_v57 = vpop.permute.xlu0 %817  ;;  %2771 = vmatprep.subr.bf16.mxu0 (!%p2500_p0), %v3538_v29 }
 0xf2c   : > { %3090 = vpow2.f32 %v1701_v56  ;;  %v820_v58 = vmul.f32 %v818_v57, %v814_v55  ;;  %v3116_v55 = vld [vmem:[#allocation18 + $0xd0] sm:$0xff] (!%p2500_p0)   ;;  %v3117_v56 = vld [vmem:[#allocation18 + $0xa0] sm:$0xff] (!%p2500_p0)   ;;  %v3118_v57 = vld [vmem:[#allocation18 + $0xd8] sm:$0xff] (!%p2500_p0)  }
 0xf2d   : > { %3126 = vrcp.f32 (!%p2500_p0), %v1801_v19 }
 0xf2e   : > { %v870_v60 = vadd.f32 %v4097_v38, %v820_v58  ;;  %v1712_v38 = vld [vmem:[#allocation5 + $0x18] sm:$0xff]  ;;  %3128 = vrcp.f32 (!%p2500_p0), %v1775_v20  ;;  %2772 = vmatpush3.bf16.msra.mxu0 (!%p2500_p0), %v3095_v24 }
 0xf2f   : > { %v1118_v61 = vpop.permute.xlu0 %1117  ;;  %3130 = vrcp.f32 (!%p2500_p0), %v2004_v21  ;;  %2773 = vmatprep.subr.bf16.mxu0 (!%p2500_p0), %v3538_v29  ;;  %v3119_v58 = vld [vmem:[#allocation18 + $0xa8] sm:$0xff] (!%p2500_p0)  }
 0xf30   : > { %871 = vst [vmem:[#allocation5] sm:$0xff] %v870_v60  ;;  %v1120_v62 = vmul.f32 %v1118_v61, %v1114_v59  ;;  %v3120_v59 = vld [vmem:[#allocation18 + $0xe0] sm:$0xff] (!%p2500_p0)  }
 0xf31   : > { %v2003_v60 = vld [vmem:[#allocation5 + $0x10] sm:$0xff] (!%p2500_p0) }
 0xf32   : > { %v1169_v63 = vadd.f32 %v4142_v18, %v1120_v62  ;;  %2774 = vmatpush3.bf16.msra.mxu0 (!%p2500_p0), %v3097_v32  ;;  %v3121_v62 = vld [vmem:[#allocation18 + $0xb0] sm:$0xff] (!%p2500_p0)  }
 0xf33   : > { %2775 = vmatprep.subr.bf16.mxu0 (!%p2500_p0), %v3538_v29 }
 0xf34   : > { %1170 = vst [vmem:[#allocation5 + $0x8] sm:$0xff] %v1169_v63  ;;  %v3122_v63 = vld [vmem:[#allocation18 + $0xe8] sm:$0xff] (!%p2500_p0)  }
 0xf36   : > { %v3091_v0 = vpop.eup %3090  ;;  %v1716_v11 = vpop.permute.xlu1 %1715  ;;  %2776 = vmatpush3.bf16.msra.mxu0 (!%p2500_p0), %v3099_v35 }
 0xf37   : > { %v1706_v1 = vsel %vm790_vm11, %v3091_v0, 0.0  ;;  %v1719_v2 = vpack.c.bf16 %v3091_v0, %v3091_v0  ;;  %v1718_v12 = vmul.f32 %v1716_v11, %v1712_v38  ;;  %v3127_v7 = vpop.eup (!%p2500_p0), %3126  ;;  %2777 = vmatprep.subr.bf16.mxu0 (!%p2500_p0), %v3538_v29  ;;  %v1774_v43 = vld [vmem:[#allocation5] sm:$0xff] (!%p2500_p0) }
 0xf38   : > { %1707 = vadd.xlane.f32.xlu0 %v1706_v1  ;;  %v3129_v34 = vpop.eup (!%p2500_p0), %3128  ;;  %v3123_v1 = vld [vmem:[#allocation18 + $0xb8] sm:$0xff] (!%p2500_p0)  }
 0xf39   : > { %2766 = vmatmul.mubr.msk.bf16.vlgmr.msra.gmra.mrb[36].mxu1 %vm790_vm11, %v1719_v2  ;;  %v3131_v14 = vpop.eup (!%p2500_p0), %3130  ;;  %v3124_v2 = vld [vmem:[#allocation18 + $0xf0] sm:$0xff] (!%p2500_p0)  }
 0xf3a   : > { %2790 = vmatpush3.bf16.msra.mxu1 (!%p2500_p0), %v3096_v26  ;;  %2008 = vperm.xlu1 (!%p2500_p0), %3093, %v3131_v14  }
 0xf3b   : > { %2791 = vmatprep.subr.bf16.mxu1 (!%p2500_p0), %v3538_v29  ;;  %2805 = vmatprep.mubr.msk.bf16.mxu1 (!%p2500_p0), %vm3539_vm13, %v3538_v29  ;;  %v1800_v6 = vld [vmem:[#allocation5 + $0x8] sm:$0xff] (!%p2500_p0) }
 0xf3c   : > { %2778 = vmatpush3.bf16.msra.mxu0 (!%p2500_p0), %v3101_v39 }
 0xf3d   : > { %2779 = vmatprep.subr.bf16.mxu0 (!%p2500_p0), %v3538_v29 }
 0xf3e   : > { %2792 = vmatpush3.bf16.msra.mxu1 (!%p2500_p0), %v3098_v30 }
 0xf3f   : > { %2793 = vmatprep.subr.bf16.mxu1 (!%p2500_p0), %v3538_v29 }
 0xf40   : > { %2780 = vmatpush3.bf16.msra.mxu0 (!%p2500_p0), %v3103_v41 }
 0xf41   : > { %2781 = vmatprep.subr.bf16.mxu0 (!%p2500_p0), %v3538_v29 }
 0xf42   : > { %2794 = vmatpush3.bf16.msra.mxu1 (!%p2500_p0), %v3100_v33 }
 0xf43   : > { %2795 = vmatprep.subr.bf16.mxu1 (!%p2500_p0), %v3538_v29 }
 0xf44   : > { %2782 = vmatpush3.bf16.msra.mxu0 (!%p2500_p0), %v3105_v42 }
 0xf45   : > { %2783 = vmatprep.subr.bf16.mxu0 (!%p2500_p0), %v3538_v29 }
 0xf46   : > { %2796 = vmatpush3.bf16.msra.mxu1 (!%p2500_p0), %v3102_v36 }
 0xf47   : > { %2797 = vmatprep.subr.bf16.mxu1 (!%p2500_p0), %v3538_v29 }
 0xf48   : > { %2784 = vmatpush3.bf16.msra.mxu0 (!%p2500_p0), %v3107_v27 }
 0xf49   : > { %2809 = vmatprep.subr.bf16.mxu0 (!%p2500_p0), %v3538_v29 }
 0xf4a   : > { %2798 = vmatpush3.bf16.msra.mxu1 (!%p2500_p0), %v3104_v40 }
 0xf4b   : > { %2799 = vmatprep.subr.bf16.mxu1 (!%p2500_p0), %v3538_v29 }
 0xf4e   : > { %1805 = vperm.xlu0 (!%p2500_p0), %3092, %v3127_v7   ;;  %2800 = vmatpush3.bf16.msra.mxu1 (!%p2500_p0), %v3106_v31 }
 0xf4f   : > { %2801 = vmatprep.subr.bf16.mxu1 (!%p2500_p0), %v3538_v29 }
 0xf52   : > { %1779 = vperm.xlu0 (!%p2500_p0), %3092, %v3129_v34   ;;  %2802 = vmatpush3.bf16.msra.mxu1 (!%p2500_p0), %v3108_v25 }
 0xf53   : > { %2803 = vmatprep.subr.bf16.mxu1 (!%p2500_p0), %v3538_v29 }
 0xf56   : > { %2804 = vmatpush3.bf16.msra.mxu1 (!%p2500_p0), %v3109_v28 }
 0xf57   : > { %2829 = vmatprep.subr.bf16.mxu1 (!%p2500_p0), %v3538_v29 }
 0xfb9   : > { %v2009_v61 = vpop.permute.xlu1 (!%p2500_p0), %2008 }
 0xfba   : > { %v2011_v0 = vmul.f32 (!%p2500_p0), %v2009_v61, %v2003_v60 }
 0xfc5   : > { %v1708_v5 = vpop.xlane.xlu0 %1707 }
 0xfc6   : > { %v1709_v8 = vadd.f32 %v1708_v5, %v1705_v4  ;;  %v2012_v5 = vpack.c.bf16 (!%p2500_p0), %v2011_v0, %v2011_v0 }
 0xfc8   : > { %1710 = vst.msk [vmem:[#allocation4 + $0x18] sm:$0xff] %vm812_vm12, %v1709_v8  ;;  %v3125_v8 = vld [vmem:[#allocation18 + $0xf8] sm:$0xff] (!%p2500_p0)  }
 0xfcd   : > { %v1806_v9 = vpop.permute.xlu0 (!%p2500_p0), %1805 }
 0xfce   : > { %v1808_v10 = vmul.f32 (!%p2500_p0), %v1806_v9, %v1800_v6 }
 0xfcf   : > { %v2120_v22 = vld [vmem:[#allocation4 + $0x18] sm:$0xff] (!%p2500_p0) }
 0xfd0   : > { %3132 = vrcp.f32 (!%p2500_p0), %v2120_v22  ;;  %v1809_v46 = vpack.c.bf16 (!%p2500_p0), %v1808_v10, %v1808_v10  ;;  %v2235_v22 = vld [vmem:[%s3980_s11] sm:$0xf] (!%p2500_p0) }
 0xfd1   : > { %v1780_v47 = vpop.permute.xlu0 (!%p2500_p0), %1779  ;;  %v2236_v30 = vunpack.c.l.bf16 (!%p2500_p0), %v2235_v22 }
 0xfd2   : > { %v1782_v48 = vmul.f32 (!%p2500_p0), %v1780_v47, %v1774_v43  ;;  %2786 = vmatmul.mubr.bf16.vlgmr.msra.gmra.mrb[0].mxu0 (!%p2500_p0), %v1809_v46 }
 0xfd3   : > { %2810 = vmatpush3.bf16.msra.mxu0 (!%p2500_p0), %v3110_v44  ;;  %2825 = vmatprep.mubr.msk.bf16.mxu0 (!%p2500_p0), %vm3539_vm13, %v3538_v29 }
 0xfd4   : > { %v1783_v51 = vpack.c.bf16 (!%p2500_p0), %v1782_v48, %v1782_v48  ;;  %2811 = vmatprep.subr.bf16.mxu0 (!%p2500_p0), %v3538_v29 }
 0xfd6   : > { %2806 = vmatmul.mubr.bf16.vlgmr.msra.gmra.mrb[0].mxu1 (!%p2500_p0), %v1783_v51 }
 0xfd7   : > { %2812 = vmatpush3.bf16.msra.mxu0 (!%p2500_p0), %v3111_v49  ;;  %2830 = vmatpush3.bf16.msra.mxu1 (!%p2500_p0), %v3112_v50 }
 0xfd8   : > { %2813 = vmatprep.subr.bf16.mxu0 (!%p2500_p0), %v3538_v29  ;;  %2831 = vmatprep.subr.bf16.mxu1 (!%p2500_p0), %v3538_v29 }
 0xfd9   : > { %2845 = vmatprep.mubr.msk.bf16.mxu1 (!%p2500_p0), %vm3539_vm13, %v3538_v29 }
 0xfda   : > { %v3133_v37 = vpop.eup (!%p2500_p0), %3132 }
 0xfdb   : > { %2124 = vperm.xlu1 (!%p2500_p0), %3093, %v3133_v37   ;;  %2814 = vmatpush3.bf16.msra.mxu0 (!%p2500_p0), %v3113_v52 }
 0xfdc   : > { %2832 = vmatpush3.bf16.msra.mxu1 (!%p2500_p0), %v3114_v53  ;;  %2815 = vmatprep.subr.bf16.mxu0 (!%p2500_p0), %v3538_v29 }
 0xfdd   : > { %2833 = vmatprep.subr.bf16.mxu1 (!%p2500_p0), %v3538_v29 }
 0xfdf   : > { %2816 = vmatpush3.bf16.msra.mxu0 (!%p2500_p0), %v3115_v54 }
 0xfe0   : > { %2834 = vmatpush3.bf16.msra.mxu1 (!%p2500_p0), %v3116_v55  ;;  %2817 = vmatprep.subr.bf16.mxu0 (!%p2500_p0), %v3538_v29 }
 0xfe1   : > { %2835 = vmatprep.subr.bf16.mxu1 (!%p2500_p0), %v3538_v29 }
 0xfe3   : > { %2818 = vmatpush3.bf16.msra.mxu0 (!%p2500_p0), %v3117_v56 }
 0xfe4   : > { %2836 = vmatpush3.bf16.msra.mxu1 (!%p2500_p0), %v3118_v57  ;;  %2819 = vmatprep.subr.bf16.mxu0 (!%p2500_p0), %v3538_v29 }
 0xfe5   : > { %2837 = vmatprep.subr.bf16.mxu1 (!%p2500_p0), %v3538_v29 }
 0xfe7   : > { %2820 = vmatpush3.bf16.msra.mxu0 (!%p2500_p0), %v3119_v58 }
 0xfe8   : > { %2838 = vmatpush3.bf16.msra.mxu1 (!%p2500_p0), %v3120_v59  ;;  %2821 = vmatprep.subr.bf16.mxu0 (!%p2500_p0), %v3538_v29 }
 0xfe9   : > { %2839 = vmatprep.subr.bf16.mxu1 (!%p2500_p0), %v3538_v29 }
 0xfeb   : > { %2822 = vmatpush3.bf16.msra.mxu0 (!%p2500_p0), %v3121_v62 }
 0xfec   : > { %2840 = vmatpush3.bf16.msra.mxu1 (!%p2500_p0), %v3122_v63  ;;  %2823 = vmatprep.subr.bf16.mxu0 (!%p2500_p0), %v3538_v29 }
 0xfed   : > { %2841 = vmatprep.subr.bf16.mxu1 (!%p2500_p0), %v3538_v29 }
 0xfef   : > { %2824 = vmatpush3.bf16.msra.mxu0 (!%p2500_p0), %v3123_v1 }
 0xff0   : > { %2842 = vmatpush3.bf16.msra.mxu1 (!%p2500_p0), %v3124_v2 }
 0xff1   : > { %2843 = vmatprep.subr.bf16.mxu1 (!%p2500_p0), %v3538_v29 }
 0xff2   : > { %2826 = vmatmul.mubr.bf16.vlgmr.msra.gmra.mrb[4].mxu0 (!%p2500_p0), %v2012_v5 }
 0xff4   : > { %2844 = vmatpush3.bf16.msra.mxu1 (!%p2500_p0), %v3125_v8 }
0x1009   : > { %1773 = sbr.rel (%p2500_p0) target bundleno = 4410 (0x113a), region = 92 }
0x100c   : > { %v1761_v13 = vpop.f32.mrb[36].mxu1 }
0x100d   : > { %v1767_v15 = vadd.f32 %v1761_v13, %v1718_v12  ;;  %v2767_v18 = vpop.f32.mrb[37].mxu1 }
0x100e   : > { %v1764_v16 = vpop.f32.mrb[38].mxu1 }
0x100f   : > { %1768 = vst [vmem:[#allocation5 + $0x18] sm:$0xff] %v1767_v15  ;;  %v2768_v17 = vpop.f32.mrb[39].mxu1 }
0x1016   : > { %v2119_v3 = vld [vmem:[#allocation5 + $0x18] sm:$0xff] }
0x105a   : > { %v2125_v4 = vpop.permute.xlu1 %2124 }
0x105b   : > { %v2127_v38 = vmul.f32 %v2125_v4, %v2119_v3 }
0x105d   : > { %v2128_v11 = vpack.c.bf16 %v2127_v38, %v2127_v38 }
0x105f   : > { %2846 = vmatmul.mubr.bf16.vlgmr.msra.gmra.mrb[4].mxu1 %v2128_v11 }
0x10a5   : > { %v1909_v12 = vpop.f32.mrb[0].mxu0 }
0x10a6   : > { %v2787_v13 = vpop.f32.mrb[1].mxu0 }
0x10a7   : > { %v1912_v15 = vpop.f32.mrb[2].mxu0 }
0x10a8   : > { %v2788_v18 = vpop.f32.mrb[3].mxu0 }
0x10a9   : > { %v1997_v16 = vpop.f32.mrb[0].mxu1 }
0x10aa   : > { %v1998_v17 = vadd.f32 %v1997_v16, %v1909_v12  ;;  %v2807_v19 = vpop.f32.mrb[1].mxu1 }
0x10ab   : > { %v2000_v20 = vpop.f32.mrb[2].mxu1 }
0x10ac   : > { %v2808_v21 = vpop.f32.mrb[3].mxu1 }
0x10c5   : > { %v2112_v45 = vpop.f32.mrb[4].mxu0 }
0x10c6   : > { %v2118_v23 = vadd.f32 %v2112_v45, %v1998_v17  ;;  %v2827_v24 = vpop.f32.mrb[5].mxu0 }
0x10c7   : > { %v2115_v26 = vpop.f32.mrb[6].mxu0 }
0x10c8   : > { %v2828_v29 = vpop.f32.mrb[7].mxu0 }
0x1132   : > { %v2228_v32 = vpop.f32.mrb[4].mxu1 }
0x1133   : > { %v2234_v33 = vadd.f32 %v2228_v32, %v2118_v23  ;;  %v2847_v7 = vpop.f32.mrb[5].mxu1 }
0x1134   : > { %v2231_v34 = vpop.f32.mrb[6].mxu1 }
0x1135   : > { %v2237_v35 = vadd.f32 %v2236_v30, %v2234_v33  ;;  %v2848_v14 = vpop.f32.mrb[7].mxu1 }
0x1137   : > { %v2238_v36 = vpack.c.bf16 %v2237_v35, %v2237_v35 }
0x1139   : > { %2240 = vst.msk [vmem:[%s4011_s23] sm:$0xf] %vm2239_vm14, %v2238_v36 }
0x113a PF: > { %s4401_s13 = sld [smem:[#allocation33_spill]]  ;;  %s4402_s24 = sld [smem:[#allocation32_spill]] }
0x113b   : > { %s2257_s5 = sshll.u32 %s4011_s23, 4  ;;  %s4403_s25 = sld [smem:[#allocation45_spill]]  ;;  %s4245_s5 = int_to_ptr.vmem [resolvable:$true] %s2257_s5 }
0x113c   : > { %s2242_s0 = scalar_lea.sflag [#allocation8], %s3976_s6  ;;  %s3362_s12 = scalar_lea.vmem %s4245_s5, 64 }
0x113d   : > { %p3363_p8 = scmp.ne.s32.totalorder %s4245_s5, %s3362_s12  ;;  %p4404_p10 = scmp.ne.s32.totalorder %s4367_s27, 0 }
0x113e   : > { %s3540_s1 = smov [#allocation20]  }
0x113f   : > { %p3364_p13 = pnand %p3363_p8, %p4404_p10  ;;  %s3366_s19 = sshll.u32 %s3540_s1, 4  ;;  %s3367_s19 = int_to_ptr.vmem [resolvable:$false] %s3366_s19 }
0x1140   : > { %s2851_s2 = smul.u32 3, %s4401_s13  ;;  %s3368_s23 = scalar_lea.vmem %s3367_s19, 128 }
0x1141   : > { %p3365_p4 = pneg %p3364_p13  ;;  %p3369_p3 = scmp.lt.s32.totalorder %s4245_s5, %s3367_s19 }
0x1142   : > { %s2253_s7 = sadd.s32 %s4402_s24, %s2851_s2  ;;  %p3370_p11 = scmp.lt.s32.totalorder %s3368_s23, %s3362_s12 }
0x1143   : > { %s2534_s8 = sshll.u32 %s2253_s7, 6 }
0x1144   : > { %s2255_s3 = scalar_lea.hbm %s4403_s25, %s2534_s8  ;;  %p3371_p5 = por %p3370_p11, %p3369_p3 }
0x1146   : > { %p3372_p2 = pnand %p3371_p5, %p3365_p4 }
0x1148   : > { %3375 = shalt.err (!%p3372_p2)
}
0x1149   : > { %s3376_s18 = scalar_lea.hbm %s2255_s3, 64  ;;  %s3380_s13 = scalar_lea.hbm %s4403_s25, 384 }
0x114a   : > { %p3377_p7 = scmp.ne.s32.totalorder %s2255_s3, %s3376_s18  ;;  %p3381_p6 = scmp.lt.u32.totalorder %s2255_s3, %s4403_s25 }
0x114b   : > { %p3382_p12 = scmp.lt.u32.totalorder %s3380_s13, %s3376_s18  ;;  %p3384_p8 = scmp.lt.u32.totalorder %s3376_s18, %s2255_s3 }
0x114c   : > { %p3378_p9 = pnand %p3377_p7, %p4404_p10 }
0x114d   : > { %p3383_p0 = por %p3382_p12, %p3381_p6 }
0x114e   : > { %p3379_p1 = pneg %p3378_p9 }
0x114f   : > { %p3385_p13 = por %p3384_p8, %p3383_p0 }
0x1151   : > { %p3386_p4 = pnand %p3385_p13, %p3379_p1 }
0x1153   : > { %3389 = shalt.err (!%p3386_p4)
}
0x1154   : > { %2880 = dma.vmem_to_hbm [thread:$0]  (%p4404_p10), %s4245_s5, 64, %s2255_s3, %s2242_s0  }
0x1155 PF: > { %p2925_p3 = scmp.ge.s32.totalorder %s3520_s17, 2  ;;  %s2269_s7 = sand.u32 1, %s3484_s30  }
0x1156   : > { %p4405_p11 = scmp.ne.s32.totalorder %s4368_s26, 0  ;;  %s2270_s8 = scalar_lea.sflag [#allocation8], %s2269_s7 }
0x1158   : > { %p2909_p5 = pnand %p2925_p3, %p4405_p11 }
0x115a   : > { %3467 = dma.done.wait (!%p2909_p5), %s2270_s8, 64  }
0x115b   : > { %3469 = vsyncadd (!%p2909_p5), %s2270_s8, 4294967232  ;;  %s30_s17 = sadd.s32 1, %s3520_s17   ;;  %s4407_s27 = sld [smem:[#allocation29_spill]] }
0x115c   : > { %p4272_p2 = scmp.ge.s32.totalorder %s30_s17, 20   ;;  %s4408_s21 = sld [smem:[#allocation30_spill]] }
0x115d   : > { %s4409_s5 = smov %s4435_s28  ;;  %s4410_s26 = sld [smem:[#allocation35_spill]] }
0x115e   : > { %s4411_s3 = sld [smem:[#allocation36_spill]]  ;;  %s4414_s29 = smov %s4409_s5 }
0x115f   : > { %s4415_s30 = smov %s3488_s9  ;;  %s4416_s9 = smov %s3492_s10 }
0x1160   : > { %s4417_s10 = smov %s3941_s4  ;;  %s4418_s11 = smov %s3508_s14 }
0x1161   : > { %s4419_s12 = smov %s3512_s15  ;;  %s4420_s13 = smov %s3516_s16 }
0x1162   : > { %s4413_s28 = smov %s4408_s21  ;;  %s4423_s16 = smov %s4433_s20 }
0x1163   : > { %s4421_s14 = smov %s4410_s26  ;;  %29 = sbr.rel (!%p4272_p2) target bundleno = 25 (0x19), region = 163 }
0x1164   : > { %s4422_s15 = smov %s4411_s3 }
0x116a   :  { %2275 = vsyncpa [#allocation7], 1 }
0x116b   :  { %2277 = vsyncpa [#allocation7 + $0x1], 1 }
0x116c   :  { %2278 = vsyncpa [#allocation10], 1 }
0x116d   :  { %2280 = vsyncpa [#allocation10 + $0x1], 1 }
0x116e   :  { %2281 = vsyncpa [#allocation13], 1 }
0x116f   :  { %2282 = vsyncpa [#allocation16], 1 }
0x1170   :  { %2283 = vsyncpa [#allocation19], 1 }
0x1171   :  { %2284 = vsyncpa [#allocation8], 1 }
0x1172   :  { %2286 = vsyncpa [#allocation8 + $0x1], 1 }

</bundles_post_ra>
